<compile_context>
chip_gen: v7x
topology: tpu7x:2x2x1
jax: 0.10.0
libtpu: 0.0.40
codegen_flags: <defaults>
</compile_context>

<pallas_src>
import jax
import jax.numpy as jnp
from jax import lax
from jax.experimental import pallas as pl
from jax.experimental.pallas import tpu as pltpu

# ----------------------------- config constants -----------------------------
B, N, C, H, W = 2, 8, 4, 16, 16      # batch, seq-len, channels, spatial
D = 32                               # backbone feature dim
R = 16                               # cfg.reduce_feature_dim
NUM_CLASSES = 8
NORM_MIN, NORM_MAX = 0.0, 1.0        # cfg.normalization_params for '-1_1'
BN_EPS = 1e-5
NUM_TAPS = 9                         # 3x3 conv taps


def _tensorcores_per_chip() -> int:
    """v7x has 2 TensorCores per chip; v5e/v6e have 1 (a grid is a serial loop there)."""
    try:
        kind = jax.devices()[0].device_kind.lower()
    except Exception:
        return 1
    return 2 if "v7" in kind else 1


# ------------------------------- fused kernel --------------------------------
def fused_net_kernel(p_ref, cw_ref, cb_ref, wr_ref, sh_ref, wh_ref, bh_ref, o_ref):
    # p_ref : (blk*H*W, 9*C) bf16 im2col patches of the raw (padded) input; the '-1_1'
    #         normalization is folded into cw/cb so raw-valued patches are correct here.
    # cw_ref: (9*C, D) bf16 conv weights (normalization folded in)
    # cb_ref: (1, D)  f32  conv bias (normalization folded in)
    # wr_ref: (D, R)  f32  Conv1d(k=1) weights with BatchNorm scale and 1/(H*W) pool-mean folded in
    # sh_ref: (1, R)  f32  Conv1d bias + BatchNorm(eval) shift, folded
    # wh_ref: (R, NUM_CLASSES) f32 head weights;  bh_ref: (1, NUM_CLASSES) f32 head bias
    # o_ref : (blk, NUM_CLASSES) post-sigmoid head outputs
    m = p_ref.shape[0]
    d = cw_ref.shape[-1]
    blk = o_ref.shape[0]
    hw = m // blk

    # backbone: 3x3 conv == one im2col matmul (bf16 operands, f32 accumulation) + bias + ReLU
    acc = jnp.dot(p_ref[...], cw_ref[...], preferred_element_type=jnp.float32)   # (m, D)
    feat = jnp.maximum(acc + cb_ref[...], 0.0)

    # global average pool: spatial SUM only (the 1/(H*W) factor is folded into wr)
    pooled = jnp.sum(feat.reshape(blk, hw, d), axis=1)                            # (blk, D)

    # FeatureReduction: Conv1d k=1 + BatchNorm1d(eval) + ReLU, folded to one matmul + shift
    red = jnp.maximum(
        jnp.dot(pooled, wr_ref[...], preferred_element_type=jnp.float32) + sh_ref[...], 0.0)

    # head: Linear + sigmoid (cfg.model_activation_fn == 'sigmoid')
    logits = jnp.dot(red, wh_ref[...], preferred_element_type=jnp.float32) + bh_ref[...]
    o_ref[...] = jax.nn.sigmoid(logits)                                           # full-slab store


# --------------------------------- wrapper -----------------------------------
def net_forward(x, params):
    """x: (B, N, C, H, W) float32 -> {'logits': (B, N, NUM_CLASSES)} (post-sigmoid head output)."""
    b, n, c, h, w = x.shape
    bn, hw, kc = b * n, h * w, NUM_TAPS * c

    # generation-selected block: whole batch in one grid step on single-TC chips (v5e/v6e),
    # one step per TensorCore on dual-TC v7x.
    cores = _tensorcores_per_chip()
    blk = bn // cores if (cores > 1 and bn % cores == 0) else bn
    grid = (bn // blk,)

    # glue ('b n c h w -> (b n) h w c'), pad the border with the raw value the '-1_1'
    # normalization maps to exactly 0 (so it matches zero-padding of the normalized input),
    # then im2col once here so the kernel sees a lane-dense (bn*H*W, 9*C) patch matrix.
    pad_val = 0.5 * (NORM_MIN + NORM_MAX)
    xi = jnp.transpose(x.reshape(bn, c, h, w), (0, 2, 3, 1))
    xp = jnp.pad(xi, ((0, 0), (1, 1), (1, 1), (0, 0)), constant_values=pad_val)
    wins = [xp[:, dy:dy + h, dx:dx + w, :] for dy in range(3) for dx in range(3)]
    patches = jnp.concatenate(wins, axis=-1).reshape(bn * hw, kc).astype(jnp.bfloat16)

    probs = pl.pallas_call(
        fused_net_kernel,
        out_shape=jax.ShapeDtypeStruct((bn, NUM_CLASSES), jnp.float32),
        grid=grid,
        in_specs=[
            pl.BlockSpec((blk * hw, kc), lambda i: (i, 0)),
            pl.BlockSpec((kc, D), lambda i: (0, 0)),
            pl.BlockSpec((1, D), lambda i: (0, 0)),
            pl.BlockSpec((D, R), lambda i: (0, 0)),
            pl.BlockSpec((1, R), lambda i: (0, 0)),
            pl.BlockSpec((R, NUM_CLASSES), lambda i: (0, 0)),
            pl.BlockSpec((1, NUM_CLASSES), lambda i: (0, 0)),
        ],
        out_specs=pl.BlockSpec((blk, NUM_CLASSES), lambda i: (i, 0)),
        compiler_params=pltpu.CompilerParams(dimension_semantics=("parallel",)),
    )(patches, params["conv_w"], params["conv_b"], params["wr"],
      params["bn_shift"], params["wh"], params["bh"])

    # Note: values are post-sigmoid probabilities (the module's head output after activation);
    # intermediate features are not returned (return_features=False path).
    return {"logits": probs.reshape(b, n, NUM_CLASSES)}


# ------------------------------ pure-JAX reference ----------------------------
def net_forward_ref(x, raw):
    b, n, c, h, w = x.shape
    xn = (x - NORM_MIN) / (NORM_MAX - NORM_MIN)
    xn = (xn - 0.5) * 2.0
    xi = xn.reshape(b * n, c, h, w)
    conv = lax.conv_general_dilated(
        xi, raw["conv_w_oihw"], window_strides=(1, 1), padding=((1, 1), (1, 1)),
        dimension_numbers=("NCHW", "OIHW", "NCHW"))
    conv = conv + raw["conv_b"][None, :, None, None]
    conv = jnp.maximum(conv, 0.0)
    feats = conv.mean(axis=(2, 3))                                    # (bn, D)
    r = feats @ raw["wr_oi"].T + raw["wr_b"]                          # Conv1d k=1
    r = (r - raw["bn_mean"]) / jnp.sqrt(raw["bn_var"] + BN_EPS) * raw["bn_gamma"] + raw["bn_beta"]
    r = jnp.maximum(r, 0.0)
    logits = r @ raw["wh_oi"].T + raw["wh_b"]
    return jax.nn.sigmoid(logits).reshape(b, n, NUM_CLASSES)


# ----------------------------------- main -------------------------------------
if __name__ == "__main__":
    key = jax.random.PRNGKey(0)
    keys = jax.random.split(key, 12)

    # deterministic synthetic parameters (PyTorch layouts first, then repacked for the kernel)
    conv_w_oihw = 0.1 * jax.random.normal(keys[0], (D, C, 3, 3), jnp.float32)
    conv_b = 0.1 * jax.random.normal(keys[1], (D,), jnp.float32)
    wr_oi = 0.1 * jax.random.normal(keys[2], (R, D), jnp.float32)     # Conv1d(D->R, k=1) weight
    wr_b = 0.1 * jax.random.normal(keys[3], (R,), jnp.float32)
    bn_gamma = 1.0 + 0.1 * jax.random.normal(keys[4], (R,), jnp.float32)
    bn_beta = 0.1 * jax.random.normal(keys[5], (R,), jnp.float32)
    bn_mean = 0.05 * jax.random.normal(keys[6], (R,), jnp.float32)
    bn_var = 1.0 + 0.1 * jax.random.uniform(keys[7], (R,), jnp.float32)
    wh_oi = 0.1 * jax.random.normal(keys[8], (NUM_CLASSES, R), jnp.float32)
    wh_b = 0.1 * jax.random.normal(keys[9], (NUM_CLASSES,), jnp.float32)

    # repack for the kernel:
    #   * fold the '-1_1' normalization x -> a*x + c0 into conv weights/bias; pack taps to (36, D)
    #   * fold Conv1d bias + BatchNorm(eval) into a single shift; fold BN scale and the 1/(H*W)
    #     pool-mean factor into the reduction weights
    a = 2.0 / (NORM_MAX - NORM_MIN)
    c0 = -2.0 * NORM_MIN / (NORM_MAX - NORM_MIN) - 1.0
    conv_w_packed = jnp.transpose(conv_w_oihw, (2, 3, 1, 0)).reshape(NUM_TAPS * C, D)  # (36, D)
    conv_w_eff = (a * conv_w_packed).astype(jnp.bfloat16)
    conv_b_eff = conv_b + c0 * conv_w_packed.sum(axis=0)

    bn_scale = bn_gamma / jnp.sqrt(bn_var + BN_EPS)
    bn_shift = (wr_b - bn_mean) * bn_scale + bn_beta
    wr_eff = (wr_oi.T * bn_scale[None, :]) / float(H * W)            # (D, R)

    params = {
        "conv_w": conv_w_eff,                              # (36, D) bf16
        "conv_b": conv_b_eff.reshape(1, D),
        "wr": wr_eff,                                      # (D, R) with BN scale + pool mean folded
        "bn_shift": bn_shift.reshape(1, R),
        "wh": wh_oi.T,                                     # (R, NUM_CLASSES)
        "bh": wh_b.reshape(1, NUM_CLASSES),
    }
    raw = {
        "conv_w_oihw": conv_w_oihw, "conv_b": conv_b,
        "wr_oi": wr_oi, "wr_b": wr_b,
        "bn_gamma": bn_gamma, "bn_beta": bn_beta, "bn_mean": bn_mean, "bn_var": bn_var,
        "wh_oi": wh_oi, "wh_b": wh_b,
    }

    x = jax.random.uniform(keys[10], (B, N, C, H, W), jnp.float32)    # batch['x']

    forward = jax.jit(net_forward)
    out = forward(x, params)
    logits = jax.block_until_ready(out["logits"])

    ref = jax.block_until_ready(net_forward_ref(x, raw))
    assert logits.shape == (B, N, NUM_CLASSES)
    # tolerance relaxed vs the pure-f32 version because the conv matmul operands are bf16
    assert jnp.allclose(logits, ref, atol=1e-2, rtol=1e-2), "mismatch vs pure-JAX reference"

    print("KERNEL_OK")
</pallas_src>

<mosaic_0001>
module attributes {stable_mosaic.version = 11 : i64} {
  func.func @fused_net_kernel(%arg0: i32, %arg1: memref<4096x36xbf16, #tpu.memory_space<vmem>>, %arg2: memref<36x32xbf16, #tpu.memory_space<vmem>>, %arg3: memref<1x32xf32, #tpu.memory_space<vmem>>, %arg4: memref<32x16xf32, #tpu.memory_space<vmem>>, %arg5: memref<1x16xf32, #tpu.memory_space<vmem>>, %arg6: memref<16x8xf32, #tpu.memory_space<vmem>>, %arg7: memref<1x8xf32, #tpu.memory_space<vmem>>, %arg8: memref<16x8xf32, #tpu.memory_space<vmem>>) attributes {dimension_semantics = [#tpu.dimension_semantics<parallel>], iteration_bounds = array<i64: 1>, scalar_prefetch = 0 : i64, scratch_operands = 0 : i64, tpu.core_type = #tpu.core_type<tc>, window_params = [{transform_indices = @transform_0, window_bounds = array<i64: 4096, 36>}, {pipeline_mode = #tpu.pipeline_mode<synchronous>, transform_indices = @transform_1, window_bounds = array<i64: 36, 32>}, {pipeline_mode = #tpu.pipeline_mode<synchronous>, transform_indices = @transform_2, window_bounds = array<i64: 1, 32>}, {pipeline_mode = #tpu.pipeline_mode<synchronous>, transform_indices = @transform_3, window_bounds = array<i64: 32, 16>}, {pipeline_mode = #tpu.pipeline_mode<synchronous>, transform_indices = @transform_4, window_bounds = array<i64: 1, 16>}, {pipeline_mode = #tpu.pipeline_mode<synchronous>, transform_indices = @transform_5, window_bounds = array<i64: 16, 8>}, {pipeline_mode = #tpu.pipeline_mode<synchronous>, transform_indices = @transform_6, window_bounds = array<i64: 1, 8>}, {transform_indices = @transform_7, window_bounds = array<i64: 16, 8>}]} {
    %c0 = arith.constant 0 : index
    %c0_0 = arith.constant 0 : index
    %0 = vector.load %arg1[%c0, %c0_0] : memref<4096x36xbf16, #tpu.memory_space<vmem>>, vector<4096x36xbf16>
    %c0_1 = arith.constant 0 : index
    %c0_2 = arith.constant 0 : index
    %1 = vector.load %arg2[%c0_1, %c0_2] : memref<36x32xbf16, #tpu.memory_space<vmem>>, vector<36x32xbf16>
    %cst = arith.constant dense<0.000000e+00> : vector<4096x32xf32>
    %2 = tpu.matmul %0, %1, %cst {dimension_numbers = #tpu.dot_dimension_numbers<[1], [0], [0], [1], [0, 0, 1, 1], [], []>} : vector<4096x36xbf16>, vector<36x32xbf16>, vector<4096x32xf32> -> vector<4096x32xf32>
    %c0_3 = arith.constant 0 : index
    %c0_4 = arith.constant 0 : index
    %3 = vector.load %arg3[%c0_3, %c0_4] : memref<1x32xf32, #tpu.memory_space<vmem>>, vector<1x32xf32>
    %4 = vector.broadcast %3 : vector<1x32xf32> to vector<4096x32xf32>
    %5 = arith.addf %2, %4 : vector<4096x32xf32>
    %cst_5 = arith.constant 0.000000e+00 : f32
    %6 = vector.broadcast %cst_5 : f32 to vector<4096x32xf32>
    %7 = arith.maximumf %5, %6 : vector<4096x32xf32>
    %8 = vector.shape_cast %7 : vector<4096x32xf32> to vector<16x256x32xf32>
    %cst_6 = arith.constant dense<0.000000e+00> : vector<16x32xf32>
    %9 = vector.multi_reduction <add>, %8, %cst_6 [1] : vector<16x256x32xf32> to vector<16x32xf32>
    %c0_7 = arith.constant 0 : index
    %c0_8 = arith.constant 0 : index
    %10 = vector.load %arg4[%c0_7, %c0_8] : memref<32x16xf32, #tpu.memory_space<vmem>>, vector<32x16xf32>
    %cst_9 = arith.constant dense<0.000000e+00> : vector<16x16xf32>
    %11 = tpu.matmul %9, %10, %cst_9 {dimension_numbers = #tpu.dot_dimension_numbers<[1], [0], [0], [1], [0, 0, 1, 1], [], []>} : vector<16x32xf32>, vector<32x16xf32>, vector<16x16xf32> -> vector<16x16xf32>
    %c0_10 = arith.constant 0 : index
    %c0_11 = arith.constant 0 : index
    %12 = vector.load %arg5[%c0_10, %c0_11] : memref<1x16xf32, #tpu.memory_space<vmem>>, vector<1x16xf32>
    %13 = vector.broadcast %12 : vector<1x16xf32> to vector<16x16xf32>
    %14 = arith.addf %11, %13 : vector<16x16xf32>
    %cst_12 = arith.constant 0.000000e+00 : f32
    %15 = vector.broadcast %cst_12 : f32 to vector<16x16xf32>
    %16 = arith.maximumf %14, %15 : vector<16x16xf32>
    %c0_13 = arith.constant 0 : index
    %c0_14 = arith.constant 0 : index
    %17 = vector.load %arg6[%c0_13, %c0_14] : memref<16x8xf32, #tpu.memory_space<vmem>>, vector<16x8xf32>
    %cst_15 = arith.constant dense<0.000000e+00> : vector<16x8xf32>
    %18 = tpu.matmul %16, %17, %cst_15 {dimension_numbers = #tpu.dot_dimension_numbers<[1], [0], [0], [1], [0, 0, 1, 1], [], []>} : vector<16x16xf32>, vector<16x8xf32>, vector<16x8xf32> -> vector<16x8xf32>
    %c0_16 = arith.constant 0 : index
    %c0_17 = arith.constant 0 : index
    %19 = vector.load %arg7[%c0_16, %c0_17] : memref<1x8xf32, #tpu.memory_space<vmem>>, vector<1x8xf32>
    %20 = vector.broadcast %19 : vector<1x8xf32> to vector<16x8xf32>
    %21 = arith.addf %18, %20 : vector<16x8xf32>
    %22 = arith.negf %21 : vector<16x8xf32>
    %23 = math.exp %22 : vector<16x8xf32>
    %cst_18 = arith.constant 1.000000e+00 : f32
    %24 = vector.broadcast %cst_18 : f32 to vector<16x8xf32>
    %25 = arith.addf %24, %23 : vector<16x8xf32>
    %26 = arith.divf %24, %25 : vector<16x8xf32>
    %c0_19 = arith.constant 0 : index
    %c0_20 = arith.constant 0 : index
    %27 = vector.load %arg8[%c0_19, %c0_20] : memref<16x8xf32, #tpu.memory_space<vmem>>, vector<16x8xf32>
    tpu.vector_store %arg8[%c0_19, %c0_20], %26 {strides = array<i32>} : memref<16x8xf32, #tpu.memory_space<vmem>>, vector<16x8xf32>,
    return
  }
  func.func @transform_0(%arg0: i32) -> (i32, i32) {
    %c0_i32 = arith.constant 0 : i32
    %c0_i32_0 = arith.constant 0 : i32
    return %arg0, %c0_i32 : i32, i32
  }
  func.func @transform_1(%arg0: i32) -> (i32, i32) {
    %c0_i32 = arith.constant 0 : i32
    %c0_i32_0 = arith.constant 0 : i32
    %c0_i32_1 = arith.constant 0 : i32
    return %c0_i32, %c0_i32_0 : i32, i32
  }
  func.func @transform_2(%arg0: i32) -> (i32, i32) {
    %c0_i32 = arith.constant 0 : i32
    %c0_i32_0 = arith.constant 0 : i32
    %c0_i32_1 = arith.constant 0 : i32
    return %c0_i32, %c0_i32_0 : i32, i32
  }
  func.func @transform_3(%arg0: i32) -> (i32, i32) {
    %c0_i32 = arith.constant 0 : i32
    %c0_i32_0 = arith.constant 0 : i32
    %c0_i32_1 = arith.constant 0 : i32
    return %c0_i32, %c0_i32_0 : i32, i32
  }
  func.func @transform_4(%arg0: i32) -> (i32, i32) {
    %c0_i32 = arith.constant 0 : i32
    %c0_i32_0 = arith.constant 0 : i32
    %c0_i32_1 = arith.constant 0 : i32
    return %c0_i32, %c0_i32_0 : i32, i32
  }
  func.func @transform_5(%arg0: i32) -> (i32, i32) {
    %c0_i32 = arith.constant 0 : i32
    %c0_i32_0 = arith.constant 0 : i32
    %c0_i32_1 = arith.constant 0 : i32
    return %c0_i32, %c0_i32_0 : i32, i32
  }
  func.func @transform_6(%arg0: i32) -> (i32, i32) {
    %c0_i32 = arith.constant 0 : i32
    %c0_i32_0 = arith.constant 0 : i32
    %c0_i32_1 = arith.constant 0 : i32
    return %c0_i32, %c0_i32_0 : i32, i32
  }
  func.func @transform_7(%arg0: i32) -> (i32, i32) {
    %c0_i32 = arith.constant 0 : i32
    %c0_i32_0 = arith.constant 0 : i32
    return %arg0, %c0_i32 : i32, i32
  }
}

</mosaic_0001>

<bundles_post_ra>
// kernel: net_forward.1
= control target key start
LH: loop header
LB: loop body
LE: loop exit
PB: predicated region body
PF: predicated region fallthrough
CT: control target
= control target key end

     0   :  { %vm1847_vm0 = vcmask 293888   ;;  %vm2616_vm1 = vcmask 1041408   ;;  %s11122_s0 = inlined_call_operand.vmem [shape: bf16[4096,36], index: 0, kind: input, shape index: {}]   ;;  %s11123_s1 = inlined_call_operand.vmem [shape: bf16[36,32], index: 1, kind: input, shape index: {}]   ;;  %s11124_s2 = inlined_call_operand.vmem [shape: f32[1,32], index: 2, kind: input, shape index: {}]   ;;  %s11125_s3 = inlined_call_operand.vmem [shape: f32[32,16], index: 3, kind: input, shape index: {}]   ;;  %s11126_s4 = inlined_call_operand.vmem [shape: f32[1,16], index: 4, kind: input, shape index: {}]   ;;  %s11127_s5 = inlined_call_operand.vmem [shape: f32[16,8], index: 5, kind: input, shape index: {}]   ;;  %s11128_s6 = inlined_call_operand.vmem [shape: f32[1,8], index: 6, kind: input, shape index: {}]   ;;  %s11129_s7 = inlined_call_operand.hbm [shape: f32[16,8], index: 7, kind: output, shape index: {}]  }
   0x1   :  { %v7921_v0 = vld [vmem:[%s11123_s1] sm:$0xff]   ;;  %v7922_v1 = vld [vmem:[%s11123_s1 + $0x8] sm:$0xff]   ;;  %v7923_v2 = vld [vmem:[%s11123_s1 + $0x10] ss:$0 sps:$4 sm:$0x33]  }
   0x2   :  { %7362 = vmatprep.subr.bf16.mxu0 %v7921_v0  ;;  %v7924_v3 = vld [vmem:[%s11122_s0] sm:$0xff]   ;;  %7910 = vmatprep.subr.bf16.mxu1 %v7921_v0  ;;  %v2618_v4 = vsel %vm2616_vm1, %v7923_v2, 0  ;;  %v7925_v5 = vld [vmem:[%s11122_s0 + $0x8] sm:$0xff]   ;;  %v7926_v6 = vld [vmem:[%s11122_s0 + $0x10] sm:$0xff]  }
   0x3   :  { %7363 = vmatpush3.bf16.msra.mxu0 %v7921_v0  ;;  %7913 = vmatpush3.bf16.msra.mxu1 %v7921_v0  ;;  %v7927_v7 = vld [vmem:[%s11122_s0 + $0x18] sm:$0xff]   ;;  %v7928_v8 = vld [vmem:[%s11122_s0 + $0x20] sm:$0xff]   ;;  %v7942_v9 = vld [vmem:[%s11122_s0 + $0x410] sm:$0xff]  }
   0x4   :  { %7364 = vmatprep.subr.bf16.mxu0 %v7922_v1  ;;  %7368 = vmatprep.mubr.msk.bf16.mxu0 %vm1847_vm0, %v7924_v3  ;;  %v7943_v10 = vld [vmem:[%s11122_s0 + $0x418] sm:$0xff]   ;;  %v7946_v11 = vld [vmem:[%s11122_s0 + $0x420] sm:$0xff]   ;;  %v7929_v12 = vld [vmem:[%s11122_s0 + $0x28] sm:$0xff]  }
   0x5   :  { %7911 = vmatprep.subr.bf16.mxu1 %v7922_v1  ;;  %7628 = vmatprep.mubr.msk.bf16.mxu1 %vm1847_vm0, %v7942_v9  ;;  %v7930_v13 = vld [vmem:[%s11122_s0 + $0x30] sm:$0xff]   ;;  %v7947_v14 = vld [vmem:[%s11122_s0 + $0x428] sm:$0xff]   ;;  %v7931_v16 = vld [vmem:[%s11122_s0 + $0x38] sm:$0xff]  }
   0x6   :  { %v7950_v15 = vld [vmem:[%s11122_s0 + $0x430] sm:$0xff]   ;;  %v7932_v17 = vld [vmem:[%s11122_s0 + $0x40] sm:$0xff]   ;;  %v7951_v18 = vld [vmem:[%s11122_s0 + $0x438] sm:$0xff]  }
   0x7   :  { %7365 = vmatpush3.bf16.msra.mxu0 %v7922_v1  ;;  %7914 = vmatpush3.bf16.msra.mxu1 %v7922_v1  ;;  %v7954_v19 = vld [vmem:[%s11122_s0 + $0x440] sm:$0xff]   ;;  %v7933_v20 = vld [vmem:[%s11122_s0 + $0x48] sm:$0xff]   ;;  %v7934_v21 = vld [vmem:[%s11122_s0 + $0x50] sm:$0xff]  }
   0x8   :  { %7916 = vmatprep.subr.msk.bf16.mxu0 %vm2616_vm1, %v7923_v2  ;;  %7917 = vmatprep.subr.msk.bf16.mxu1 %vm2616_vm1, %v7923_v2  ;;  %v7955_v22 = vld [vmem:[%s11122_s0 + $0x448] sm:$0xff]   ;;  %v7958_v23 = vld [vmem:[%s11122_s0 + $0x450] sm:$0xff]   ;;  %v7935_v24 = vld [vmem:[%s11122_s0 + $0x58] sm:$0xff]  }
   0x9   :  { %v7936_v25 = vld [vmem:[%s11122_s0 + $0x60] sm:$0xff]   ;;  %v7959_v26 = vld [vmem:[%s11122_s0 + $0x458] sm:$0xff]   ;;  %v7937_v28 = vld [vmem:[%s11122_s0 + $0x68] sm:$0xff]  }
   0xa   :  { %v7962_v27 = vld [vmem:[%s11122_s0 + $0x460] sm:$0xff]   ;;  %v7938_v29 = vld [vmem:[%s11122_s0 + $0x70] sm:$0xff]   ;;  %v7963_v30 = vld [vmem:[%s11122_s0 + $0x468] sm:$0xff]  }
   0xb   :  { %7367 = vmatpush3.bf16.msra.mxu0 %v2618_v4  ;;  %7915 = vmatpush3.bf16.msra.mxu1 %v2618_v4  ;;  %v7966_v31 = vld [vmem:[%s11122_s0 + $0x470] sm:$0xff]   ;;  %v7939_v32 = vld [vmem:[%s11122_s0 + $0x78] sm:$0xff]   ;;  %v7940_v33 = vld [vmem:[%s11122_s0 + $0x80] sm:$0xff]  }
   0xc   :  { %v7967_v34 = vld [vmem:[%s11122_s0 + $0x478] sm:$0xff]   ;;  %v7970_v35 = vld [vmem:[%s11122_s0 + $0x480] sm:$0xff]   ;;  %v7941_v36 = vld [vmem:[%s11122_s0 + $0x88] sm:$0xff]  }
   0xd   :  { %v7944_v37 = vld [vmem:[%s11122_s0 + $0x90] sm:$0xff]   ;;  %v7971_v38 = vld [vmem:[%s11122_s0 + $0x488] sm:$0xff]   ;;  %v7945_v40 = vld [vmem:[%s11122_s0 + $0x98] sm:$0xff]  }
   0xe   :  { %7369 = vmatmul.mubr.msk.bf16.vlgmr.msra.gmra.mrb[0].mxu0 %vm1847_vm0, %v7925_v5  ;;  %7629 = vmatmul.mubr.msk.bf16.vlgmr.msra.gmra.mrb[0].mxu1 %vm1847_vm0, %v7943_v10  ;;  %v7974_v39 = vld [vmem:[%s11122_s0 + $0x490] sm:$0xff]   ;;  %v7948_v41 = vld [vmem:[%s11122_s0 + $0xa0] sm:$0xff]   ;;  %v7975_v42 = vld [vmem:[%s11122_s0 + $0x498] sm:$0xff]  }
   0xf   :  { %7372 = vmatprep.mubr.msk.bf16.mxu0 %vm1847_vm0, %v7926_v6  ;;  %7632 = vmatprep.mubr.msk.bf16.mxu1 %vm1847_vm0, %v7946_v11  ;;  %v7978_v43 = vld [vmem:[%s11122_s0 + $0x4a0] sm:$0xff]   ;;  %v7949_v44 = vld [vmem:[%s11122_s0 + $0xa8] sm:$0xff]   ;;  %v7952_v45 = vld [vmem:[%s11122_s0 + $0xb0] sm:$0xff]  }
  0x10   :  { %v7979_v46 = vld [vmem:[%s11122_s0 + $0x4a8] sm:$0xff]   ;;  %v7982_v47 = vld [vmem:[%s11122_s0 + $0x4b0] sm:$0xff]   ;;  %v7953_v48 = vld [vmem:[%s11122_s0 + $0xb8] sm:$0xff]  }
  0x11   :  { %v7956_v49 = vld [vmem:[%s11122_s0 + $0xc0] sm:$0xff]   ;;  %v7983_v50 = vld [vmem:[%s11122_s0 + $0x4b8] sm:$0xff]   ;;  %v7957_v52 = vld [vmem:[%s11122_s0 + $0xc8] sm:$0xff]  }
  0x12   :  { %v7986_v51 = vld [vmem:[%s11122_s0 + $0x4c0] sm:$0xff]   ;;  %v7960_v53 = vld [vmem:[%s11122_s0 + $0xd0] sm:$0xff]   ;;  %v7987_v54 = vld [vmem:[%s11122_s0 + $0x4c8] sm:$0xff]  }
  0x13   :  { %v7990_v55 = vld [vmem:[%s11122_s0 + $0x4d0] sm:$0xff]   ;;  %v7961_v56 = vld [vmem:[%s11122_s0 + $0xd8] sm:$0xff]   ;;  %v7964_v57 = vld [vmem:[%s11122_s0 + $0xe0] sm:$0xff]  }
  0x14   :  { %v7991_v58 = vld [vmem:[%s11122_s0 + $0x4d8] sm:$0xff]   ;;  %v7994_v59 = vld [vmem:[%s11122_s0 + $0x4e0] sm:$0xff]   ;;  %v7965_v60 = vld [vmem:[%s11122_s0 + $0xe8] sm:$0xff]  }
  0x15   :  { %v7968_v61 = vld [vmem:[%s11122_s0 + $0xf0] sm:$0xff]   ;;  %v7995_v62 = vld [vmem:[%s11122_s0 + $0x4e8] sm:$0xff]   ;;  %v7969_v0 = vld [vmem:[%s11122_s0 + $0xf8] sm:$0xff]  }
  0x16   :  { %7373 = vmatmul.mubr.msk.bf16.gmra.mrb[4].mxu0 %vm1847_vm0, %v7927_v7  ;;  %7633 = vmatmul.mubr.msk.bf16.gmra.mrb[4].mxu1 %vm1847_vm0, %v7947_v14  ;;  %v7998_v63 = vld [vmem:[%s11122_s0 + $0x4f0] sm:$0xff]   ;;  %v7972_v1 = vld [vmem:[%s11122_s0 + $0x100] sm:$0xff]   ;;  %v7999_v2 = vld [vmem:[%s11122_s0 + $0x4f8] sm:$0xff]  }
  0x17   :  { %7376 = vmatprep.mubr.msk.bf16.mxu0 %vm1847_vm0, %v7928_v8  ;;  %7636 = vmatprep.mubr.msk.bf16.mxu1 %vm1847_vm0, %v7950_v15  ;;  %v8002_v3 = vld [vmem:[%s11122_s0 + $0x500] sm:$0xff]   ;;  %v7973_v4 = vld [vmem:[%s11122_s0 + $0x108] sm:$0xff]   ;;  %v7976_v5 = vld [vmem:[%s11122_s0 + $0x110] sm:$0xff]  }
  0x18   :  { %v8003_v6 = vld [vmem:[%s11122_s0 + $0x508] sm:$0xff]   ;;  %v8006_v7 = vld [vmem:[%s11122_s0 + $0x510] sm:$0xff]   ;;  %v7977_v8 = vld [vmem:[%s11122_s0 + $0x118] sm:$0xff]  }
  0x19   :  { %v7980_v9 = vld [vmem:[%s11122_s0 + $0x120] sm:$0xff]   ;;  %v8007_v10 = vld [vmem:[%s11122_s0 + $0x518] sm:$0xff]   ;;  %v8011_v14 = vld [vmem:[%s11122_s0 + $0x528] sm:$0xff]  }
  0x1a   :  { %v8010_v11 = vld [vmem:[%s11122_s0 + $0x520] sm:$0xff]   ;;  %v8014_v15 = vld [vmem:[%s11122_s0 + $0x530] sm:$0xff]  }
  0x1e   :  { %7377 = vmatmul.mubr.msk.bf16.gmra.mrb[8].mxu0 %vm1847_vm0, %v7929_v12  ;;  %7637 = vmatmul.mubr.msk.bf16.gmra.mrb[8].mxu1 %vm1847_vm0, %v7951_v18  ;;  %v7981_v12 = vld [vmem:[%s11122_s0 + $0x128] sm:$0xff]   ;;  %v8015_v18 = vld [vmem:[%s11122_s0 + $0x538] sm:$0xff]  }
  0x1f   :  { %7380 = vmatprep.mubr.msk.bf16.mxu0 %vm1847_vm0, %v7930_v13  ;;  %7640 = vmatprep.mubr.msk.bf16.mxu1 %vm1847_vm0, %v7954_v19  ;;  %v7984_v13 = vld [vmem:[%s11122_s0 + $0x130] sm:$0xff]   ;;  %v8018_v19 = vld [vmem:[%s11122_s0 + $0x540] sm:$0xff]  }
  0x26   :  { %7381 = vmatmul.mubr.msk.bf16.gmra.mrb[12].mxu0 %vm1847_vm0, %v7931_v16  ;;  %7641 = vmatmul.mubr.msk.bf16.gmra.mrb[12].mxu1 %vm1847_vm0, %v7955_v22  ;;  %v7985_v16 = vld [vmem:[%s11122_s0 + $0x138] sm:$0xff]   ;;  %v8019_v22 = vld [vmem:[%s11122_s0 + $0x548] sm:$0xff]  }
  0x27   :  { %7384 = vmatprep.mubr.msk.bf16.mxu0 %vm1847_vm0, %v7932_v17  ;;  %7644 = vmatprep.mubr.msk.bf16.mxu1 %vm1847_vm0, %v7958_v23  ;;  %v7988_v17 = vld [vmem:[%s11122_s0 + $0x140] sm:$0xff]   ;;  %v8022_v23 = vld [vmem:[%s11122_s0 + $0x550] sm:$0xff]  }
  0x2e   :  { %7385 = vmatmul.mubr.msk.bf16.gmra.mrb[16].mxu0 %vm1847_vm0, %v7933_v20  ;;  %7645 = vmatmul.mubr.msk.bf16.gmra.mrb[16].mxu1 %vm1847_vm0, %v7959_v26  ;;  %v7989_v20 = vld [vmem:[%s11122_s0 + $0x148] sm:$0xff]   ;;  %v8023_v26 = vld [vmem:[%s11122_s0 + $0x558] sm:$0xff]  }
  0x2f   :  { %7388 = vmatprep.mubr.msk.bf16.mxu0 %vm1847_vm0, %v7934_v21  ;;  %7648 = vmatprep.mubr.msk.bf16.mxu1 %vm1847_vm0, %v7962_v27  ;;  %v7992_v21 = vld [vmem:[%s11122_s0 + $0x150] sm:$0xff]   ;;  %v8026_v27 = vld [vmem:[%s11122_s0 + $0x560] sm:$0xff]  }
  0x36   :  { %7389 = vmatmul.mubr.msk.bf16.gmra.mrb[20].mxu0 %vm1847_vm0, %v7935_v24  ;;  %7649 = vmatmul.mubr.msk.bf16.gmra.mrb[20].mxu1 %vm1847_vm0, %v7963_v30  ;;  %v7993_v24 = vld [vmem:[%s11122_s0 + $0x158] sm:$0xff]   ;;  %v8027_v30 = vld [vmem:[%s11122_s0 + $0x568] sm:$0xff]  }
  0x37   :  { %7392 = vmatprep.mubr.msk.bf16.mxu0 %vm1847_vm0, %v7936_v25  ;;  %7652 = vmatprep.mubr.msk.bf16.mxu1 %vm1847_vm0, %v7966_v31  ;;  %v7996_v25 = vld [vmem:[%s11122_s0 + $0x160] sm:$0xff]   ;;  %v8030_v31 = vld [vmem:[%s11122_s0 + $0x570] sm:$0xff]  }
  0x3e   :  { %7393 = vmatmul.mubr.msk.bf16.gmra.mrb[24].mxu0 %vm1847_vm0, %v7937_v28  ;;  %7653 = vmatmul.mubr.msk.bf16.gmra.mrb[24].mxu1 %vm1847_vm0, %v7967_v34  ;;  %v7997_v28 = vld [vmem:[%s11122_s0 + $0x168] sm:$0xff]   ;;  %v8031_v34 = vld [vmem:[%s11122_s0 + $0x578] sm:$0xff]  }
  0x3f   :  { %7396 = vmatprep.mubr.msk.bf16.mxu0 %vm1847_vm0, %v7938_v29  ;;  %7656 = vmatprep.mubr.msk.bf16.mxu1 %vm1847_vm0, %v7970_v35  ;;  %v8000_v29 = vld [vmem:[%s11122_s0 + $0x170] sm:$0xff]   ;;  %v8034_v35 = vld [vmem:[%s11122_s0 + $0x580] sm:$0xff]  }
  0x46   :  { %7397 = vmatmul.mubr.msk.bf16.gmra.mrb[28].mxu0 %vm1847_vm0, %v7939_v32  ;;  %7657 = vmatmul.mubr.msk.bf16.gmra.mrb[28].mxu1 %vm1847_vm0, %v7971_v38  ;;  %v8001_v32 = vld [vmem:[%s11122_s0 + $0x178] sm:$0xff]   ;;  %v6319_v38 = vld [vmem:[%s11125_s3 + $0x8] sm:$0xff] }
  0x47   :  { %7400 = vmatprep.mubr.msk.bf16.mxu0 %vm1847_vm0, %v7940_v33  ;;  %7660 = vmatprep.mubr.msk.bf16.mxu1 %vm1847_vm0, %v7974_v39  ;;  %v8004_v33 = vld [vmem:[%s11122_s0 + $0x180] sm:$0xff]  }
  0x4e   :  { %7401 = vmatmul.mubr.msk.bf16.gmra.mrb[32].mxu0 %vm1847_vm0, %v7941_v36  ;;  %7661 = vmatmul.mubr.msk.bf16.gmra.mrb[32].mxu1 %vm1847_vm0, %v7975_v42  ;;  %v8005_v36 = vld [vmem:[%s11122_s0 + $0x188] sm:$0xff]   ;;  %v8038_v42 = vld [vmem:[%s11122_s0 + $0x590] sm:$0xff]  }
  0x4f   :  { %7404 = vmatprep.mubr.msk.bf16.mxu0 %vm1847_vm0, %v7944_v37  ;;  %7664 = vmatprep.mubr.msk.bf16.mxu1 %vm1847_vm0, %v7978_v43  ;;  %v6318_v37 = vld [vmem:[%s11125_s3] sm:$0xff]  ;;  %v8009_v43 = vld [vmem:[%s11122_s0 + $0x198] sm:$0xff]  }
  0x50   :  { %v7898_v39 = vpack.c.bf16 %v6319_v38, %v6318_v37 }
  0x52   :  { %7899 = vmatprep.subr.bf16.mxu1 %v7898_v39 }
  0x53   :  { %7901 = vmatpush3.bf16.msra.mxu1 %v7898_v39 }
  0x56   :  { %7405 = vmatmul.mubr.msk.bf16.gmra.mrb[36].mxu0 %vm1847_vm0, %v7945_v40  ;;  %7665 = vmatmul.mubr.msk.bf16.gmra.mrb[36].mxu1 %vm1847_vm0, %v7979_v46  ;;  %v8008_v40 = vld [vmem:[%s11122_s0 + $0x190] sm:$0xff]   ;;  %v8042_v46 = vld [vmem:[%s11122_s0 + $0x5a0] sm:$0xff]  }
  0x57   :  { %7408 = vmatprep.mubr.msk.bf16.mxu0 %vm1847_vm0, %v7948_v41  ;;  %7668 = vmatprep.mubr.msk.bf16.mxu1 %vm1847_vm0, %v7982_v47  ;;  %v8035_v41 = vld [vmem:[%s11122_s0 + $0x588] sm:$0xff]  }
  0x58   :  { %v8013_v47 = vld [vmem:[%s11122_s0 + $0x1a8] sm:$0xff]  }
  0x5e   :  { %7409 = vmatmul.mubr.msk.bf16.gmra.mrb[40].mxu0 %vm1847_vm0, %v7949_v44  ;;  %7669 = vmatmul.mubr.msk.bf16.gmra.mrb[40].mxu1 %vm1847_vm0, %v7983_v50  ;;  %v8012_v44 = vld [vmem:[%s11122_s0 + $0x1a0] sm:$0xff]   ;;  %v8046_v50 = vld [vmem:[%s11122_s0 + $0x5b0] sm:$0xff]  }
  0x5f   :  { %7412 = vmatprep.mubr.msk.bf16.mxu0 %vm1847_vm0, %v7952_v45  ;;  %7672 = vmatprep.mubr.msk.bf16.mxu1 %vm1847_vm0, %v7986_v51  ;;  %v8039_v45 = vld [vmem:[%s11122_s0 + $0x598] sm:$0xff]   ;;  %v8707_v51 = vld [vmem:[%s11124_s2] ss:$0 sm:$0xff] }
  0x66   :  { %7413 = vmatmul.mubr.msk.bf16.gmra.mrb[44].mxu0 %vm1847_vm0, %v7953_v48  ;;  %7673 = vmatmul.mubr.msk.bf16.gmra.mrb[44].mxu1 %vm1847_vm0, %v7987_v54  ;;  %v8016_v48 = vld [vmem:[%s11122_s0 + $0x1b0] sm:$0xff]   ;;  %v8017_v54 = vld [vmem:[%s11122_s0 + $0x1b8] sm:$0xff]  }
  0x67   :  { %7416 = vmatprep.mubr.msk.bf16.mxu0 %vm1847_vm0, %v7956_v49  ;;  %7676 = vmatprep.mubr.msk.bf16.mxu1 %vm1847_vm0, %v7990_v55  ;;  %v8043_v49 = vld [vmem:[%s11122_s0 + $0x5a8] sm:$0xff]  }
  0x6e   :  { %7417 = vmatmul.mubr.msk.bf16.gmra.mrb[48].mxu0 %vm1847_vm0, %v7957_v52  ;;  %7677 = vmatmul.mubr.msk.bf16.gmra.mrb[48].mxu1 %vm1847_vm0, %v7991_v58  ;;  %v8020_v58 = vld [vmem:[%s11122_s0 + $0x1c0] sm:$0xff]  }
  0x6f   :  { %7420 = vmatprep.mubr.msk.bf16.mxu0 %vm1847_vm0, %v7960_v53  ;;  %7680 = vmatprep.mubr.msk.bf16.mxu1 %vm1847_vm0, %v7994_v59 }
  0x76   :  { %7421 = vmatmul.mubr.msk.bf16.gmra.mrb[52].mxu0 %vm1847_vm0, %v7961_v56  ;;  %7681 = vmatmul.mubr.msk.bf16.gmra.mrb[52].mxu1 %vm1847_vm0, %v7995_v62 }
  0x77   :  { %7424 = vmatprep.mubr.msk.bf16.mxu0 %vm1847_vm0, %v7964_v57  ;;  %7684 = vmatprep.mubr.msk.bf16.mxu1 %vm1847_vm0, %v7998_v63 }
  0x7e   :  { %7425 = vmatmul.mubr.msk.bf16.gmra.mrb[56].mxu0 %vm1847_vm0, %v7965_v60  ;;  %7685 = vmatmul.mubr.msk.bf16.gmra.mrb[56].mxu1 %vm1847_vm0, %v7999_v2 }
  0x7f   :  { %7428 = vmatprep.mubr.msk.bf16.mxu0 %vm1847_vm0, %v7968_v61  ;;  %7688 = vmatprep.mubr.msk.bf16.mxu1 %vm1847_vm0, %v8002_v3 }
  0x86   :  { %7429 = vmatmul.mubr.msk.bf16.gmra.mrb[60].mxu0 %vm1847_vm0, %v7969_v0  ;;  %7689 = vmatmul.mubr.msk.bf16.gmra.mrb[60].mxu1 %vm1847_vm0, %v8003_v6 }
  0x87   :  { %7432 = vmatprep.mubr.msk.bf16.mxu0 %vm1847_vm0, %v7972_v1  ;;  %7692 = vmatprep.mubr.msk.bf16.mxu1 %vm1847_vm0, %v8006_v7 }
  0x8e   :  { %7433 = vmatmul.mubr.msk.bf16.gmra.mrb[64].mxu0 %vm1847_vm0, %v7973_v4  ;;  %7693 = vmatmul.mubr.msk.bf16.gmra.mrb[64].mxu1 %vm1847_vm0, %v8007_v10 }
  0x8f   :  { %7436 = vmatprep.mubr.msk.bf16.mxu0 %vm1847_vm0, %v7976_v5  ;;  %7696 = vmatprep.mubr.msk.bf16.mxu1 %vm1847_vm0, %v8010_v11 }
  0x96   :  { %7437 = vmatmul.mubr.msk.bf16.gmra.mrb[68].mxu0 %vm1847_vm0, %v7977_v8  ;;  %7697 = vmatmul.mubr.msk.bf16.gmra.mrb[68].mxu1 %vm1847_vm0, %v8011_v14 }
  0x97   :  { %7440 = vmatprep.mubr.msk.bf16.mxu0 %vm1847_vm0, %v7980_v9  ;;  %7700 = vmatprep.mubr.msk.bf16.mxu1 %vm1847_vm0, %v8014_v15 }
  0x9e   :  { %7441 = vmatmul.mubr.msk.bf16.gmra.mrb[72].mxu0 %vm1847_vm0, %v7981_v12  ;;  %7701 = vmatmul.mubr.msk.bf16.gmra.mrb[72].mxu1 %vm1847_vm0, %v8015_v18 }
  0x9f   :  { %7444 = vmatprep.mubr.msk.bf16.mxu0 %vm1847_vm0, %v7984_v13  ;;  %7704 = vmatprep.mubr.msk.bf16.mxu1 %vm1847_vm0, %v8018_v19 }
  0xa6   :  { %7445 = vmatmul.mubr.msk.bf16.gmra.mrb[76].mxu0 %vm1847_vm0, %v7985_v16  ;;  %7705 = vmatmul.mubr.msk.bf16.gmra.mrb[76].mxu1 %vm1847_vm0, %v8019_v22 }
  0xa7   :  { %7448 = vmatprep.mubr.msk.bf16.mxu0 %vm1847_vm0, %v7988_v17  ;;  %7708 = vmatprep.mubr.msk.bf16.mxu1 %vm1847_vm0, %v8022_v23 }
  0xae   :  { %7449 = vmatmul.mubr.msk.bf16.gmra.mrb[80].mxu0 %vm1847_vm0, %v7989_v20  ;;  %7709 = vmatmul.mubr.msk.bf16.gmra.mrb[80].mxu1 %vm1847_vm0, %v8023_v26 }
  0xaf   :  { %7452 = vmatprep.mubr.msk.bf16.mxu0 %vm1847_vm0, %v7992_v21  ;;  %7712 = vmatprep.mubr.msk.bf16.mxu1 %vm1847_vm0, %v8026_v27 }
  0xb6   :  { %7453 = vmatmul.mubr.msk.bf16.gmra.mrb[84].mxu0 %vm1847_vm0, %v7993_v24  ;;  %7713 = vmatmul.mubr.msk.bf16.gmra.mrb[84].mxu1 %vm1847_vm0, %v8027_v30 }
  0xb7   :  { %7456 = vmatprep.mubr.msk.bf16.mxu0 %vm1847_vm0, %v7996_v25  ;;  %7716 = vmatprep.mubr.msk.bf16.mxu1 %vm1847_vm0, %v8030_v31 }
  0xbe   :  { %7457 = vmatmul.mubr.msk.bf16.gmra.mrb[88].mxu0 %vm1847_vm0, %v7997_v28  ;;  %7717 = vmatmul.mubr.msk.bf16.gmra.mrb[88].mxu1 %vm1847_vm0, %v8031_v34 }
  0xbf   :  { %7460 = vmatprep.mubr.msk.bf16.mxu0 %vm1847_vm0, %v8000_v29  ;;  %7720 = vmatprep.mubr.msk.bf16.mxu1 %vm1847_vm0, %v8034_v35 }
  0xc6   :  { %7461 = vmatmul.mubr.msk.bf16.gmra.mrb[92].mxu0 %vm1847_vm0, %v8001_v32  ;;  %7721 = vmatmul.mubr.msk.bf16.gmra.mrb[92].mxu1 %vm1847_vm0, %v8035_v41 }
  0xc7   :  { %7464 = vmatprep.mubr.msk.bf16.mxu0 %vm1847_vm0, %v8004_v33  ;;  %7724 = vmatprep.mubr.msk.bf16.mxu1 %vm1847_vm0, %v8038_v42 }
  0xce   :  { %7465 = vmatmul.mubr.msk.bf16.gmra.mrb[96].mxu0 %vm1847_vm0, %v8005_v36  ;;  %7725 = vmatmul.mubr.msk.bf16.gmra.mrb[96].mxu1 %vm1847_vm0, %v8039_v45 }
  0xcf   :  { %7468 = vmatprep.mubr.msk.bf16.mxu0 %vm1847_vm0, %v8008_v40  ;;  %7728 = vmatprep.mubr.msk.bf16.mxu1 %vm1847_vm0, %v8042_v46 }
  0xd6   :  { %7469 = vmatmul.mubr.msk.bf16.gmra.mrb[100].mxu0 %vm1847_vm0, %v8009_v43  ;;  %7729 = vmatmul.mubr.msk.bf16.gmra.mrb[100].mxu1 %vm1847_vm0, %v8043_v49 }
  0xd7   :  { %7472 = vmatprep.mubr.msk.bf16.mxu0 %vm1847_vm0, %v8012_v44  ;;  %7732 = vmatprep.mubr.msk.bf16.mxu1 %vm1847_vm0, %v8046_v50 }
  0xde   :  { %7473 = vmatmul.mubr.msk.bf16.gmra.mrb[104].mxu0 %vm1847_vm0, %v8013_v47 }
  0xdf   :  { %7476 = vmatprep.mubr.msk.bf16.mxu0 %vm1847_vm0, %v8016_v48 }
  0xe1   :  { %v7370_v52 = vpop.f32.mrb[0].mxu0 }
  0xe2   :  { %v2654_v53 = vpop.f32.mrb[1].mxu0  ;;  %v2663_v55 = vadd.f32 %v7370_v52, %v8707_v51 }
  0xe3   :  { %v2655_v56 = vadd.f32 %v8707_v51, %v2654_v53  ;;  %v7371_v57 = vpop.f32.mrb[2].mxu0 }
  0xe4   :  { %12 = vsyncpa [#allocation3], 0  ;;  %v2657_v59 = vpop.f32.mrb[3].mxu0  ;;  %v8047_v60 = vld [vmem:[%s11122_s0 + $0x5b8] sm:$0xff]   ;;  %v2666_v62 = vadd.f32 %v7371_v57, %v8707_v51  ;;  %v8050_v0 = vld [vmem:[%s11122_s0 + $0x5c0] sm:$0xff]   ;;  %vm5213_vm2 = vcmask 261120  }
  0xe5   :  { %v4701_v61 = vmax.f32 %v2655_v56, 0.0  ;;  %v2658_v63 = vadd.f32 %v8707_v51, %v2657_v59  ;;  %v4703_v1 = vmax.f32 %v2663_v55, 0.0  ;;  %7733 = vmatmul.mubr.msk.bf16.gmra.mrb[104].mxu1 %vm1847_vm0, %v8047_v60  ;;  %v8021_v9 = vld [vmem:[%s11122_s0 + $0x1c8] sm:$0xff]   ;;  %v8024_v14 = vld [vmem:[%s11122_s0 + $0x1d0] sm:$0xff]   ;;  %v8743_v15 = vpop.f32.mrb[0].mxu1  ;;  %v8025_v37 = vld [vmem:[%s11122_s0 + $0x1d8] sm:$0xff]  }
  0xe6   :  { %7477 = vmatmul.mubr.msk.bf16.gmra.mrb[108].mxu0 %vm1847_vm0, %v8017_v54  ;;  %v4704_v4 = vmax.f32 %v2666_v62, 0.0  ;;  %7736 = vmatprep.mubr.msk.bf16.mxu1 %vm1847_vm0, %v8050_v0  ;;  %v8051_v18 = vld [vmem:[%s11122_s0 + $0x5c8] sm:$0xff]   ;;  %v8748_v19 = vpop.f32.mrb[1].mxu1  ;;  %v8054_v25 = vld [vmem:[%s11122_s0 + $0x5d0] sm:$0xff]   ;;  %v8028_v42 = vld [vmem:[%s11122_s0 + $0x1e0] sm:$0xff]   ;;  %vm6345_vm3 = vcmask 1041409  }
  0xe7   :  { %v4702_v2 = vmax.f32 %v2658_v63, 0.0  ;;  %7480 = vmatprep.mubr.msk.bf16.mxu0 %vm1847_vm0, %v8020_v58  ;;  %v5214_v3 = vsel %vm5213_vm2, %v4701_v61, 0.0  ;;  %v5217_v10 = vsel %vm5213_vm2, %v4703_v1, 0.0  ;;  %v8753_v24 = vpop.f32.mrb[2].mxu1  ;;  %v8055_v46 = vld [vmem:[%s11122_s0 + $0x5d8] sm:$0xff]   ;;  %v8058_v54 = vld [vmem:[%s11122_s0 + $0x5e0] sm:$0xff]  }
  0xe8   :  { %v5219_v20 = vsel %vm5213_vm2, %v4704_v4, 0.0  ;;  %v8759_v27 = vpop.f32.mrb[3].mxu1  ;;  %vm6347_vm4 = vcmask 1042434   ;;  %vm6349_vm5 = vcmask 1043459   ;;  %vm6351_vm6 = vcmask 1044484  }
  0xe9   :  { %v5215_v5 = vsel %vm5213_vm2, %v4702_v2, 0.0  ;;  %v7374_v6 = vpop.f32.mrb[4].mxu0  ;;  %v8775_v43 = vpop.f32.mrb[4].mxu1  ;;  %v8029_v2 = vld [vmem:[%s11122_s0 + $0x1e8] sm:$0xff]   ;;  %vm6353_vm7 = vcmask 1045509   ;;  %vm6355_vm8 = vcmask 1046534  }
  0xea   :  { %v5216_v7 = vadd.f32 %v5215_v5, %v5214_v3  ;;  %v2670_v8 = vpop.f32.mrb[5].mxu0  ;;  %v2679_v11 = vadd.f32 %v7374_v6, %v8707_v51  ;;  %v8780_v47 = vpop.f32.mrb[5].mxu1  ;;  %vm6357_vm9 = vcmask 1047559   ;;  %vm6456_vm10 = vcmask 130048  }
  0xeb   :  { %v2671_v12 = vadd.f32 %v8707_v51, %v2670_v8  ;;  %v7375_v13 = vpop.f32.mrb[6].mxu0  ;;  %v8785_v53 = vpop.f32.mrb[6].mxu1  ;;  %vm6550_vm11 = vcmask 64512  }
  0xec   :  { %v5218_v16 = vadd.f32 %v5217_v10, %v5216_v7  ;;  %v2673_v17 = vpop.f32.mrb[7].mxu0  ;;  %v2682_v22 = vadd.f32 %v7375_v13, %v8707_v51  ;;  %v4707_v28 = vmax.f32 %v2679_v11, 0.0  ;;  %v8791_v56 = vpop.f32.mrb[7].mxu1  ;;  %v8032_v7 = vld [vmem:[%s11122_s0 + $0x1f0] sm:$0xff]   ;;  %v8059_v11 = vld [vmem:[%s11122_s0 + $0x5e8] sm:$0xff]  }
  0xed   :  { %v4705_v21 = vmax.f32 %v2671_v12, 0.0  ;;  %v2674_v23 = vadd.f32 %v8707_v51, %v2673_v17  ;;  %7737 = vmatmul.mubr.msk.bf16.gmra.mrb[108].mxu1 %vm1847_vm0, %v8051_v18 }
  0xee   :  { %v5220_v26 = vadd.f32 %v5219_v20, %v5218_v16  ;;  %7481 = vmatmul.mubr.msk.bf16.gmra.mrb[112].mxu0 %vm1847_vm0, %v8021_v9  ;;  %v4708_v32 = vmax.f32 %v2682_v22, 0.0  ;;  %7740 = vmatprep.mubr.msk.bf16.mxu1 %vm1847_vm0, %v8054_v25  ;;  %v5225_v38 = vsel %vm5213_vm2, %v4707_v28, 0.0  ;;  %v8062_v20 = vld [vmem:[%s11122_s0 + $0x5f0] sm:$0xff]  }
  0xef   :  { %v5221_v29 = vsel %vm5213_vm2, %v4705_v21, 0.0  ;;  %v4706_v30 = vmax.f32 %v2674_v23, 0.0  ;;  %7484 = vmatprep.mubr.msk.bf16.mxu0 %vm1847_vm0, %v8024_v14 }
  0xf0   :  { %v5222_v31 = vadd.f32 %v5221_v29, %v5220_v26  ;;  %v5227_v48 = vsel %vm5213_vm2, %v4708_v32, 0.0 }
  0xf1   :  { %v5223_v33 = vsel %vm5213_vm2, %v4706_v30, 0.0  ;;  %v7378_v34 = vpop.f32.mrb[8].mxu0  ;;  %v8807_v8 = vpop.f32.mrb[8].mxu1 }
  0xf2   :  { %v5224_v35 = vadd.f32 %v5223_v33, %v5222_v31  ;;  %v2686_v36 = vpop.f32.mrb[9].mxu0  ;;  %v2695_v39 = vadd.f32 %v7378_v34, %v8707_v51  ;;  %v8812_v12 = vpop.f32.mrb[9].mxu1  ;;  %v8033_v34 = vld [vmem:[%s11122_s0 + $0x1f8] sm:$0xff]  }
  0xf3   :  { %v2687_v40 = vadd.f32 %v8707_v51, %v2686_v36  ;;  %v7379_v41 = vpop.f32.mrb[10].mxu0  ;;  %v8817_v18 = vpop.f32.mrb[10].mxu1 }
  0xf4   :  { %v5226_v44 = vadd.f32 %v5225_v38, %v5224_v35  ;;  %v2689_v45 = vpop.f32.mrb[11].mxu0  ;;  %v2698_v50 = vadd.f32 %v7379_v41, %v8707_v51  ;;  %v4711_v57 = vmax.f32 %v2695_v39, 0.0  ;;  %v8823_v22 = vpop.f32.mrb[11].mxu1  ;;  %v8036_v39 = vld [vmem:[%s11122_s0 + $0x200] sm:$0xff]  }
  0xf5   :  { %v4709_v49 = vmax.f32 %v2687_v40, 0.0  ;;  %v2690_v52 = vadd.f32 %v8707_v51, %v2689_v45  ;;  %7741 = vmatmul.mubr.msk.bf16.gmra.mrb[112].mxu1 %vm1847_vm0, %v8055_v46 }
  0xf6   :  { %v5228_v55 = vadd.f32 %v5227_v48, %v5226_v44  ;;  %7485 = vmatmul.mubr.msk.bf16.gmra.mrb[116].mxu0 %vm1847_vm0, %v8025_v37  ;;  %v4712_v61 = vmax.f32 %v2698_v50, 0.0  ;;  %7744 = vmatprep.mubr.msk.bf16.mxu1 %vm1847_vm0, %v8058_v54  ;;  %v5233_v3 = vsel %vm5213_vm2, %v4711_v57, 0.0  ;;  %v8063_v44 = vld [vmem:[%s11122_s0 + $0x5f8] sm:$0xff]   ;;  %v8066_v54 = vld [vmem:[%s11122_s0 + $0x600] sm:$0xff]  }
  0xf7   :  { %v5229_v58 = vsel %vm5213_vm2, %v4709_v49, 0.0  ;;  %v4710_v59 = vmax.f32 %v2690_v52, 0.0  ;;  %7488 = vmatprep.mubr.msk.bf16.mxu0 %vm1847_vm0, %v8028_v42 }
  0xf8   :  { %v5230_v60 = vadd.f32 %v5229_v58, %v5228_v55  ;;  %v5235_v13 = vsel %vm5213_vm2, %v4712_v61, 0.0 }
  0xf9   :  { %v5231_v62 = vsel %vm5213_vm2, %v4710_v59, 0.0  ;;  %v7382_v63 = vpop.f32.mrb[12].mxu0  ;;  %v8839_v40 = vpop.f32.mrb[12].mxu1 }
  0xfa   :  { %v5232_v0 = vadd.f32 %v5231_v62, %v5230_v60  ;;  %v2702_v1 = vpop.f32.mrb[13].mxu0  ;;  %v2711_v4 = vadd.f32 %v7382_v63, %v8707_v51  ;;  %11136 = vst [vmem:[#allocation5_spill] sm:$0xff] %v8839_v40  ;;  %v8844_v45 = vpop.f32.mrb[13].mxu1 }
  0xfb   :  { %v2703_v5 = vadd.f32 %v8707_v51, %v2702_v1  ;;  %v7383_v6 = vpop.f32.mrb[14].mxu0  ;;  %v8849_v52 = vpop.f32.mrb[14].mxu1 }
  0xfc   :  { %v5234_v9 = vadd.f32 %v5233_v3, %v5232_v0  ;;  %v2705_v10 = vpop.f32.mrb[15].mxu0  ;;  %v2714_v16 = vadd.f32 %v7383_v6, %v8707_v51  ;;  %v4715_v23 = vmax.f32 %v2711_v4, 0.0  ;;  %11137 = vst [vmem:[#allocation6_spill] sm:$0xff] %v8849_v52  ;;  %v8855_v57 = vpop.f32.mrb[15].mxu1  ;;  %v8037_v3 = vld [vmem:[%s11122_s0 + $0x208] sm:$0xff]  }
  0xfd   :  { %v4713_v14 = vmax.f32 %v2703_v5, 0.0  ;;  %v2706_v17 = vadd.f32 %v8707_v51, %v2705_v10  ;;  %7745 = vmatmul.mubr.msk.bf16.gmra.mrb[116].mxu1 %vm1847_vm0, %v8059_v11  ;;  %11138 = vst [vmem:[#allocation7_spill] sm:$0xff] %v8855_v57 }
  0xfe   :  { %v5236_v21 = vadd.f32 %v5235_v13, %v5234_v9  ;;  %7489 = vmatmul.mubr.msk.bf16.gmra.mrb[120].mxu0 %vm1847_vm0, %v8029_v2  ;;  %v4716_v29 = vmax.f32 %v2714_v16, 0.0  ;;  %7748 = vmatprep.mubr.msk.bf16.mxu1 %vm1847_vm0, %v8062_v20  ;;  %v5241_v35 = vsel %vm5213_vm2, %v4715_v23, 0.0  ;;  %v8040_v9 = vld [vmem:[%s11122_s0 + $0x210] sm:$0xff]  }
  0xff   :  { %v5237_v25 = vsel %vm5213_vm2, %v4713_v14, 0.0  ;;  %v4714_v26 = vmax.f32 %v2706_v17, 0.0  ;;  %7492 = vmatprep.mubr.msk.bf16.mxu0 %vm1847_vm0, %v8032_v7  ;;  %v8067_v14 = vld [vmem:[%s11122_s0 + $0x608] sm:$0xff]  }
 0x100   :  { %v5238_v28 = vadd.f32 %v5237_v25, %v5236_v21  ;;  %v5243_v46 = vsel %vm5213_vm2, %v4716_v29, 0.0 }
 0x101   :  { %v5239_v30 = vsel %vm5213_vm2, %v4714_v26, 0.0  ;;  %v7386_v31 = vpop.f32.mrb[16].mxu0  ;;  %v8871_v10 = vpop.f32.mrb[16].mxu1  ;;  %v8070_v26 = vld [vmem:[%s11122_s0 + $0x610] sm:$0xff]  }
 0x102   :  { %v5240_v32 = vadd.f32 %v5239_v30, %v5238_v28  ;;  %v2718_v33 = vpop.f32.mrb[17].mxu0  ;;  %v2727_v36 = vadd.f32 %v7386_v31, %v8707_v51  ;;  %11139 = vst [vmem:[#allocation8_spill] sm:$0xff] %v8871_v10  ;;  %v8876_v16 = vpop.f32.mrb[17].mxu1 }
 0x103   :  { %v2719_v37 = vadd.f32 %v8707_v51, %v2718_v33  ;;  %v7387_v38 = vpop.f32.mrb[18].mxu0  ;;  %11140 = vst [vmem:[#allocation9_spill] sm:$0xff] %v8876_v16  ;;  %v8881_v25 = vpop.f32.mrb[18].mxu1 }
 0x104   :  { %v5242_v41 = vadd.f32 %v5241_v35, %v5240_v32  ;;  %v2721_v42 = vpop.f32.mrb[19].mxu0  ;;  %v2730_v49 = vadd.f32 %v7387_v38, %v8707_v51  ;;  %v4719_v58 = vmax.f32 %v2727_v36, 0.0  ;;  %11141 = vst [vmem:[#allocation10_spill] sm:$0xff] %v8881_v25  ;;  %v8887_v29 = vpop.f32.mrb[19].mxu1 }
 0x105   :  { %v4717_v48 = vmax.f32 %v2719_v37, 0.0  ;;  %v2722_v50 = vadd.f32 %v8707_v51, %v2721_v42  ;;  %7749 = vmatmul.mubr.msk.bf16.gmra.mrb[120].mxu1 %vm1847_vm0, %v8063_v44  ;;  %11142 = vst [vmem:[#allocation11_spill] sm:$0xff] %v8887_v29 }
 0x106   :  { %v5244_v55 = vadd.f32 %v5243_v46, %v5242_v41  ;;  %7493 = vmatmul.mubr.msk.bf16.gmra.mrb[124].mxu0 %vm1847_vm0, %v8033_v34  ;;  %v4720_v62 = vmax.f32 %v2730_v49, 0.0  ;;  %7752 = vmatprep.mubr.msk.bf16.mxu1 %vm1847_vm0, %v8066_v54  ;;  %v5249_v4 = vsel %vm5213_vm2, %v4719_v58, 0.0 }
 0x107   :  { %v5245_v59 = vsel %vm5213_vm2, %v4717_v48, 0.0  ;;  %v4718_v60 = vmax.f32 %v2722_v50, 0.0  ;;  %7496 = vmatprep.mubr.msk.bf16.mxu0 %vm1847_vm0, %v8036_v39  ;;  %v8041_v39 = vld [vmem:[%s11122_s0 + $0x218] sm:$0xff]   ;;  %v8044_v48 = vld [vmem:[%s11122_s0 + $0x220] sm:$0xff]  }
 0x108   :  { %v5246_v61 = vadd.f32 %v5245_v59, %v5244_v55  ;;  %v5251_v17 = vsel %vm5213_vm2, %v4720_v62, 0.0  ;;  %v8071_v55 = vld [vmem:[%s11122_s0 + $0x618] sm:$0xff]  }
 0x109   :  { %v5247_v63 = vsel %vm5213_vm2, %v4718_v60, 0.0  ;;  %v7390_v0 = vpop.f32.mrb[20].mxu0  ;;  %v8903_v49 = vpop.f32.mrb[20].mxu1 }
 0x10a   :  { %v5248_v1 = vadd.f32 %v5247_v63, %v5246_v61  ;;  %v2734_v2 = vpop.f32.mrb[21].mxu0  ;;  %v2743_v5 = vadd.f32 %v7390_v0, %v8707_v51  ;;  %11143 = vst [vmem:[#allocation12_spill] sm:$0xff] %v8903_v49  ;;  %v8908_v58 = vpop.f32.mrb[21].mxu1  ;;  %v8074_v0 = vld [vmem:[%s11122_s0 + $0x620] sm:$0xff]  }
 0x10b   :  { %v2735_v6 = vadd.f32 %v8707_v51, %v2734_v2  ;;  %v7391_v7 = vpop.f32.mrb[22].mxu0  ;;  %11144 = vst [vmem:[#allocation13_spill] sm:$0xff] %v8908_v58  ;;  %v8913_v63 = vpop.f32.mrb[22].mxu1 }
 0x10c   :  { %v5250_v11 = vadd.f32 %v5249_v4, %v5248_v1  ;;  %v2737_v13 = vpop.f32.mrb[23].mxu0  ;;  %v2746_v21 = vadd.f32 %v7391_v7, %v8707_v51  ;;  %v4723_v30 = vmax.f32 %v2743_v5, 0.0  ;;  %11145 = vst [vmem:[#allocation14_spill] sm:$0xff] %v8913_v63  ;;  %v8919_v2 = vpop.f32.mrb[23].mxu1 }
 0x10d   :  { %v4721_v20 = vmax.f32 %v2735_v6, 0.0  ;;  %v2738_v23 = vadd.f32 %v8707_v51, %v2737_v13  ;;  %7753 = vmatmul.mubr.msk.bf16.gmra.mrb[124].mxu1 %vm1847_vm0, %v8067_v14  ;;  %11146 = vst [vmem:[#allocation15_spill] sm:$0xff] %v8919_v2 }
 0x10e   :  { %v5252_v28 = vadd.f32 %v5251_v17, %v5250_v11  ;;  %7497 = vmatmul.mubr.msk.bf16.gmra.mrb[128].mxu0 %vm1847_vm0, %v8037_v3  ;;  %v4724_v34 = vmax.f32 %v2746_v21, 0.0  ;;  %7756 = vmatprep.mubr.msk.bf16.mxu1 %vm1847_vm0, %v8070_v26  ;;  %v5257_v41 = vsel %vm5213_vm2, %v4723_v30, 0.0  ;;  %v8045_v17 = vld [vmem:[%s11122_s0 + $0x228] sm:$0xff]  }
 0x10f   :  { %v5253_v31 = vsel %vm5213_vm2, %v4721_v20, 0.0  ;;  %v4722_v32 = vmax.f32 %v2738_v23, 0.0  ;;  %7500 = vmatprep.mubr.msk.bf16.mxu0 %vm1847_vm0, %v8040_v9 }
 0x110   :  { %v5254_v33 = vadd.f32 %v5253_v31, %v5252_v28  ;;  %v5259_v59 = vsel %vm5213_vm2, %v4724_v34, 0.0  ;;  %v8048_v28 = vld [vmem:[%s11122_s0 + $0x230] sm:$0xff]  }
 0x111   :  { %v5255_v35 = vsel %vm5213_vm2, %v4722_v32, 0.0  ;;  %v7394_v36 = vpop.f32.mrb[24].mxu0  ;;  %v8935_v30 = vpop.f32.mrb[24].mxu1 }
 0x112   :  { %v5256_v37 = vadd.f32 %v5255_v35, %v5254_v33  ;;  %v2750_v38 = vpop.f32.mrb[25].mxu0  ;;  %v2759_v42 = vadd.f32 %v7394_v36, %v8707_v51  ;;  %11147 = vst [vmem:[#allocation16_spill] sm:$0xff] %v8935_v30  ;;  %v8938_v34 = vpop.f32.mrb[25].mxu1  ;;  %v8075_v35 = vld [vmem:[%s11122_s0 + $0x628] sm:$0xff]  }
 0x113   :  { %v2751_v44 = vadd.f32 %v8707_v51, %v2750_v38  ;;  %v7395_v46 = vpop.f32.mrb[26].mxu0  ;;  %11148 = vst [vmem:[#allocation17_spill] sm:$0xff] %v8938_v34 }
 0x114   :  { %v5258_v50 = vadd.f32 %v5257_v41, %v5256_v37  ;;  %v2753_v54 = vpop.f32.mrb[27].mxu0  ;;  %v2762_v61 = vadd.f32 %v7395_v46, %v8707_v51  ;;  %v4727_v3 = vmax.f32 %v2759_v42, 0.0  ;;  %v8078_v41 = vld [vmem:[%s11122_s0 + $0x630] sm:$0xff]  }
 0x115   :  { %v4725_v60 = vmax.f32 %v2751_v44, 0.0  ;;  %v2754_v62 = vadd.f32 %v8707_v51, %v2753_v54  ;;  %7757 = vmatmul.mubr.msk.bf16.gmra.mrb[128].mxu1 %vm1847_vm0, %v8071_v55 }
 0x116   :  { %v5260_v1 = vadd.f32 %v5259_v59, %v5258_v50  ;;  %7501 = vmatmul.mubr.msk.bf16.gmra.mrb[132].mxu0 %vm1847_vm0, %v8041_v39  ;;  %v4728_v7 = vmax.f32 %v2762_v61, 0.0  ;;  %7760 = vmatprep.mubr.msk.bf16.mxu1 %vm1847_vm0, %v8074_v0  ;;  %v5265_v20 = vsel %vm5213_vm2, %v4727_v3, 0.0  ;;  %v8945_v39 = vpop.f32.mrb[26].mxu1  ;;  %v8049_v0 = vld [vmem:[%s11122_s0 + $0x238] sm:$0xff]  }
 0x117   :  { %v5261_v4 = vsel %vm5213_vm2, %v4725_v60, 0.0  ;;  %v4726_v5 = vmax.f32 %v2754_v62, 0.0  ;;  %7504 = vmatprep.mubr.msk.bf16.mxu0 %vm1847_vm0, %v8044_v48  ;;  %11149 = vst [vmem:[#allocation18_spill] sm:$0xff] %v8945_v39  ;;  %v8951_v44 = vpop.f32.mrb[27].mxu1 }
 0x118   :  { %v5262_v6 = vadd.f32 %v5261_v4, %v5260_v1  ;;  %v5267_v36 = vsel %vm5213_vm2, %v4728_v7, 0.0  ;;  %11150 = vst [vmem:[#allocation19_spill] sm:$0xff] %v8951_v44 }
 0x119   :  { %v5263_v9 = vsel %vm5213_vm2, %v4726_v5, 0.0  ;;  %v7398_v11 = vpop.f32.mrb[28].mxu0  ;;  %v7658_v7 = vpop.f32.mrb[28].mxu1 }
 0x11a   :  { %v5264_v13 = vadd.f32 %v5263_v9, %v5262_v6  ;;  %v2766_v14 = vpop.f32.mrb[29].mxu0  ;;  %v2775_v21 = vadd.f32 %v7398_v11, %v8707_v51  ;;  %v8052_v6 = vld [vmem:[%s11122_s0 + $0x240] sm:$0xff]  }
 0x11b   :  { %v2767_v23 = vadd.f32 %v8707_v51, %v2766_v14  ;;  %v7399_v26 = vpop.f32.mrb[30].mxu0  ;;  %v3806_v14 = vpop.f32.mrb[29].mxu1 }
 0x11c   :  { %v5266_v31 = vadd.f32 %v5265_v20, %v5264_v13  ;;  %v2778_v32 = vadd.f32 %v7399_v26, %v8707_v51  ;;  %v2769_v33 = vpop.f32.mrb[31].mxu0  ;;  %v4731_v46 = vmax.f32 %v2775_v21, 0.0  ;;  %v3807_v26 = vadd.f32 %v8707_v51, %v3806_v14 }
 0x11d   :  { %v4729_v37 = vmax.f32 %v2767_v23, 0.0  ;;  %v2770_v38 = vadd.f32 %v8707_v51, %v2769_v33  ;;  %7761 = vmatmul.mubr.msk.bf16.gmra.mrb[132].mxu1 %vm1847_vm0, %v8075_v35  ;;  %v3815_v33 = vadd.f32 %v7658_v7, %v8707_v51 }
 0x11e   :  { %v5268_v42 = vadd.f32 %v5267_v36, %v5266_v31  ;;  %7505 = vmatmul.mubr.msk.bf16.gmra.mrb[136].mxu0 %vm1847_vm0, %v8045_v17  ;;  %v4732_v55 = vmax.f32 %v2778_v32, 0.0  ;;  %7764 = vmatprep.mubr.msk.bf16.mxu1 %vm1847_vm0, %v8078_v41  ;;  %v5273_v1 = vsel %vm5213_vm2, %v4731_v46, 0.0  ;;  %v8079_v17 = vld [vmem:[%s11122_s0 + $0x638] sm:$0xff]   ;;  %v8082_v31 = vld [vmem:[%s11122_s0 + $0x640] sm:$0xff]  }
 0x11f   :  { %v5269_v48 = vsel %vm5213_vm2, %v4729_v37, 0.0  ;;  %v4730_v50 = vmax.f32 %v2770_v38, 0.0  ;;  %7508 = vmatprep.mubr.msk.bf16.mxu0 %vm1847_vm0, %v8048_v28  ;;  %v7659_v28 = vpop.f32.mrb[30].mxu1  ;;  %v4989_v38 = vmax.f32 %v3807_v26, 0.0 }
 0x120   :  { %v5270_v54 = vadd.f32 %v5269_v48, %v5268_v42  ;;  %v5275_v9 = vsel %vm5213_vm2, %v4732_v55, 0.0  ;;  %v3809_v35 = vpop.f32.mrb[31].mxu1  ;;  %v3818_v41 = vadd.f32 %v7659_v28, %v8707_v51 }
 0x121   :  { %v5271_v59 = vsel %vm5213_vm2, %v4730_v50, 0.0  ;;  %v7402_v60 = vpop.f32.mrb[32].mxu0  ;;  %v3810_v42 = vadd.f32 %v8707_v51, %v3809_v35 }
 0x122   :  { %v5272_v61 = vadd.f32 %v5271_v59, %v5270_v54  ;;  %v2782_v62 = vpop.f32.mrb[33].mxu0  ;;  %v2791_v3 = vadd.f32 %v7402_v60, %v8707_v51  ;;  %v4992_v14 = vmax.f32 %v3818_v41, 0.0 }
 0x123   :  { %v2783_v4 = vadd.f32 %v8707_v51, %v2782_v62  ;;  %v7403_v5 = vpop.f32.mrb[34].mxu0  ;;  %v4991_v62 = vmax.f32 %v3815_v33, 0.0  ;;  %v8086_v33 = vld [vmem:[%s11122_s0 + $0x650] sm:$0xff]  }
 0x124   :  { %v5274_v11 = vadd.f32 %v5273_v1, %v5272_v61  ;;  %v2785_v13 = vpop.f32.mrb[35].mxu0  ;;  %v2794_v21 = vadd.f32 %v7403_v5, %v8707_v51  ;;  %v4735_v36 = vmax.f32 %v2791_v3, 0.0  ;;  %v8053_v61 = vld [vmem:[%s11122_s0 + $0x248] sm:$0xff]   ;;  %v4990_v5 = vmax.f32 %v3810_v42, 0.0 }
 0x125   :  { %v4733_v20 = vmax.f32 %v2783_v4, 0.0  ;;  %v2786_v23 = vadd.f32 %v8707_v51, %v2785_v13  ;;  %7765 = vmatmul.mubr.msk.bf16.gmra.mrb[136].mxu1 %vm1847_vm0, %v8079_v17  ;;  %v8056_v4 = vld [vmem:[%s11122_s0 + $0x250] sm:$0xff]   ;;  %v5835_v13 = vsel %vm5213_vm2, %v4989_v38, 0.0 }
 0x126   :  { %v8977_v32 = vadd.f32 %v5275_v9, %v5274_v11  ;;  %7509 = vmatmul.mubr.msk.bf16.gmra.mrb[140].mxu0 %vm1847_vm0, %v8049_v0  ;;  %v4736_v48 = vmax.f32 %v2794_v21, 0.0  ;;  %7768 = vmatprep.mubr.msk.bf16.mxu1 %vm1847_vm0, %v8082_v31  ;;  %v5286_v0 = vsel %vm5213_vm2, %v4735_v36, 0.0  ;;  %v5836_v28 = vsel %vm5213_vm2, %v4990_v5, 0.0 }
 0x127   :  { %v4734_v37 = vmax.f32 %v2786_v23, 0.0  ;;  %7512 = vmatprep.mubr.msk.bf16.mxu0 %vm1847_vm0, %v8052_v6  ;;  %v5283_v46 = vsel %vm5213_vm2, %v4733_v20, 0.0  ;;  %v7662_v6 = vpop.f32.mrb[32].mxu1  ;;  %v8083_v20 = vld [vmem:[%s11122_s0 + $0x648] sm:$0xff]  }
 0x128   :  { %v3822_v17 = vpop.f32.mrb[33].mxu1  ;;  %v5288_v21 = vsel %vm5213_vm2, %v4736_v48, 0.0  ;;  %v3831_v48 = vadd.f32 %v7662_v6, %v8707_v51  ;;  %v8057_v6 = vld [vmem:[%s11122_s0 + $0x258] sm:$0xff]  }
 0x129   :  { %v5284_v50 = vsel %vm5213_vm2, %v4734_v37, 0.0  ;;  %v7406_v54 = vpop.f32.mrb[36].mxu0  ;;  %v7663_v31 = vpop.f32.mrb[34].mxu1  ;;  %v5838_v37 = vsel %vm5213_vm2, %v4991_v62, 0.0 }
 0x12a   :  { %v5285_v55 = vadd.f32 %v5284_v50, %v5283_v46  ;;  %v2807_v59 = vadd.f32 %v7406_v54, %v8707_v51  ;;  %v2798_v60 = vpop.f32.mrb[37].mxu0  ;;  %v3825_v38 = vpop.f32.mrb[35].mxu1  ;;  %v5837_v46 = vadd.f32 %v5836_v28, %v5835_v13  ;;  %v8060_v13 = vld [vmem:[%s11122_s0 + $0x260] sm:$0xff]  }
 0x12b   :  { %v2799_v1 = vadd.f32 %v8707_v51, %v2798_v60  ;;  %v7407_v3 = vpop.f32.mrb[38].mxu0 }
 0x12c   :  { %v5287_v7 = vadd.f32 %v5286_v0, %v5285_v55  ;;  %v2810_v9 = vadd.f32 %v7407_v3, %v8707_v51  ;;  %v2801_v11 = vpop.f32.mrb[39].mxu0  ;;  %v4739_v35 = vmax.f32 %v2807_v59, 0.0  ;;  %v5840_v55 = vsel %vm5213_vm2, %v4992_v14, 0.0 }
 0x12d   :  { %v4737_v23 = vmax.f32 %v2799_v1, 0.0  ;;  %v2802_v26 = vadd.f32 %v8707_v51, %v2801_v11  ;;  %v3823_v59 = vadd.f32 %v8707_v51, %v3822_v17  ;;  %7769 = vmatmul.mubr.msk.bf16.gmra.mrb[140].mxu1 %vm1847_vm0, %v8083_v20  ;;  %v5839_v62 = vadd.f32 %v5838_v37, %v5837_v46 }
 0x12e   :  { %v5289_v36 = vadd.f32 %v5288_v21, %v5287_v7  ;;  %7513 = vmatmul.mubr.msk.bf16.gmra.mrb[144].mxu0 %vm1847_vm0, %v8053_v61  ;;  %v4740_v54 = vmax.f32 %v2810_v9, 0.0  ;;  %v3834_v0 = vadd.f32 %v7663_v31, %v8707_v51  ;;  %7772 = vmatprep.mubr.msk.bf16.mxu1 %vm1847_vm0, %v8086_v33  ;;  %v5294_v1 = vsel %vm5213_vm2, %v4739_v35, 0.0  ;;  %v7666_v21 = vpop.f32.mrb[36].mxu1 }
 0x12f   :  { %v5290_v41 = vsel %vm5213_vm2, %v4737_v23, 0.0  ;;  %v4738_v42 = vmax.f32 %v2802_v26, 0.0  ;;  %7516 = vmatprep.mubr.msk.bf16.mxu0 %vm1847_vm0, %v8056_v4  ;;  %v4993_v7 = vmax.f32 %v3823_v59, 0.0  ;;  %v4995_v14 = vmax.f32 %v3831_v48, 0.0  ;;  %v3838_v35 = vpop.f32.mrb[37].mxu1  ;;  %v8090_v48 = vld [vmem:[%s11122_s0 + $0x660] sm:$0xff]  }
 0x130   :  { %v5291_v50 = vadd.f32 %v5290_v41, %v5289_v36  ;;  %v5841_v17 = vadd.f32 %v5840_v55, %v5839_v62  ;;  %v3826_v20 = vadd.f32 %v8707_v51, %v3825_v38  ;;  %v5296_v23 = vsel %vm5213_vm2, %v4740_v54, 0.0  ;;  %v8087_v36 = vld [vmem:[%s11122_s0 + $0x658] sm:$0xff]   ;;  %v7667_v38 = vpop.f32.mrb[38].mxu1 }
 0x131   :  { %v5292_v60 = vsel %vm5213_vm2, %v4738_v42, 0.0  ;;  %v7410_v61 = vpop.f32.mrb[40].mxu0  ;;  %v5842_v33 = vsel %vm5213_vm2, %v4993_v7, 0.0  ;;  %v4996_v46 = vmax.f32 %v3834_v0, 0.0  ;;  %v3839_v0 = vadd.f32 %v8707_v51, %v3838_v35 }
 0x132   :  { %v5293_v3 = vadd.f32 %v5292_v60, %v5291_v50  ;;  %v2823_v4 = vadd.f32 %v7410_v61, %v8707_v51  ;;  %v2814_v5 = vpop.f32.mrb[41].mxu0  ;;  %v5843_v42 = vadd.f32 %v5842_v33, %v5841_v17  ;;  %v4994_v59 = vmax.f32 %v3826_v20, 0.0  ;;  %v3841_v60 = vpop.f32.mrb[39].mxu1 }
 0x133   :  { %v2815_v9 = vadd.f32 %v8707_v51, %v2814_v5  ;;  %v7411_v11 = vpop.f32.mrb[42].mxu0  ;;  %v5846_v5 = vsel %vm5213_vm2, %v4995_v14, 0.0  ;;  %v3850_v7 = vadd.f32 %v7667_v38, %v8707_v51  ;;  %v8061_v14 = vld [vmem:[%s11122_s0 + $0x268] sm:$0xff]  }
 0x134   :  { %v5295_v26 = vadd.f32 %v5294_v1, %v5293_v3  ;;  %v2826_v28 = vadd.f32 %v7411_v11, %v8707_v51  ;;  %v2817_v31 = vpop.f32.mrb[43].mxu0  ;;  %v4743_v50 = vmax.f32 %v2823_v4, 0.0  ;;  %v3847_v1 = vadd.f32 %v7666_v21, %v8707_v51 }
 0x135   :  { %v4741_v37 = vmax.f32 %v2815_v9, 0.0  ;;  %v2818_v41 = vadd.f32 %v8707_v51, %v2817_v31  ;;  %v5844_v4 = vsel %vm5213_vm2, %v4994_v59, 0.0  ;;  %7773 = vmatmul.mubr.msk.bf16.gmra.mrb[144].mxu1 %vm1847_vm0, %v8087_v36  ;;  %v5848_v11 = vsel %vm5213_vm2, %v4996_v46, 0.0 }
 0x136   :  { %v5297_v54 = vadd.f32 %v5296_v23, %v5295_v26  ;;  %v4744_v55 = vmax.f32 %v2826_v28, 0.0  ;;  %7517 = vmatmul.mubr.msk.bf16.gmra.mrb[148].mxu0 %vm1847_vm0, %v8057_v6  ;;  %v5845_v17 = vadd.f32 %v5844_v4, %v5843_v42  ;;  %7776 = vmatprep.mubr.msk.bf16.mxu1 %vm1847_vm0, %v8090_v48  ;;  %v4999_v26 = vmax.f32 %v3847_v1, 0.0  ;;  %v7670_v42 = vpop.f32.mrb[40].mxu1 }
 0x137   :  { %v5298_v61 = vsel %vm5213_vm2, %v4741_v37, 0.0  ;;  %v4742_v62 = vmax.f32 %v2818_v41, 0.0  ;;  %7520 = vmatprep.mubr.msk.bf16.mxu0 %vm1847_vm0, %v8060_v13  ;;  %v4997_v13 = vmax.f32 %v3839_v0, 0.0  ;;  %v3842_v28 = vadd.f32 %v8707_v51, %v3841_v60  ;;  %v8064_v37 = vld [vmem:[%s11122_s0 + $0x270] sm:$0xff]   ;;  %v3854_v60 = vpop.f32.mrb[41].mxu1 }
 0x138   :  { %v5299_v3 = vadd.f32 %v5298_v61, %v5297_v54  ;;  %v5302_v31 = vsel %vm5213_vm2, %v4743_v50, 0.0  ;;  %v5304_v33 = vsel %vm5213_vm2, %v4744_v55, 0.0  ;;  %v5847_v41 = vadd.f32 %v5846_v5, %v5845_v17  ;;  %v8091_v50 = vld [vmem:[%s11122_s0 + $0x668] sm:$0xff]   ;;  %v7671_v0 = vpop.f32.mrb[42].mxu1 }
 0x139   :  { %v5300_v6 = vsel %vm5213_vm2, %v4742_v62, 0.0  ;;  %v7414_v9 = vpop.f32.mrb[44].mxu0  ;;  %v5850_v54 = vsel %vm5213_vm2, %v4997_v13, 0.0  ;;  %v5000_v59 = vmax.f32 %v3850_v7, 0.0  ;;  %v4998_v1 = vmax.f32 %v3842_v28, 0.0 }
 0x13a   :  { %v5301_v20 = vadd.f32 %v5300_v6, %v5299_v3  ;;  %v2839_v21 = vadd.f32 %v7414_v9, %v8707_v51  ;;  %v2830_v23 = vpop.f32.mrb[45].mxu0  ;;  %v5849_v62 = vadd.f32 %v5848_v11, %v5847_v41  ;;  %v8094_v3 = vld [vmem:[%s11122_s0 + $0x670] sm:$0xff]   ;;  %v5854_v7 = vsel %vm5213_vm2, %v4999_v26, 0.0  ;;  %v3857_v9 = vpop.f32.mrb[43].mxu1 }
 0x13b   :  { %v2831_v35 = vadd.f32 %v8707_v51, %v2830_v23  ;;  %v7415_v36 = vpop.f32.mrb[46].mxu0  ;;  %v3863_v6 = vadd.f32 %v7670_v42, %v8707_v51 }
 0x13c   :  { %v5303_v46 = vadd.f32 %v5302_v31, %v5301_v20  ;;  %v2842_v38 = vadd.f32 %v7415_v36, %v8707_v51  ;;  %v2833_v48 = vpop.f32.mrb[47].mxu0  ;;  %v4747_v5 = vmax.f32 %v2839_v21, 0.0  ;;  %v5851_v11 = vadd.f32 %v5850_v54, %v5849_v62  ;;  %v7674_v62 = vpop.f32.mrb[44].mxu1 }
 0x13d   :  { %v4745_v55 = vmax.f32 %v2831_v35, 0.0  ;;  %v2834_v61 = vadd.f32 %v8707_v51, %v2833_v48  ;;  %v5852_v20 = vsel %vm5213_vm2, %v4998_v1, 0.0  ;;  %v5856_v21 = vsel %vm5213_vm2, %v5000_v59, 0.0  ;;  %7777 = vmatmul.mubr.msk.bf16.gmra.mrb[148].mxu1 %vm1847_vm0, %v8091_v50  ;;  %v8068_v50 = vld [vmem:[%s11122_s0 + $0x280] sm:$0xff]  }
 0x13e   :  { %v5305_v4 = vadd.f32 %v5304_v33, %v5303_v46  ;;  %7521 = vmatmul.mubr.msk.bf16.gmra.mrb[152].mxu0 %vm1847_vm0, %v8061_v14  ;;  %v4748_v28 = vmax.f32 %v2842_v38, 0.0  ;;  %v3855_v31 = vadd.f32 %v8707_v51, %v3854_v60  ;;  %v5853_v33 = vadd.f32 %v5852_v20, %v5851_v11  ;;  %7780 = vmatprep.mubr.msk.bf16.mxu1 %vm1847_vm0, %v8094_v3  ;;  %v8065_v46 = vld [vmem:[%s11122_s0 + $0x278] sm:$0xff]  }
 0x13f   :  { %v5306_v17 = vsel %vm5213_vm2, %v4745_v55, 0.0  ;;  %v4746_v13 = vmax.f32 %v2834_v61, 0.0  ;;  %7524 = vmatprep.mubr.msk.bf16.mxu0 %vm1847_vm0, %v8064_v37  ;;  %v3866_v35 = vadd.f32 %v7671_v0, %v8707_v51  ;;  %v3858_v36 = vadd.f32 %v8707_v51, %v3857_v9  ;;  %v3870_v9 = vpop.f32.mrb[45].mxu1 }
 0x140   :  { %v5307_v23 = vadd.f32 %v5306_v17, %v5305_v4  ;;  %v5003_v38 = vmax.f32 %v3863_v6, 0.0  ;;  %v5001_v48 = vmax.f32 %v3855_v31, 0.0  ;;  %v5310_v54 = vsel %vm5213_vm2, %v4747_v5, 0.0  ;;  %v8095_v5 = vld [vmem:[%s11122_s0 + $0x678] sm:$0xff]   ;;  %v7675_v20 = vpop.f32.mrb[46].mxu1 }
 0x141   :  { %v5308_v14 = vsel %vm5213_vm2, %v4746_v13, 0.0  ;;  %v7418_v26 = vpop.f32.mrb[48].mxu0  ;;  %v5855_v55 = vadd.f32 %v5854_v7, %v5853_v33  ;;  %v5002_v61 = vmax.f32 %v3858_v36, 0.0  ;;  %v5004_v6 = vmax.f32 %v3866_v35, 0.0  ;;  %v3873_v35 = vpop.f32.mrb[47].mxu1 }
 0x142   :  { %v5309_v37 = vadd.f32 %v5308_v14, %v5307_v23  ;;  %v2855_v41 = vadd.f32 %v7418_v26, %v8707_v51  ;;  %v2846_v42 = vpop.f32.mrb[49].mxu0  ;;  %v5858_v4 = vsel %vm5213_vm2, %v5001_v48, 0.0  ;;  %v5312_v17 = vsel %vm5213_vm2, %v4748_v28, 0.0  ;;  %v8098_v23 = vld [vmem:[%s11122_s0 + $0x680] sm:$0xff]  }
 0x143   :  { %v2847_v59 = vadd.f32 %v8707_v51, %v2846_v42  ;;  %v7419_v60 = vpop.f32.mrb[50].mxu0  ;;  %v5857_v7 = vadd.f32 %v5856_v21, %v5855_v55  ;;  %v5862_v26 = vsel %vm5213_vm2, %v5003_v38, 0.0  ;;  %v5860_v33 = vsel %vm5213_vm2, %v5002_v61, 0.0 }
 0x144   :  { %v5311_v1 = vadd.f32 %v5310_v54, %v5309_v37  ;;  %v2858_v0 = vadd.f32 %v7419_v60, %v8707_v51  ;;  %v2849_v3 = vpop.f32.mrb[51].mxu0  ;;  %v4751_v31 = vmax.f32 %v2855_v41, 0.0  ;;  %v3879_v37 = vadd.f32 %v7674_v62, %v8707_v51 }
 0x145   :  { %v4749_v13 = vmax.f32 %v2847_v59, 0.0  ;;  %v2850_v11 = vadd.f32 %v8707_v51, %v2849_v3  ;;  %v5859_v21 = vadd.f32 %v5858_v4, %v5857_v7  ;;  %v5864_v41 = vsel %vm5213_vm2, %v5004_v6, 0.0  ;;  %7781 = vmatmul.mubr.msk.bf16.gmra.mrb[152].mxu1 %vm1847_vm0, %v8095_v5  ;;  %v8072_v5 = vld [vmem:[%s11122_s0 + $0x290] sm:$0xff]  }
 0x146   :  { %v5313_v14 = vadd.f32 %v5312_v17, %v5311_v1  ;;  %7525 = vmatmul.mubr.msk.bf16.gmra.mrb[156].mxu0 %vm1847_vm0, %v8065_v46  ;;  %v4752_v48 = vmax.f32 %v2858_v0, 0.0  ;;  %v3871_v54 = vadd.f32 %v8707_v51, %v3870_v9  ;;  %v3882_v60 = vadd.f32 %v7675_v20, %v8707_v51  ;;  %7784 = vmatprep.mubr.msk.bf16.mxu1 %vm1847_vm0, %v8098_v23  ;;  %v8069_v1 = vld [vmem:[%s11122_s0 + $0x288] sm:$0xff]  }
 0x147   :  { %v5314_v28 = vsel %vm5213_vm2, %v4749_v13, 0.0  ;;  %v4750_v36 = vmax.f32 %v2850_v11, 0.0  ;;  %7528 = vmatprep.mubr.msk.bf16.mxu0 %vm1847_vm0, %v8068_v50  ;;  %v5861_v59 = vadd.f32 %v5860_v33, %v5859_v21  ;;  %v3874_v55 = vadd.f32 %v8707_v51, %v3873_v35  ;;  %v7678_v11 = vpop.f32.mrb[48].mxu1 }
 0x148   :  { %v5315_v42 = vadd.f32 %v5314_v28, %v5313_v14  ;;  %v5007_v0 = vmax.f32 %v3879_v37, 0.0  ;;  %v5005_v3 = vmax.f32 %v3871_v54, 0.0  ;;  %v5318_v4 = vsel %vm5213_vm2, %v4751_v31, 0.0  ;;  %v3886_v35 = vpop.f32.mrb[49].mxu1  ;;  %v8099_v31 = vld [vmem:[%s11122_s0 + $0x688] sm:$0xff]  }
 0x149   :  { %v5316_v46 = vsel %vm5213_vm2, %v4750_v36, 0.0  ;;  %v7422_v38 = vpop.f32.mrb[52].mxu0  ;;  %v5863_v17 = vadd.f32 %v5862_v26, %v5861_v59  ;;  %v5006_v13 = vmax.f32 %v3874_v55, 0.0  ;;  %v5320_v7 = vsel %vm5213_vm2, %v4752_v48, 0.0  ;;  %v7679_v37 = vpop.f32.mrb[50].mxu1 }
 0x14a   :  { %v5317_v50 = vadd.f32 %v5316_v46, %v5315_v42  ;;  %v2871_v61 = vadd.f32 %v7422_v38, %v8707_v51  ;;  %v2862_v62 = vpop.f32.mrb[53].mxu0  ;;  %v5866_v33 = vsel %vm5213_vm2, %v5005_v3, 0.0  ;;  %v5008_v26 = vmax.f32 %v3882_v60, 0.0  ;;  %v8102_v42 = vld [vmem:[%s11122_s0 + $0x690] sm:$0xff]   ;;  %v3889_v59 = vpop.f32.mrb[51].mxu1 }
 0x14b   :  { %v2863_v6 = vadd.f32 %v8707_v51, %v2862_v62  ;;  %v7423_v9 = vpop.f32.mrb[54].mxu0  ;;  %v5865_v21 = vadd.f32 %v5864_v41, %v5863_v17  ;;  %v5870_v46 = vsel %vm5213_vm2, %v5007_v0, 0.0  ;;  %v5868_v38 = vsel %vm5213_vm2, %v5006_v13, 0.0  ;;  %v9143_v41 = vld [vmem:[%s11124_s2] ss:$0 sm:$0xff] }
 0x14c   :  { %v5319_v20 = vadd.f32 %v5318_v4, %v5317_v50  ;;  %v2874_v23 = vadd.f32 %v7423_v9, %v8707_v51  ;;  %v2865_v14 = vpop.f32.mrb[55].mxu0  ;;  %v4755_v48 = vmax.f32 %v2871_v61, 0.0  ;;  %v3895_v60 = vadd.f32 %v9143_v41, %v7678_v11 }
 0x14d   :  { %v4753_v28 = vmax.f32 %v2863_v6, 0.0  ;;  %v2866_v36 = vadd.f32 %v8707_v51, %v2865_v14  ;;  %v5867_v51 = vadd.f32 %v5866_v33, %v5865_v21  ;;  %v3898_v0 = vadd.f32 %v9143_v41, %v7679_v37  ;;  %7785 = vmatmul.mubr.msk.bf16.gmra.mrb[156].mxu1 %vm1847_vm0, %v8099_v31  ;;  %v8076_v31 = vld [vmem:[%s11122_s0 + $0x2a0] sm:$0xff]   ;;  %v7682_v21 = vpop.f32.mrb[52].mxu1 }
 0x14e   :  { %v5321_v54 = vadd.f32 %v5320_v7, %v5319_v20  ;;  %7529 = vmatmul.mubr.msk.bf16.gmra.mrb[160].mxu0 %vm1847_vm0, %v8069_v1  ;;  %v4756_v62 = vmax.f32 %v2874_v23, 0.0  ;;  %v3887_v1 = vadd.f32 %v9143_v41, %v3886_v35  ;;  %v5872_v6 = vsel %vm5213_vm2, %v5008_v26, 0.0  ;;  %7788 = vmatprep.mubr.msk.bf16.mxu1 %vm1847_vm0, %v8102_v42  ;;  %v8073_v7 = vld [vmem:[%s11122_s0 + $0x298] sm:$0xff]  }
 0x14f   :  { %v5322_v55 = vsel %vm5213_vm2, %v4753_v28, 0.0  ;;  %v4754_v50 = vmax.f32 %v2866_v36, 0.0  ;;  %7532 = vmatprep.mubr.msk.bf16.mxu0 %vm1847_vm0, %v8072_v5  ;;  %v5869_v9 = vadd.f32 %v5868_v38, %v5867_v51  ;;  %v3890_v5 = vadd.f32 %v9143_v41, %v3889_v59  ;;  %v3902_v59 = vpop.f32.mrb[53].mxu1 }
 0x150   :  { %v5323_v61 = vadd.f32 %v5322_v55, %v5321_v54  ;;  %v5011_v20 = vmax.f32 %v3895_v60, 0.0  ;;  %v5009_v23 = vmax.f32 %v3887_v1, 0.0  ;;  %v5326_v14 = vsel %vm5213_vm2, %v4755_v48, 0.0  ;;  %v8103_v48 = vld [vmem:[%s11122_s0 + $0x698] sm:$0xff]   ;;  %v7683_v60 = vpop.f32.mrb[54].mxu1 }
 0x151   :  { %v5324_v3 = vsel %vm5213_vm2, %v4754_v50, 0.0  ;;  %v7426_v4 = vpop.f32.mrb[56].mxu0  ;;  %v5871_v28 = vadd.f32 %v5870_v46, %v5869_v9  ;;  %v5010_v36 = vmax.f32 %v3890_v5, 0.0  ;;  %v5328_v26 = vsel %vm5213_vm2, %v4756_v62, 0.0 }
 0x152   :  { %v5325_v17 = vadd.f32 %v5324_v3, %v5323_v61  ;;  %v2887_v13 = vadd.f32 %v9143_v41, %v7426_v4  ;;  %v2878_v11 = vpop.f32.mrb[57].mxu0  ;;  %v5874_v54 = vsel %vm5213_vm2, %v5009_v23, 0.0  ;;  %v5012_v38 = vmax.f32 %v3898_v0, 0.0  ;;  %v8106_v61 = vld [vmem:[%s11122_s0 + $0x6a0] sm:$0xff]   ;;  %v3905_v4 = vpop.f32.mrb[55].mxu1 }
 0x153   :  { %v2879_v33 = vadd.f32 %v9143_v41, %v2878_v11  ;;  %v7427_v35 = vpop.f32.mrb[58].mxu0  ;;  %v5873_v46 = vadd.f32 %v5872_v6, %v5871_v28  ;;  %v5878_v0 = vsel %vm5213_vm2, %v5011_v20, 0.0  ;;  %v5876_v3 = vsel %vm5213_vm2, %v5010_v36, 0.0 }
 0x154   :  { %v5327_v37 = vadd.f32 %v5326_v14, %v5325_v17  ;;  %v2881_v42 = vpop.f32.mrb[59].mxu0  ;;  %v2890_v50 = vadd.f32 %v9143_v41, %v7427_v35  ;;  %v4759_v62 = vmax.f32 %v2887_v13, 0.0  ;;  %v3911_v17 = vadd.f32 %v9143_v41, %v7682_v21 }
 0x155   :  { %v4757_v55 = vmax.f32 %v2879_v33, 0.0  ;;  %v2882_v51 = vadd.f32 %v9143_v41, %v2881_v42  ;;  %v5875_v6 = vadd.f32 %v5874_v54, %v5873_v46  ;;  %v5880_v23 = vsel %vm5213_vm2, %v5012_v38, 0.0  ;;  %7789 = vmatmul.mubr.msk.bf16.gmra.mrb[160].mxu1 %vm1847_vm0, %v8103_v48  ;;  %v8080_v48 = vld [vmem:[%s11122_s0 + $0x2b0] sm:$0xff]  }
 0x156   :  { %v5329_v1 = vadd.f32 %v5328_v26, %v5327_v37  ;;  %7533 = vmatmul.mubr.msk.bf16.gmra.mrb[164].mxu0 %vm1847_vm0, %v8073_v7  ;;  %v3903_v13 = vadd.f32 %v9143_v41, %v3902_v59  ;;  %v3914_v7 = vadd.f32 %v9143_v41, %v7683_v60  ;;  %v4760_v20 = vmax.f32 %v2890_v50, 0.0  ;;  %7792 = vmatprep.mubr.msk.bf16.mxu1 %vm1847_vm0, %v8106_v61  ;;  %v8077_v26 = vld [vmem:[%s11122_s0 + $0x2a8] sm:$0xff]  }
 0x157   :  { %v5330_v9 = vsel %vm5213_vm2, %v4757_v55, 0.0  ;;  %v4758_v5 = vmax.f32 %v2882_v51, 0.0  ;;  %7536 = vmatprep.mubr.msk.bf16.mxu0 %vm1847_vm0, %v8076_v31  ;;  %v5877_v35 = vadd.f32 %v5876_v3, %v5875_v6  ;;  %v3906_v28 = vadd.f32 %v9143_v41, %v3905_v4  ;;  %v7686_v51 = vpop.f32.mrb[56].mxu1 }
 0x158   :  { %v5331_v11 = vadd.f32 %v5330_v9, %v5329_v1  ;;  %v5015_v37 = vmax.f32 %v3911_v17, 0.0  ;;  %v5013_v42 = vmax.f32 %v3903_v13, 0.0  ;;  %v5334_v54 = vsel %vm5213_vm2, %v4759_v62, 0.0  ;;  %v3918_v4 = vpop.f32.mrb[57].mxu1  ;;  %v8107_v62 = vld [vmem:[%s11122_s0 + $0x6a8] sm:$0xff]  }
 0x159   :  { %v5332_v14 = vsel %vm5213_vm2, %v4758_v5, 0.0  ;;  %v7430_v33 = vpop.f32.mrb[60].mxu0  ;;  %v5879_v55 = vadd.f32 %v5878_v0, %v5877_v35  ;;  %v5014_v50 = vmax.f32 %v3906_v28, 0.0  ;;  %v5016_v3 = vmax.f32 %v3914_v7, 0.0  ;;  %v7687_v17 = vpop.f32.mrb[58].mxu1 }
 0x15a   :  { %v5333_v31 = vadd.f32 %v5332_v14, %v5331_v11  ;;  %v2903_v36 = vadd.f32 %v9143_v41, %v7430_v33  ;;  %v2894_v21 = vpop.f32.mrb[61].mxu0  ;;  %v5882_v1 = vsel %vm5213_vm2, %v5013_v42, 0.0  ;;  %v5336_v9 = vsel %vm5213_vm2, %v4760_v20, 0.0  ;;  %v8110_v11 = vld [vmem:[%s11122_s0 + $0x6b0] sm:$0xff]   ;;  %v3921_v35 = vpop.f32.mrb[59].mxu1 }
 0x15b   :  { %v2895_v38 = vadd.f32 %v9143_v41, %v2894_v21  ;;  %v7431_v59 = vpop.f32.mrb[62].mxu0  ;;  %v5881_v0 = vadd.f32 %v5880_v23, %v5879_v55  ;;  %v5886_v7 = vsel %vm5213_vm2, %v5015_v37, 0.0  ;;  %v5884_v33 = vsel %vm5213_vm2, %v5014_v50, 0.0 }
 0x15c   :  { %v5335_v46 = vadd.f32 %v5334_v54, %v5333_v31  ;;  %v2906_v60 = vadd.f32 %v9143_v41, %v7431_v59  ;;  %v2897_v61 = vpop.f32.mrb[63].mxu0  ;;  %v4763_v13 = vmax.f32 %v2903_v36, 0.0  ;;  %v5888_v42 = vsel %vm5213_vm2, %v5016_v3, 0.0 }
 0x15d   :  { %v4761_v5 = vmax.f32 %v2895_v38, 0.0  ;;  %v2898_v6 = vadd.f32 %v9143_v41, %v2897_v61  ;;  %v5883_v23 = vadd.f32 %v5882_v1, %v5881_v0  ;;  %v3927_v36 = vadd.f32 %v9143_v41, %v7686_v51  ;;  %7793 = vmatmul.mubr.msk.bf16.gmra.mrb[164].mxu1 %vm1847_vm0, %v8107_v62  ;;  %v8084_v62 = vld [vmem:[%s11122_s0 + $0x2c0] sm:$0xff]  }
 0x15e   :  { %v5337_v14 = vadd.f32 %v5336_v9, %v5335_v46  ;;  %7537 = vmatmul.mubr.msk.bf16.gmra.mrb[168].mxu0 %vm1847_vm0, %v8077_v26  ;;  %v4764_v28 = vmax.f32 %v2906_v60, 0.0  ;;  %v3919_v54 = vadd.f32 %v9143_v41, %v3918_v4  ;;  %v3930_v59 = vadd.f32 %v9143_v41, %v7687_v17  ;;  %7796 = vmatprep.mubr.msk.bf16.mxu1 %vm1847_vm0, %v8110_v11  ;;  %v8081_v60 = vld [vmem:[%s11122_s0 + $0x2b8] sm:$0xff]  }
 0x15f   :  { %v5338_v20 = vsel %vm5213_vm2, %v4761_v5, 0.0  ;;  %v4762_v31 = vmax.f32 %v2898_v6, 0.0  ;;  %7540 = vmatprep.mubr.msk.bf16.mxu0 %vm1847_vm0, %v8080_v48  ;;  %v5885_v38 = vadd.f32 %v5884_v33, %v5883_v23  ;;  %v3922_v55 = vadd.f32 %v9143_v41, %v3921_v35  ;;  %v7690_v6 = vpop.f32.mrb[60].mxu1  ;;  %v8111_v35 = vld [vmem:[%s11122_s0 + $0x6b8] sm:$0xff]  }
 0x160   :  { %v5339_v21 = vadd.f32 %v5338_v20, %v5337_v14  ;;  %v5342_v48 = vsel %vm5213_vm2, %v4763_v13, 0.0  ;;  %v5017_v61 = vmax.f32 %v3919_v54, 0.0  ;;  %v5344_v1 = vsel %vm5213_vm2, %v4764_v28, 0.0  ;;  %v3934_v33 = vpop.f32.mrb[61].mxu1 }
 0x161   :  { %v5340_v26 = vsel %vm5213_vm2, %v4762_v31, 0.0  ;;  %v7434_v37 = vpop.f32.mrb[64].mxu0  ;;  %v5887_v9 = vadd.f32 %v5886_v7, %v5885_v38  ;;  %v5018_v5 = vmax.f32 %v3922_v55, 0.0  ;;  %v5019_v13 = vmax.f32 %v3927_v36, 0.0  ;;  %v7691_v7 = vpop.f32.mrb[62].mxu1 }
 0x162   :  { %v5341_v50 = vadd.f32 %v5340_v26, %v5339_v21  ;;  %v2919_v46 = vadd.f32 %v9143_v41, %v7434_v37  ;;  %v2910_v51 = vpop.f32.mrb[65].mxu0  ;;  %v5890_v14 = vsel %vm5213_vm2, %v5017_v61, 0.0  ;;  %v5020_v23 = vmax.f32 %v3930_v59, 0.0  ;;  %v8114_v21 = vld [vmem:[%s11122_s0 + $0x6c0] sm:$0xff]   ;;  %v3937_v38 = vpop.f32.mrb[63].mxu1 }
 0x163   :  { %v2911_v3 = vadd.f32 %v9143_v41, %v2910_v51  ;;  %v7435_v4 = vpop.f32.mrb[66].mxu0  ;;  %v5889_v31 = vadd.f32 %v5888_v42, %v5887_v9  ;;  %v5892_v37 = vsel %vm5213_vm2, %v5018_v5, 0.0  ;;  %v5894_v42 = vsel %vm5213_vm2, %v5019_v13, 0.0  ;;  %v8085_v9 = vld [vmem:[%s11122_s0 + $0x2c8] sm:$0xff]  }
 0x164   :  { %v5343_v0 = vadd.f32 %v5342_v48, %v5341_v50  ;;  %v2922_v17 = vadd.f32 %v9143_v41, %v7435_v4  ;;  %v2913_v11 = vpop.f32.mrb[67].mxu0  ;;  %v4767_v36 = vmax.f32 %v2919_v46, 0.0  ;;  %v3935_v59 = vadd.f32 %v9143_v41, %v3934_v33  ;;  %v7694_v33 = vpop.f32.mrb[64].mxu1 }
 0x165   :  { %v4765_v20 = vmax.f32 %v2911_v3, 0.0  ;;  %v2914_v28 = vadd.f32 %v9143_v41, %v2913_v11  ;;  %v5891_v48 = vadd.f32 %v5890_v14, %v5889_v31  ;;  %7797 = vmatmul.mubr.msk.bf16.gmra.mrb[168].mxu1 %vm1847_vm0, %v8111_v35  ;;  %v5896_v5 = vsel %vm5213_vm2, %v5020_v23, 0.0 }
 0x166   :  { %v9236_v54 = vadd.f32 %v5344_v1, %v5343_v0  ;;  %v4768_v26 = vmax.f32 %v2922_v17, 0.0  ;;  %7541 = vmatmul.mubr.msk.bf16.gmra.mrb[172].mxu0 %vm1847_vm0, %v8081_v60  ;;  %v3943_v60 = vadd.f32 %v9143_v41, %v7690_v6  ;;  %7800 = vmatprep.mubr.msk.bf16.mxu1 %vm1847_vm0, %v8114_v21  ;;  %v5355_v1 = vsel %vm5213_vm2, %v4767_v36, 0.0  ;;  %v8088_v6 = vld [vmem:[%s11122_s0 + $0x2d0] sm:$0xff]   ;;  %v3950_v21 = vpop.f32.mrb[65].mxu1  ;;  %v8115_v36 = vld [vmem:[%s11122_s0 + $0x6c8] sm:$0xff]  }
 0x167   :  { %v4766_v55 = vmax.f32 %v2914_v28, 0.0  ;;  %7544 = vmatprep.mubr.msk.bf16.mxu0 %vm1847_vm0, %v8084_v62  ;;  %v5352_v50 = vsel %vm5213_vm2, %v4765_v20, 0.0  ;;  %v5893_v61 = vadd.f32 %v5892_v37, %v5891_v48  ;;  %v3946_v14 = vadd.f32 %v9143_v41, %v7691_v7  ;;  %v7695_v7 = vpop.f32.mrb[66].mxu1 }
 0x168   :  { %v5357_v3 = vsel %vm5213_vm2, %v4768_v26, 0.0  ;;  %v5021_v31 = vmax.f32 %v3935_v59, 0.0  ;;  %v3938_v23 = vadd.f32 %v9143_v41, %v3937_v38  ;;  %v5023_v48 = vmax.f32 %v3943_v60, 0.0  ;;  %v3953_v38 = vpop.f32.mrb[67].mxu1 }
 0x169   :  { %v5353_v46 = vsel %vm5213_vm2, %v4766_v55, 0.0  ;;  %v7438_v51 = vpop.f32.mrb[68].mxu0  ;;  %v5895_v13 = vadd.f32 %v5894_v42, %v5893_v61  ;;  %v8118_v42 = vld [vmem:[%s11122_s0 + $0x6d0] sm:$0xff]   ;;  %v5024_v61 = vmax.f32 %v3946_v14, 0.0 }
 0x16a   :  { %v5354_v4 = vadd.f32 %v5353_v46, %v5352_v50  ;;  %v2926_v62 = vpop.f32.mrb[69].mxu0  ;;  %v2935_v0 = vadd.f32 %v9143_v41, %v7438_v51  ;;  %v5904_v60 = vsel %vm5213_vm2, %v5021_v31, 0.0 }
 0x16b   :  { %v2927_v17 = vadd.f32 %v9143_v41, %v2926_v62  ;;  %v7439_v11 = vpop.f32.mrb[70].mxu0  ;;  %v9266_v55 = vadd.f32 %v5896_v5, %v5895_v13  ;;  %v5022_v62 = vmax.f32 %v3938_v23, 0.0  ;;  %v8089_v13 = vld [vmem:[%s11122_s0 + $0x2d8] sm:$0xff]   ;;  %v8092_v23 = vld [vmem:[%s11122_s0 + $0x2e0] sm:$0xff]  }
 0x16c   :  { %v5356_v35 = vadd.f32 %v5355_v1, %v5354_v4  ;;  %v2938_v20 = vadd.f32 %v9143_v41, %v7439_v11  ;;  %v2929_v28 = vpop.f32.mrb[71].mxu0  ;;  %v4771_v59 = vmax.f32 %v2935_v0, 0.0  ;;  %v3951_v0 = vadd.f32 %v9143_v41, %v3950_v21 }
 0x16d   :  { %v4769_v26 = vmax.f32 %v2927_v17, 0.0  ;;  %v2930_v37 = vadd.f32 %v9143_v41, %v2929_v28  ;;  %11151 = vst [vmem:[#allocation20_spill] sm:$0xff] %v9266_v55  ;;  %7801 = vmatmul.mubr.msk.bf16.gmra.mrb[172].mxu1 %vm1847_vm0, %v8115_v36  ;;  %v5905_v14 = vsel %vm5213_vm2, %v5022_v62, 0.0  ;;  %v5909_v21 = vsel %vm5213_vm2, %v5024_v61, 0.0 }
 0x16e   :  { %v5358_v50 = vadd.f32 %v5357_v3, %v5356_v35  ;;  %7545 = vmatmul.mubr.msk.bf16.gmra.mrb[176].mxu0 %vm1847_vm0, %v8085_v9  ;;  %v4772_v4 = vmax.f32 %v2938_v20, 0.0  ;;  %v5907_v9 = vsel %vm5213_vm2, %v5023_v48, 0.0  ;;  %7804 = vmatprep.mubr.msk.bf16.mxu1 %vm1847_vm0, %v8118_v42  ;;  %v3959_v35 = vadd.f32 %v9143_v41, %v7694_v33 }
 0x16f   :  { %v5359_v46 = vsel %vm5213_vm2, %v4769_v26, 0.0  ;;  %v4770_v51 = vmax.f32 %v2930_v37, 0.0  ;;  %7548 = vmatprep.mubr.msk.bf16.mxu0 %vm1847_vm0, %v8088_v6  ;;  %v5363_v20 = vsel %vm5213_vm2, %v4771_v59, 0.0  ;;  %v5906_v36 = vadd.f32 %v5905_v14, %v5904_v60  ;;  %v7698_v26 = vpop.f32.mrb[68].mxu1  ;;  %v8119_v59 = vld [vmem:[%s11122_s0 + $0x6d8] sm:$0xff]  }
 0x170   :  { %v5360_v1 = vadd.f32 %v5359_v46, %v5358_v50  ;;  %v5365_v37 = vsel %vm5213_vm2, %v4772_v4, 0.0  ;;  %v5025_v33 = vmax.f32 %v3951_v0, 0.0  ;;  %v3966_v46 = vpop.f32.mrb[69].mxu1  ;;  %v8122_v4 = vld [vmem:[%s11122_s0 + $0x6e0] sm:$0xff]  }
 0x171   :  { %v5361_v5 = vsel %vm5213_vm2, %v4770_v51, 0.0  ;;  %v7442_v3 = vpop.f32.mrb[72].mxu0  ;;  %v7699_v61 = vpop.f32.mrb[70].mxu1 }
 0x172   :  { %v5362_v17 = vadd.f32 %v5361_v5, %v5360_v1  ;;  %v2951_v11 = vadd.f32 %v9143_v41, %v7442_v3  ;;  %v2942_v6 = vpop.f32.mrb[73].mxu0  ;;  %v5908_v5 = vadd.f32 %v5907_v9, %v5906_v36  ;;  %v5027_v3 = vmax.f32 %v3959_v35, 0.0  ;;  %v3969_v0 = vpop.f32.mrb[71].mxu1 }
 0x173   :  { %v2943_v28 = vadd.f32 %v9143_v41, %v2942_v6  ;;  %v7443_v31 = vpop.f32.mrb[74].mxu0  ;;  %v5911_v9 = vsel %vm5213_vm2, %v5025_v33, 0.0 }
 0x174   :  { %v5364_v48 = vadd.f32 %v5363_v20, %v5362_v17  ;;  %v2954_v42 = vadd.f32 %v9143_v41, %v7443_v31  ;;  %v2945_v50 = vpop.f32.mrb[75].mxu0  ;;  %v4775_v51 = vmax.f32 %v2951_v11, 0.0  ;;  %v5910_v11 = vadd.f32 %v5909_v21, %v5908_v5  ;;  %v7702_v5 = vpop.f32.mrb[72].mxu1 }
 0x175   :  { %v4773_v1 = vmax.f32 %v2943_v28, 0.0  ;;  %v2946_v62 = vadd.f32 %v9143_v41, %v2945_v50  ;;  %v3962_v28 = vadd.f32 %v9143_v41, %v7695_v7  ;;  %7805 = vmatmul.mubr.msk.bf16.gmra.mrb[176].mxu1 %vm1847_vm0, %v8119_v59  ;;  %v8093_v7 = vld [vmem:[%s11122_s0 + $0x2e8] sm:$0xff]  }
 0x176   :  { %v5366_v60 = vadd.f32 %v5365_v37, %v5364_v48  ;;  %7549 = vmatmul.mubr.msk.bf16.gmra.mrb[180].mxu0 %vm1847_vm0, %v8089_v13  ;;  %v4776_v20 = vmax.f32 %v2954_v42, 0.0  ;;  %v5371_v31 = vsel %vm5213_vm2, %v4775_v51, 0.0  ;;  %v5912_v36 = vadd.f32 %v5911_v9, %v5910_v11  ;;  %7808 = vmatprep.mubr.msk.bf16.mxu1 %vm1847_vm0, %v8122_v4  ;;  %v3982_v11 = vpop.f32.mrb[73].mxu1 }
 0x177   :  { %v5367_v17 = vsel %vm5213_vm2, %v4773_v1, 0.0  ;;  %v4774_v6 = vmax.f32 %v2946_v62, 0.0  ;;  %7552 = vmatprep.mubr.msk.bf16.mxu0 %vm1847_vm0, %v8092_v23  ;;  %v3954_v37 = vadd.f32 %v9143_v41, %v3953_v38  ;;  %v5915_v42 = vsel %vm5213_vm2, %v5027_v3, 0.0  ;;  %v8096_v38 = vld [vmem:[%s11122_s0 + $0x2f0] sm:$0xff]  }
 0x178   :  { %v5368_v14 = vadd.f32 %v5367_v17, %v5366_v60  ;;  %v5028_v50 = vmax.f32 %v3962_v28, 0.0  ;;  %v3975_v1 = vadd.f32 %v9143_v41, %v7698_v26  ;;  %v3967_v62 = vadd.f32 %v9143_v41, %v3966_v46 }
 0x179   :  { %v5369_v13 = vsel %vm5213_vm2, %v4774_v6, 0.0  ;;  %v7446_v35 = vpop.f32.mrb[76].mxu0  ;;  %v5026_v51 = vmax.f32 %v3954_v37, 0.0  ;;  %v5373_v4 = vsel %vm5213_vm2, %v4776_v20, 0.0  ;;  %v3978_v46 = vadd.f32 %v9143_v41, %v7699_v61  ;;  %v8126_v20 = vld [vmem:[%s11122_s0 + $0x6f0] sm:$0xff]  }
 0x17a   :  { %v5370_v23 = vadd.f32 %v5369_v13, %v5368_v14  ;;  %v2967_v21 = vadd.f32 %v9143_v41, %v7446_v35  ;;  %v2958_v48 = vpop.f32.mrb[77].mxu0  ;;  %v8123_v14 = vld [vmem:[%s11122_s0 + $0x6e8] sm:$0xff]   ;;  %v7703_v13 = vpop.f32.mrb[74].mxu1  ;;  %v5917_v35 = vsel %vm5213_vm2, %v5028_v50, 0.0 }
 0x17b   :  { %v2959_v33 = vadd.f32 %v9143_v41, %v2958_v48  ;;  %v7447_v59 = vpop.f32.mrb[78].mxu0  ;;  %v5913_v26 = vsel %vm5213_vm2, %v5026_v51, 0.0  ;;  %v5032_v50 = vmax.f32 %v3978_v46, 0.0  ;;  %v3983_v46 = vadd.f32 %v9143_v41, %v3982_v11 }
 0x17c   :  { %v5372_v60 = vadd.f32 %v5371_v31, %v5370_v23  ;;  %v4779_v17 = vmax.f32 %v2967_v21, 0.0  ;;  %v2970_v3 = vadd.f32 %v9143_v41, %v7447_v59  ;;  %v2961_v6 = vpop.f32.mrb[79].mxu0  ;;  %v5914_v37 = vadd.f32 %v5913_v26, %v5912_v36  ;;  %v3985_v23 = vpop.f32.mrb[75].mxu1 }
 0x17d   :  { %v4777_v9 = vmax.f32 %v2959_v33, 0.0  ;;  %v2962_v28 = vadd.f32 %v9143_v41, %v2961_v6  ;;  %v5031_v33 = vmax.f32 %v3975_v1, 0.0  ;;  %v5029_v59 = vmax.f32 %v3967_v62, 0.0  ;;  %7809 = vmatmul.mubr.msk.bf16.gmra.mrb[180].mxu1 %vm1847_vm0, %v8123_v14 }
 0x17e   :  { %v5374_v31 = vadd.f32 %v5373_v4, %v5372_v60  ;;  %7553 = vmatmul.mubr.msk.bf16.gmra.mrb[184].mxu0 %vm1847_vm0, %v8093_v7  ;;  %v5379_v61 = vsel %vm5213_vm2, %v4779_v17, 0.0  ;;  %v4780_v6 = vmax.f32 %v2970_v3, 0.0  ;;  %v5916_v55 = vadd.f32 %v5915_v42, %v5914_v37  ;;  %7812 = vmatprep.mubr.msk.bf16.mxu1 %vm1847_vm0, %v8126_v20  ;;  %v8097_v42 = vld [vmem:[%s11122_s0 + $0x2f8] sm:$0xff]   ;;  %v7706_v20 = vpop.f32.mrb[76].mxu1 }
 0x17f   :  { %v5375_v21 = vsel %vm5213_vm2, %v4777_v9, 0.0  ;;  %v4778_v48 = vmax.f32 %v2962_v28, 0.0  ;;  %7556 = vmatprep.mubr.msk.bf16.mxu0 %vm1847_vm0, %v8096_v38  ;;  %v5919_v36 = vsel %vm5213_vm2, %v5029_v59, 0.0  ;;  %v3970_v60 = vadd.f32 %v9143_v41, %v3969_v0  ;;  %v8100_v0 = vld [vmem:[%s11122_s0 + $0x300] sm:$0xff]  }
 0x180   :  { %v5376_v51 = vadd.f32 %v5375_v21, %v5374_v31  ;;  %v5918_v17 = vadd.f32 %v5917_v35, %v5916_v55  ;;  %v3991_v3 = vadd.f32 %v9143_v41, %v7702_v5  ;;  %v5923_v28 = vsel %vm5213_vm2, %v5031_v33, 0.0  ;;  %v3998_v21 = vpop.f32.mrb[77].mxu1 }
 0x181   :  { %v5377_v7 = vsel %vm5213_vm2, %v4778_v48, 0.0  ;;  %v7450_v4 = vpop.f32.mrb[80].mxu0  ;;  %v5030_v26 = vmax.f32 %v3970_v60, 0.0  ;;  %v5381_v31 = vsel %vm5213_vm2, %v4780_v6, 0.0  ;;  %v8127_v48 = vld [vmem:[%s11122_s0 + $0x6f8] sm:$0xff]   ;;  %v5925_v33 = vsel %vm5213_vm2, %v5032_v50, 0.0 }
 0x182   :  { %v5378_v38 = vadd.f32 %v5377_v7, %v5376_v51  ;;  %v2983_v1 = vadd.f32 %v9143_v41, %v7450_v4  ;;  %v2974_v62 = vpop.f32.mrb[81].mxu0  ;;  %v5920_v5 = vadd.f32 %v5919_v36, %v5918_v17  ;;  %v7707_v7 = vpop.f32.mrb[78].mxu1  ;;  %v5035_v60 = vmax.f32 %v3991_v3, 0.0 }
 0x183   :  { %v2975_v14 = vadd.f32 %v9143_v41, %v2974_v62  ;;  %v7451_v9 = vpop.f32.mrb[82].mxu0  ;;  %v5921_v11 = vsel %vm5213_vm2, %v5030_v26, 0.0  ;;  %v5033_v50 = vmax.f32 %v3983_v46, 0.0  ;;  %v3986_v39 = vadd.f32 %v9143_v41, %v3985_v23  ;;  %v8101_v23 = vld [vmem:[%s11122_s0 + $0x308] sm:$0xff]  }
 0x184   :  { %v5380_v37 = vadd.f32 %v5379_v61, %v5378_v38  ;;  %v2986_v55 = vadd.f32 %v9143_v41, %v7451_v9  ;;  %v2977_v35 = vpop.f32.mrb[83].mxu0  ;;  %v8130_v61 = vld [vmem:[%s11122_s0 + $0x700] sm:$0xff]   ;;  %v4783_v6 = vmax.f32 %v2983_v1, 0.0  ;;  %v5922_v36 = vadd.f32 %v5921_v11, %v5920_v5  ;;  %v4001_v38 = vpop.f32.mrb[79].mxu1 }
 0x185   :  { %v4781_v59 = vmax.f32 %v2975_v14, 0.0  ;;  %v2978_v51 = vadd.f32 %v9143_v41, %v2977_v35  ;;  %v3994_v14 = vadd.f32 %v9143_v41, %v7703_v13  ;;  %7813 = vmatmul.mubr.msk.bf16.gmra.mrb[184].mxu1 %vm1847_vm0, %v8127_v48  ;;  %v5927_v3 = vsel %vm5213_vm2, %v5033_v50, 0.0 }
 0x186   :  { %v5382_v4 = vadd.f32 %v5381_v31, %v5380_v37  ;;  %7557 = vmatmul.mubr.msk.bf16.gmra.mrb[188].mxu0 %vm1847_vm0, %v8097_v42  ;;  %v4784_v26 = vmax.f32 %v2986_v55, 0.0  ;;  %v5924_v35 = vadd.f32 %v5923_v28, %v5922_v36  ;;  %v4007_v37 = vadd.f32 %v9143_v41, %v7706_v20  ;;  %7816 = vmatprep.mubr.msk.bf16.mxu1 %vm1847_vm0, %v8130_v61  ;;  %v8104_v20 = vld [vmem:[%s11122_s0 + $0x310] sm:$0xff]   ;;  %v7710_v61 = vpop.f32.mrb[80].mxu1 }
 0x187   :  { %v5383_v62 = vsel %vm5213_vm2, %v4781_v59, 0.0  ;;  %v4782_v17 = vmax.f32 %v2978_v51, 0.0  ;;  %7560 = vmatprep.mubr.msk.bf16.mxu0 %vm1847_vm0, %v8100_v0  ;;  %v5036_v31 = vmax.f32 %v3994_v14, 0.0  ;;  %v5034_v55 = vmax.f32 %v3986_v39, 0.0 }
 0x188   :  { %v5384_v9 = vadd.f32 %v5383_v62, %v5382_v4  ;;  %v5926_v28 = vadd.f32 %v5925_v33, %v5924_v35  ;;  %v5387_v5 = vsel %vm5213_vm2, %v4783_v6, 0.0  ;;  %v5931_v51 = vsel %vm5213_vm2, %v5035_v60, 0.0  ;;  %v4014_v6 = vpop.f32.mrb[81].mxu1 }
 0x189   :  { %v5385_v1 = vsel %vm5213_vm2, %v4782_v17, 0.0  ;;  %v7454_v42 = vpop.f32.mrb[84].mxu0  ;;  %v3999_v11 = vadd.f32 %v9143_v41, %v3998_v21  ;;  %v5389_v4 = vsel %vm5213_vm2, %v4784_v26, 0.0  ;;  %v8131_v17 = vld [vmem:[%s11122_s0 + $0x708] sm:$0xff]   ;;  %v5933_v60 = vsel %vm5213_vm2, %v5036_v31, 0.0  ;;  %v8134_v26 = vld [vmem:[%s11122_s0 + $0x710] sm:$0xff]  }
 0x18a   :  { %v5386_v0 = vadd.f32 %v5385_v1, %v5384_v9  ;;  %v2999_v13 = vadd.f32 %v9143_v41, %v7454_v42  ;;  %v2990_v46 = vpop.f32.mrb[85].mxu0  ;;  %v5928_v62 = vadd.f32 %v5927_v3, %v5926_v28  ;;  %v5929_v21 = vsel %vm5213_vm2, %v5034_v55, 0.0  ;;  %v7711_v9 = vpop.f32.mrb[82].mxu1 }
 0x18b   :  { %v2991_v48 = vadd.f32 %v9143_v41, %v2990_v46  ;;  %v7455_v59 = vpop.f32.mrb[86].mxu0  ;;  %v5039_v3 = vmax.f32 %v4007_v37, 0.0  ;;  %v5037_v31 = vmax.f32 %v3999_v11, 0.0  ;;  %v4010_v55 = vadd.f32 %v9143_v41, %v7707_v7 }
 0x18c   :  { %v5388_v36 = vadd.f32 %v5387_v5, %v5386_v0  ;;  %v3002_v33 = vadd.f32 %v9143_v41, %v7455_v59  ;;  %v2993_v39 = vpop.f32.mrb[87].mxu0  ;;  %v4787_v35 = vmax.f32 %v2999_v13, 0.0  ;;  %v5930_v42 = vadd.f32 %v5929_v21, %v5928_v62  ;;  %v4017_v0 = vpop.f32.mrb[83].mxu1 }
 0x18d   :  { %v4785_v50 = vmax.f32 %v2991_v48, 0.0  ;;  %v2994_v14 = vadd.f32 %v9143_v41, %v2993_v39  ;;  %v4002_v39 = vadd.f32 %v9143_v41, %v4001_v38  ;;  %7817 = vmatmul.mubr.msk.bf16.gmra.mrb[188].mxu1 %vm1847_vm0, %v8131_v17  ;;  %v5935_v37 = vsel %vm5213_vm2, %v5037_v31, 0.0  ;;  %v8105_v38 = vld [vmem:[%s11122_s0 + $0x318] sm:$0xff]  }
 0x18e   :  { %v5390_v1 = vadd.f32 %v5389_v4, %v5388_v36  ;;  %7561 = vmatmul.mubr.msk.bf16.gmra.mrb[192].mxu0 %vm1847_vm0, %v8101_v23  ;;  %v4788_v48 = vmax.f32 %v3002_v33, 0.0  ;;  %v5932_v59 = vadd.f32 %v5931_v51, %v5930_v42  ;;  %v5040_v4 = vmax.f32 %v4010_v55, 0.0  ;;  %7820 = vmatprep.mubr.msk.bf16.mxu1 %vm1847_vm0, %v8134_v26  ;;  %v7714_v26 = vpop.f32.mrb[84].mxu1  ;;  %v8135_v31 = vld [vmem:[%s11122_s0 + $0x718] sm:$0xff]  }
 0x18f   :  { %v5391_v46 = vsel %vm5213_vm2, %v4785_v50, 0.0  ;;  %v4786_v28 = vmax.f32 %v2994_v14, 0.0  ;;  %7564 = vmatprep.mubr.msk.bf16.mxu0 %vm1847_vm0, %v8104_v20  ;;  %v4023_v36 = vadd.f32 %v9143_v41, %v7710_v61  ;;  %v5038_v33 = vmax.f32 %v4002_v39, 0.0  ;;  %v8108_v61 = vld [vmem:[%s11122_s0 + $0x320] sm:$0xff]  }
 0x190   :  { %v5392_v5 = vadd.f32 %v5391_v46, %v5390_v1  ;;  %v5934_v51 = vadd.f32 %v5933_v60, %v5932_v59  ;;  %v5395_v62 = vsel %vm5213_vm2, %v4787_v35, 0.0  ;;  %v5939_v14 = vsel %vm5213_vm2, %v5039_v3, 0.0  ;;  %v4030_v35 = vpop.f32.mrb[85].mxu1 }
 0x191   :  { %v5393_v13 = vsel %vm5213_vm2, %v4786_v28, 0.0  ;;  %v7458_v23 = vpop.f32.mrb[88].mxu0  ;;  %v4015_v21 = vadd.f32 %v9143_v41, %v4014_v6  ;;  %v5397_v1 = vsel %vm5213_vm2, %v4788_v48, 0.0  ;;  %v5941_v3 = vsel %vm5213_vm2, %v5040_v4, 0.0  ;;  %v7715_v59 = vpop.f32.mrb[86].mxu1  ;;  %v8138_v48 = vld [vmem:[%s11122_s0 + $0x720] sm:$0xff]  }
 0x192   :  { %v5394_v20 = vadd.f32 %v5393_v13, %v5392_v5  ;;  %v3015_v7 = vadd.f32 %v9143_v41, %v7458_v23  ;;  %v3006_v11 = vpop.f32.mrb[89].mxu0  ;;  %v5936_v28 = vadd.f32 %v5935_v37, %v5934_v51  ;;  %v5937_v6 = vsel %vm5213_vm2, %v5038_v33, 0.0 }
 0x193   :  { %v3007_v17 = vadd.f32 %v9143_v41, %v3006_v11  ;;  %v7459_v50 = vpop.f32.mrb[90].mxu0  ;;  %v5043_v37 = vmax.f32 %v4023_v36, 0.0  ;;  %v5041_v4 = vmax.f32 %v4015_v21, 0.0  ;;  %v4026_v33 = vadd.f32 %v9143_v41, %v7711_v9 }
 0x194   :  { %v5396_v42 = vadd.f32 %v5395_v62, %v5394_v20  ;;  %v3018_v60 = vadd.f32 %v9143_v41, %v7459_v50  ;;  %v3009_v46 = vpop.f32.mrb[91].mxu0  ;;  %v4791_v39 = vmax.f32 %v3015_v7, 0.0  ;;  %v5938_v23 = vadd.f32 %v5937_v6, %v5936_v28  ;;  %v4033_v20 = vpop.f32.mrb[87].mxu1 }
 0x195   :  { %v4789_v55 = vmax.f32 %v3007_v17, 0.0  ;;  %v3010_v5 = vadd.f32 %v9143_v41, %v3009_v46  ;;  %v4018_v46 = vadd.f32 %v9143_v41, %v4017_v0  ;;  %7821 = vmatmul.mubr.msk.bf16.gmra.mrb[192].mxu1 %vm1847_vm0, %v8135_v31  ;;  %v5943_v36 = vsel %vm5213_vm2, %v5041_v4, 0.0  ;;  %v8109_v0 = vld [vmem:[%s11122_s0 + $0x328] sm:$0xff]  }
 0x196   :  { %v5398_v13 = vadd.f32 %v5397_v1, %v5396_v42  ;;  %7565 = vmatmul.mubr.msk.bf16.gmra.mrb[196].mxu0 %vm1847_vm0, %v8105_v38  ;;  %v4792_v17 = vmax.f32 %v3018_v60, 0.0  ;;  %v5940_v50 = vadd.f32 %v5939_v14, %v5938_v23  ;;  %v5044_v1 = vmax.f32 %v4026_v33, 0.0  ;;  %7824 = vmatprep.mubr.msk.bf16.mxu1 %vm1847_vm0, %v8138_v48  ;;  %v7718_v48 = vpop.f32.mrb[88].mxu1  ;;  %v8139_v4 = vld [vmem:[%s11122_s0 + $0x728] sm:$0xff]  }
 0x197   :  { %v5399_v11 = vsel %vm5213_vm2, %v4789_v55, 0.0  ;;  %v4790_v51 = vmax.f32 %v3010_v5, 0.0  ;;  %7568 = vmatprep.mubr.msk.bf16.mxu0 %vm1847_vm0, %v8108_v61  ;;  %v4039_v42 = vadd.f32 %v9143_v41, %v7714_v26  ;;  %v5042_v60 = vmax.f32 %v4018_v46, 0.0  ;;  %v8112_v26 = vld [vmem:[%s11122_s0 + $0x330] sm:$0xff]  }
 0x198   :  { %v5400_v62 = vadd.f32 %v5399_v11, %v5398_v13  ;;  %v5942_v14 = vadd.f32 %v5941_v3, %v5940_v50  ;;  %v5403_v28 = vsel %vm5213_vm2, %v4791_v39, 0.0  ;;  %v5947_v5 = vsel %vm5213_vm2, %v5043_v37, 0.0  ;;  %v4046_v39 = vpop.f32.mrb[89].mxu1 }
 0x199   :  { %v5401_v7 = vsel %vm5213_vm2, %v4790_v51, 0.0  ;;  %v7462_v38 = vpop.f32.mrb[92].mxu0  ;;  %v4031_v6 = vadd.f32 %v9143_v41, %v4030_v35  ;;  %v5405_v13 = vsel %vm5213_vm2, %v4792_v17, 0.0  ;;  %v5945_v37 = vsel %vm5213_vm2, %v5042_v60, 0.0  ;;  %v7719_v35 = vpop.f32.mrb[90].mxu1  ;;  %v8142_v17 = vld [vmem:[%s11122_s0 + $0x730] sm:$0xff]  }
 0x19a   :  { %v5402_v61 = vadd.f32 %v5401_v7, %v5400_v62  ;;  %v3031_v9 = vadd.f32 %v9143_v41, %v7462_v38  ;;  %v3022_v21 = vpop.f32.mrb[93].mxu0  ;;  %v5944_v51 = vadd.f32 %v5943_v36, %v5942_v14  ;;  %v5047_v50 = vmax.f32 %v4039_v42, 0.0 }
 0x19b   :  { %v3023_v31 = vadd.f32 %v9143_v41, %v3022_v21  ;;  %v7463_v55 = vpop.f32.mrb[94].mxu0  ;;  %v5949_v38 = vsel %vm5213_vm2, %v5044_v1, 0.0  ;;  %v5045_v60 = vmax.f32 %v4031_v6, 0.0  ;;  %v4042_v42 = vadd.f32 %v9143_v41, %v7715_v59  ;;  %v8113_v59 = vld [vmem:[%s11122_s0 + $0x338] sm:$0xff]  }
 0x19c   :  { %v5404_v23 = vadd.f32 %v5403_v28, %v5402_v61  ;;  %v3034_v3 = vadd.f32 %v9143_v41, %v7463_v55  ;;  %v3025_v11 = vpop.f32.mrb[95].mxu0  ;;  %v4795_v46 = vmax.f32 %v3031_v9, 0.0  ;;  %v5946_v36 = vadd.f32 %v5945_v37, %v5944_v51  ;;  %v4049_v61 = vpop.f32.mrb[91].mxu1 }
 0x19d   :  { %v4793_v33 = vmax.f32 %v3023_v31, 0.0  ;;  %v3026_v62 = vadd.f32 %v9143_v41, %v3025_v11  ;;  %v4034_v9 = vadd.f32 %v9143_v41, %v4033_v20  ;;  %7825 = vmatmul.mubr.msk.bf16.gmra.mrb[196].mxu1 %vm1847_vm0, %v8139_v4  ;;  %v4047_v37 = vadd.f32 %v9143_v41, %v4046_v39 }
 0x19e   :  { %v5406_v7 = vadd.f32 %v5405_v13, %v5404_v23  ;;  %7569 = vmatmul.mubr.msk.bf16.gmra.mrb[200].mxu0 %vm1847_vm0, %v8109_v0  ;;  %v4796_v31 = vmax.f32 %v3034_v3, 0.0  ;;  %v5948_v55 = vadd.f32 %v5947_v5, %v5946_v36  ;;  %v5955_v13 = vsel %vm5213_vm2, %v5047_v50, 0.0  ;;  %7828 = vmatprep.mubr.msk.bf16.mxu1 %vm1847_vm0, %v8142_v17  ;;  %v7722_v50 = vpop.f32.mrb[92].mxu1 }
 0x19f   :  { %v5407_v21 = vsel %vm5213_vm2, %v4793_v33, 0.0  ;;  %v4794_v14 = vmax.f32 %v3026_v62, 0.0  ;;  %7572 = vmatprep.mubr.msk.bf16.mxu0 %vm1847_vm0, %v8112_v26  ;;  %v5951_v23 = vsel %vm5213_vm2, %v5045_v60, 0.0  ;;  %v5048_v3 = vmax.f32 %v4042_v42, 0.0  ;;  %v8116_v62 = vld [vmem:[%s11122_s0 + $0x340] sm:$0xff]  }
 0x1a0   :  { %v5408_v28 = vadd.f32 %v5407_v21, %v5406_v7  ;;  %v5950_v5 = vadd.f32 %v5949_v38, %v5948_v55  ;;  %v5046_v20 = vmax.f32 %v4034_v9, 0.0  ;;  %v5411_v11 = vsel %vm5213_vm2, %v4795_v46, 0.0  ;;  %v9483_v46 = vpop.f32.mrb[93].mxu1 }
 0x1a1   :  { %v5409_v0 = vsel %vm5213_vm2, %v4794_v14, 0.0  ;;  %v7466_v1 = vpop.f32.mrb[96].mxu0  ;;  %v5413_v17 = vsel %vm5213_vm2, %v4796_v31, 0.0  ;;  %v8143_v14 = vld [vmem:[%s11122_s0 + $0x738] sm:$0xff]   ;;  %v4055_v39 = vadd.f32 %v9143_v41, %v7718_v48  ;;  %v9491_v55 = vpop.f32.mrb[94].mxu1  ;;  %v8146_v31 = vld [vmem:[%s11122_s0 + $0x740] sm:$0xff]  }
 0x1a2   :  { %v5410_v26 = vadd.f32 %v5409_v0, %v5408_v28  ;;  %v3038_v6 = vpop.f32.mrb[97].mxu0  ;;  %v3047_v51 = vadd.f32 %v9143_v41, %v7466_v1  ;;  %v5952_v21 = vadd.f32 %v5951_v23, %v5950_v5  ;;  %v5953_v28 = vsel %vm5213_vm2, %v5046_v20, 0.0  ;;  %v4065_v23 = vpop.f32.mrb[95].mxu1 }
 0x1a3   :  { %v3039_v4 = vadd.f32 %v9143_v41, %v3038_v6  ;;  %v7467_v33 = vpop.f32.mrb[98].mxu0  ;;  %v5957_v0 = vsel %vm5213_vm2, %v5048_v3, 0.0  ;;  %v5049_v5 = vmax.f32 %v4047_v37, 0.0 }
 0x1a4   :  { %v5412_v7 = vadd.f32 %v5411_v11, %v5410_v26  ;;  %v3050_v38 = vadd.f32 %v9143_v41, %v7467_v33  ;;  %v3041_v36 = vpop.f32.mrb[99].mxu0  ;;  %v5954_v1 = vadd.f32 %v5953_v28, %v5952_v21  ;;  %v4799_v26 = vmax.f32 %v3047_v51, 0.0  ;;  %v8120_v21 = vld [vmem:[%s11122_s0 + $0x350] sm:$0xff]  }
 0x1a5   :  { %v4797_v60 = vmax.f32 %v3039_v4, 0.0  ;;  %v3042_v42 = vadd.f32 %v9143_v41, %v3041_v36  ;;  %v9504_v41 = vld [vmem:[%s11124_s2] ss:$0 sm:$0xff]  ;;  %7829 = vmatmul.mubr.msk.bf16.gmra.mrb[200].mxu1 %vm1847_vm0, %v8143_v14  ;;  %v5051_v33 = vmax.f32 %v4055_v39, 0.0 }
 0x1a6   :  { %v9496_v9 = vadd.f32 %v5413_v17, %v5412_v7  ;;  %7573 = vmatmul.mubr.msk.bf16.gmra.mrb[204].mxu0 %vm1847_vm0, %v8113_v59  ;;  %v4058_v48 = vadd.f32 %v9504_v41, %v7719_v35  ;;  %v4800_v20 = vmax.f32 %v3050_v38, 0.0  ;;  %v5956_v11 = vadd.f32 %v5955_v13, %v5954_v1  ;;  %7832 = vmatprep.mubr.msk.bf16.mxu1 %vm1847_vm0, %v8146_v31  ;;  %v8117_v35 = vld [vmem:[%s11122_s0 + $0x348] sm:$0xff]  }
 0x1a7   :  { %v4798_v6 = vmax.f32 %v3042_v42, 0.0  ;;  %7576 = vmatprep.mubr.msk.bf16.mxu0 %vm1847_vm0, %v8116_v62  ;;  %v4050_v59 = vadd.f32 %v9504_v41, %v4049_v61  ;;  %v5421_v3 = vsel %vm5213_vm2, %v4797_v60, 0.0  ;;  %v5959_v61 = vsel %vm5213_vm2, %v5049_v5, 0.0  ;;  %v9522_v42 = vpop.f32.mrb[96].mxu1 }
 0x1a8   :  { %v5958_v13 = vadd.f32 %v5957_v0, %v5956_v11  ;;  %v5424_v7 = vsel %vm5213_vm2, %v4799_v26, 0.0  ;;  %v5052_v14 = vmax.f32 %v4058_v48, 0.0  ;;  %v5426_v28 = vsel %vm5213_vm2, %v4800_v20, 0.0  ;;  %v9527_v26 = vpop.f32.mrb[97].mxu1  ;;  %v8150_v20 = vld [vmem:[%s11122_s0 + $0x750] sm:$0xff]  }
 0x1a9   :  { %v5422_v51 = vsel %vm5213_vm2, %v4798_v6, 0.0  ;;  %v7470_v4 = vpop.f32.mrb[100].mxu0  ;;  %v5050_v60 = vmax.f32 %v4050_v59, 0.0  ;;  %v4071_v1 = vadd.f32 %v9504_v41, %v7722_v50  ;;  %v8147_v6 = vld [vmem:[%s11122_s0 + $0x748] sm:$0xff]   ;;  %v9541_v50 = vadd.f32 %v9504_v41, %v8743_v15 }
 0x1aa   :  { %v5423_v62 = vadd.f32 %v5422_v51, %v5421_v3  ;;  %v3063_v37 = vadd.f32 %v9504_v41, %v7470_v4  ;;  %v3054_v17 = vpop.f32.mrb[101].mxu0  ;;  %v5960_v11 = vadd.f32 %v5959_v61, %v5958_v13  ;;  %v9534_v3 = vpop.f32.mrb[98].mxu1 }
 0x1ab   :  { %v3055_v38 = vadd.f32 %v9504_v41, %v3054_v17  ;;  %v7471_v36 = vpop.f32.mrb[102].mxu0  ;;  %v5961_v59 = vsel %vm5213_vm2, %v5050_v60, 0.0  ;;  %v9545_v17 = vpop.f32.mrb[99].mxu1  ;;  %v5055_v15 = vmax.f32 %v4071_v1, 0.0 }
 0x1ac   :  { %v5425_v39 = vadd.f32 %v5424_v7, %v5423_v62  ;;  %v3066_v31 = vadd.f32 %v9504_v41, %v7471_v36  ;;  %v3057_v0 = vpop.f32.mrb[103].mxu0  ;;  %v4803_v51 = vmax.f32 %v3063_v37, 0.0  ;;  %v5963_v62 = vsel %vm5213_vm2, %v5051_v33, 0.0 }
 0x1ad   :  { %v4801_v5 = vmax.f32 %v3055_v38, 0.0  ;;  %v3058_v48 = vadd.f32 %v9504_v41, %v3057_v0  ;;  %v5965_v7 = vsel %vm5213_vm2, %v5052_v14, 0.0  ;;  %v5962_v38 = vadd.f32 %v5961_v59, %v5960_v11  ;;  %7833 = vmatmul.mubr.msk.bf16.gmra.mrb[204].mxu1 %vm1847_vm0, %v8147_v6 }
 0x1ae   :  { %v5427_v4 = vadd.f32 %v5426_v28, %v5425_v39  ;;  %7577 = vmatmul.mubr.msk.bf16.gmra.mrb[208].mxu0 %vm1847_vm0, %v8117_v35  ;;  %v4804_v60 = vmax.f32 %v3066_v31, 0.0  ;;  %v4063_v37 = vadd.f32 %v9504_v41, %v9483_v46  ;;  %v4074_v39 = vadd.f32 %v9504_v41, %v9491_v55  ;;  %7836 = vmatprep.mubr.msk.bf16.mxu1 %vm1847_vm0, %v8150_v20  ;;  %v8121_v46 = vld [vmem:[%s11122_s0 + $0x358] sm:$0xff]   ;;  %v8124_v55 = vld [vmem:[%s11122_s0 + $0x360] sm:$0xff]   ;;  %v9569_v20 = vpop.f32.mrb[100].mxu1 }
 0x1af   :  { %v5428_v13 = vsel %vm5213_vm2, %v4801_v5, 0.0  ;;  %v4802_v61 = vmax.f32 %v3058_v48, 0.0  ;;  %7580 = vmatprep.mubr.msk.bf16.mxu0 %vm1847_vm0, %v8120_v21  ;;  %v5964_v28 = vadd.f32 %v5963_v62, %v5962_v38  ;;  %v4066_v21 = vadd.f32 %v9504_v41, %v4065_v23  ;;  %v9575_v38 = vpop.f32.mrb[101].mxu1 }
 0x1b0   :  { %v5429_v36 = vadd.f32 %v5428_v13, %v5427_v4  ;;  %v5432_v14 = vsel %vm5213_vm2, %v4803_v51, 0.0  ;;  %v5053_v6 = vmax.f32 %v4063_v37, 0.0  ;;  %v5056_v11 = vmax.f32 %v4074_v39, 0.0 }
 0x1b1   :  { %v5430_v33 = vsel %vm5213_vm2, %v4802_v61, 0.0  ;;  %v7474_v35 = vpop.f32.mrb[104].mxu0  ;;  %v9567_v23 = vadd.f32 %v5965_v7, %v5964_v28  ;;  %v5054_v59 = vmax.f32 %v4066_v21, 0.0  ;;  %v3695_v51 = vadd.f32 %v9504_v41, %v8748_v19  ;;  %v8151_v7 = vld [vmem:[%s11122_s0 + $0x758] sm:$0xff]   ;;  %v9583_v19 = vpop.f32.mrb[102].mxu1  ;;  %v8154_v28 = vld [vmem:[%s11122_s0 + $0x760] sm:$0xff]  }
 0x1b2   :  { %v5431_v31 = vadd.f32 %v5430_v33, %v5429_v36  ;;  %v3079_v0 = vadd.f32 %v9504_v41, %v7474_v35  ;;  %v3070_v1 = vpop.f32.mrb[105].mxu0  ;;  %v5973_v61 = vsel %vm5213_vm2, %v5053_v6, 0.0  ;;  %v4963_v36 = vmax.f32 %v9541_v50, 0.0  ;;  %v9591_v50 = vpop.f32.mrb[103].mxu1 }
 0x1b3   :  { %v3071_v5 = vadd.f32 %v9504_v41, %v3070_v1  ;;  %v7475_v48 = vpop.f32.mrb[106].mxu0  ;;  %11152 = vst [vmem:[#allocation21_spill] sm:$0xff] %v9567_v23  ;;  %v5434_v37 = vsel %vm5213_vm2, %v4804_v60, 0.0  ;;  %v5978_v6 = vsel %vm5213_vm2, %v5056_v11, 0.0  ;;  %v9608_v11 = vadd.f32 %v9504_v41, %v8753_v24 }
 0x1b4   :  { %v5433_v4 = vadd.f32 %v5432_v14, %v5431_v31  ;;  %v3082_v62 = vadd.f32 %v9504_v41, %v7475_v48  ;;  %v3073_v13 = vpop.f32.mrb[107].mxu0  ;;  %v4807_v39 = vmax.f32 %v3079_v0, 0.0  ;;  %v5976_v14 = vsel %vm5213_vm2, %v5055_v15, 0.0 }
 0x1b5   :  { %v4805_v33 = vmax.f32 %v3071_v5, 0.0  ;;  %v3074_v35 = vadd.f32 %v9504_v41, %v3073_v13  ;;  %v5974_v31 = vsel %vm5213_vm2, %v5054_v59, 0.0  ;;  %v4087_v0 = vadd.f32 %v9504_v41, %v9522_v42  ;;  %7837 = vmatmul.mubr.msk.bf16.gmra.mrb[208].mxu1 %vm1847_vm0, %v8151_v7 }
 0x1b6   :  { %v5435_v21 = vadd.f32 %v5434_v37, %v5433_v4  ;;  %7581 = vmatmul.mubr.msk.bf16.gmra.mrb[212].mxu0 %vm1847_vm0, %v8121_v46  ;;  %v5975_v5 = vadd.f32 %v5974_v31, %v5973_v61  ;;  %v4808_v13 = vmax.f32 %v3082_v62, 0.0  ;;  %v4079_v15 = vadd.f32 %v9504_v41, %v9527_v26  ;;  %7840 = vmatprep.mubr.msk.bf16.mxu1 %vm1847_vm0, %v8154_v28  ;;  %v8125_v26 = vld [vmem:[%s11122_s0 + $0x368] sm:$0xff]  }
 0x1b7   :  { %v5436_v60 = vsel %vm5213_vm2, %v4805_v33, 0.0  ;;  %v4806_v1 = vmax.f32 %v3074_v35, 0.0  ;;  %7584 = vmatprep.mubr.msk.bf16.mxu0 %vm1847_vm0, %v8124_v55  ;;  %v4961_v46 = vmax.f32 %v3695_v51, 0.0  ;;  %v9604_v55 = vsel %vm5213_vm2, %v4963_v36, 0.0  ;;  %v8128_v36 = vld [vmem:[%s11122_s0 + $0x370] sm:$0xff]  }
 0x1b8   :  { %v5437_v48 = vadd.f32 %v5436_v60, %v5435_v21  ;;  %v5977_v37 = vadd.f32 %v5976_v14, %v5975_v5  ;;  %v5057_v51 = vmax.f32 %v4079_v15, 0.0  ;;  %v5440_v61 = vsel %vm5213_vm2, %v4807_v39, 0.0  ;;  %v9619_v28 = vpop.f32.mrb[104].mxu1  ;;  %v8155_v5 = vld [vmem:[%s11122_s0 + $0x768] sm:$0xff]  }
 0x1b9   :  { %v5438_v59 = vsel %vm5213_vm2, %v4806_v1, 0.0  ;;  %v7478_v4 = vpop.f32.mrb[108].mxu0  ;;  %v5442_v21 = vsel %vm5213_vm2, %v4808_v13, 0.0  ;;  %v5059_v60 = vmax.f32 %v4087_v0, 0.0  ;;  %v4090_v39 = vadd.f32 %v9504_v41, %v9534_v3  ;;  %v9624_v1 = vpop.f32.mrb[105].mxu1  ;;  %v8158_v0 = vld [vmem:[%s11122_s0 + $0x770] sm:$0xff]  }
 0x1ba   :  { %v5439_v42 = vadd.f32 %v5438_v59, %v5437_v48  ;;  %v3086_v62 = vpop.f32.mrb[109].mxu0  ;;  %v3095_v7 = vadd.f32 %v9504_v41, %v7478_v4  ;;  %v5979_v24 = vadd.f32 %v5978_v6, %v5977_v37  ;;  %v5980_v59 = vsel %vm5213_vm2, %v5057_v51, 0.0  ;;  %v9632_v13 = vpop.f32.mrb[106].mxu1 }
 0x1bb   :  { %v3087_v33 = vadd.f32 %v9504_v41, %v3086_v62  ;;  %v7479_v35 = vpop.f32.mrb[110].mxu0  ;;  %v9638_v3 = vsel %vm5213_vm2, %v4961_v46, 0.0  ;;  %v9642_v4 = vadd.f32 %v9504_v41, %v8759_v27  ;;  %v9645_v62 = vpop.f32.mrb[107].mxu1  ;;  %v4082_v27 = vadd.f32 %v9504_v41, %v9545_v17 }
 0x1bc   :  { %v5441_v14 = vadd.f32 %v5440_v61, %v5439_v42  ;;  %v3089_v31 = vpop.f32.mrb[111].mxu0  ;;  %v3098_v15 = vadd.f32 %v9504_v41, %v7479_v35  ;;  %v5981_v42 = vadd.f32 %v5980_v59, %v5979_v24  ;;  %v4811_v61 = vmax.f32 %v3095_v7, 0.0 }
 0x1bd   :  { %v4809_v48 = vmax.f32 %v3087_v33, 0.0  ;;  %v3090_v6 = vadd.f32 %v9504_v41, %v3089_v31  ;;  %v5060_v31 = vmax.f32 %v4090_v39, 0.0  ;;  %7841 = vmatmul.mubr.msk.bf16.gmra.mrb[212].mxu1 %vm1847_vm0, %v8155_v5  ;;  %v5984_v7 = vsel %vm5213_vm2, %v5059_v60, 0.0 }
 0x1be   :  { %v5443_v37 = vadd.f32 %v5442_v21, %v5441_v14  ;;  %7585 = vmatmul.mubr.msk.bf16.gmra.mrb[216].mxu0 %vm1847_vm0, %v8125_v26  ;;  %v4103_v21 = vadd.f32 %v9504_v41, %v9569_v20  ;;  %v4812_v26 = vmax.f32 %v3098_v15, 0.0  ;;  %7844 = vmatprep.mubr.msk.bf16.mxu1 %vm1847_vm0, %v8158_v0  ;;  %v8129_v20 = vld [vmem:[%s11122_s0 + $0x378] sm:$0xff]   ;;  %v5058_v5 = vmax.f32 %v4082_v27, 0.0 }
 0x1bf   :  { %v5444_v33 = vsel %vm5213_vm2, %v4809_v48, 0.0  ;;  %v4810_v35 = vmax.f32 %v3090_v6, 0.0  ;;  %7588 = vmatprep.mubr.msk.bf16.mxu0 %vm1847_vm0, %v8128_v36  ;;  %v4095_v48 = vadd.f32 %v9504_v41, %v9575_v38  ;;  %v4098_v15 = vadd.f32 %v9504_v41, %v9591_v50  ;;  %v8132_v38 = vld [vmem:[%s11122_s0 + $0x380] sm:$0xff]  }
 0x1c0   :  { %v5445_v46 = vadd.f32 %v5444_v33, %v5443_v37  ;;  %v5448_v6 = vsel %vm5213_vm2, %v4811_v61, 0.0  ;;  %v5063_v0 = vmax.f32 %v4103_v21, 0.0  ;;  %v9673_v37 = vadd.f32 %v9504_v41, %v9583_v19  ;;  %v9675_v33 = vpop.f32.mrb[108].mxu1 }
 0x1c1   :  { %v5446_v24 = vsel %vm5213_vm2, %v4810_v35, 0.0  ;;  %v7482_v14 = vpop.f32.mrb[112].mxu0  ;;  %v5982_v61 = vsel %vm5213_vm2, %v5058_v5, 0.0  ;;  %v5061_v27 = vmax.f32 %v4095_v48, 0.0  ;;  %v5450_v21 = vsel %vm5213_vm2, %v4812_v26, 0.0 }
 0x1c2   :  { %v5447_v36 = vadd.f32 %v5446_v24, %v5445_v46  ;;  %v3111_v39 = vadd.f32 %v9504_v41, %v7482_v14  ;;  %v3102_v17 = vpop.f32.mrb[113].mxu0  ;;  %v9679_v24 = vpop.f32.mrb[109].mxu1  ;;  %v8159_v14 = vld [vmem:[%s11122_s0 + $0x778] sm:$0xff]   ;;  %v5983_v51 = vadd.f32 %v5982_v61, %v5981_v42  ;;  %v5992_v44 = vsel %vm5213_vm2, %v5063_v0, 0.0 }
 0x1c3   :  { %v3103_v60 = vadd.f32 %v9504_v41, %v3102_v17  ;;  %v7483_v59 = vpop.f32.mrb[114].mxu0  ;;  %v9686_v23 = vpop.f32.mrb[110].mxu1 }
 0x1c4   :  { %v5449_v35 = vadd.f32 %v5448_v6, %v5447_v36  ;;  %v3114_v46 = vadd.f32 %v9504_v41, %v7483_v59  ;;  %v3105_v50 = vpop.f32.mrb[115].mxu0  ;;  %v8162_v36 = vld [vmem:[%s11122_s0 + $0x780] sm:$0xff]   ;;  %v4815_v5 = vmax.f32 %v3111_v39, 0.0  ;;  %v5986_v6 = vsel %vm5213_vm2, %v5060_v31, 0.0  ;;  %v9693_v30 = vpop.f32.mrb[111].mxu1 }
 0x1c5   :  { %v4813_v17 = vmax.f32 %v3103_v60, 0.0  ;;  %v3106_v19 = vadd.f32 %v9504_v41, %v3105_v50  ;;  %v5062_v59 = vmax.f32 %v4098_v15, 0.0  ;;  %v5985_v42 = vadd.f32 %v5984_v7, %v5983_v51  ;;  %7845 = vmatmul.mubr.msk.bf16.gmra.mrb[216].mxu1 %vm1847_vm0, %v8159_v14 }
 0x1c6   :  { %v5451_v48 = vadd.f32 %v5450_v21, %v5449_v35  ;;  %7589 = vmatmul.mubr.msk.bf16.gmra.mrb[220].mxu0 %vm1847_vm0, %v8129_v20  ;;  %v4816_v60 = vmax.f32 %v3114_v46, 0.0  ;;  %v5988_v39 = vsel %vm5213_vm2, %v5061_v27, 0.0  ;;  %v5064_v35 = vmax.f32 %v9673_v37, 0.0  ;;  %7848 = vmatprep.mubr.msk.bf16.mxu1 %vm1847_vm0, %v8162_v36  ;;  %v8133_v27 = vld [vmem:[%s11122_s0 + $0x388] sm:$0xff]  }
 0x1c7   :  { %v5452_v26 = vsel %vm5213_vm2, %v4813_v17, 0.0  ;;  %v4814_v50 = vmax.f32 %v3106_v19, 0.0  ;;  %7592 = vmatprep.mubr.msk.bf16.mxu0 %vm1847_vm0, %v8132_v38  ;;  %v5987_v15 = vadd.f32 %v5986_v6, %v5985_v42  ;;  %v4119_v46 = vadd.f32 %v9504_v41, %v9619_v28  ;;  %v8163_v42 = vld [vmem:[%s11122_s0 + $0x788] sm:$0xff]  }
 0x1c8   :  { %v5453_v61 = vadd.f32 %v5452_v26, %v5451_v48  ;;  %v4111_v38 = vadd.f32 %v9504_v41, %v9624_v1  ;;  %v5456_v51 = vsel %vm5213_vm2, %v4815_v5, 0.0  ;;  %v5990_v14 = vsel %vm5213_vm2, %v5062_v59, 0.0  ;;  %v8136_v1 = vld [vmem:[%s11122_s0 + $0x390] sm:$0xff]   ;;  %v9720_v5 = vpop.f32.mrb[112].mxu1 }
 0x1c9   :  { %v5454_v31 = vsel %vm5213_vm2, %v4814_v50, 0.0  ;;  %v7486_v20 = vpop.f32.mrb[116].mxu0  ;;  %v5458_v21 = vsel %vm5213_vm2, %v4816_v60, 0.0  ;;  %v5989_v19 = vadd.f32 %v5988_v39, %v5987_v15  ;;  %v4114_v36 = vadd.f32 %v9504_v41, %v9645_v62  ;;  %v9725_v50 = vpop.f32.mrb[113].mxu1  ;;  %v8166_v15 = vld [vmem:[%s11122_s0 + $0x790] sm:$0xff]  }
 0x1ca   :  { %v5455_v7 = vadd.f32 %v5454_v31, %v5453_v61  ;;  %v3127_v0 = vadd.f32 %v9504_v41, %v7486_v20  ;;  %v3118_v37 = vpop.f32.mrb[117].mxu0  ;;  %v5065_v59 = vmax.f32 %v4111_v38, 0.0  ;;  %v4122_v60 = vadd.f32 %v9504_v41, %v9632_v13  ;;  %v9731_v20 = vpop.f32.mrb[114].mxu1 }
 0x1cb   :  { %v3119_v28 = vadd.f32 %v9504_v41, %v3118_v37  ;;  %v7487_v17 = vpop.f32.mrb[118].mxu0  ;;  %v5991_v62 = vadd.f32 %v5990_v14, %v5989_v19  ;;  %v5067_v31 = vmax.f32 %v4119_v46, 0.0  ;;  %v9738_v37 = vpop.f32.mrb[115].mxu1  ;;  %v5066_v14 = vmax.f32 %v4114_v36, 0.0 }
 0x1cc   :  { %v5457_v48 = vadd.f32 %v5456_v51, %v5455_v7  ;;  %v3130_v6 = vadd.f32 %v9504_v41, %v7487_v17  ;;  %v3121_v26 = vpop.f32.mrb[119].mxu0  ;;  %v4819_v38 = vmax.f32 %v3127_v0, 0.0  ;;  %v5994_v7 = vsel %vm5213_vm2, %v5064_v35, 0.0 }
 0x1cd   :  { %v4817_v61 = vmax.f32 %v3119_v28, 0.0  ;;  %v3122_v39 = vadd.f32 %v9504_v41, %v3121_v26  ;;  %v5993_v46 = vadd.f32 %v5992_v44, %v5991_v62  ;;  %v5996_v26 = vsel %vm5213_vm2, %v5065_v59, 0.0  ;;  %7849 = vmatmul.mubr.msk.bf16.gmra.mrb[220].mxu1 %vm1847_vm0, %v8163_v42 }
 0x1ce   :  { %v5459_v51 = vadd.f32 %v5458_v21, %v5457_v48  ;;  %v4820_v13 = vmax.f32 %v3130_v6, 0.0  ;;  %7593 = vmatmul.mubr.msk.bf16.gmra.mrb[224].mxu0 %vm1847_vm0, %v8133_v27  ;;  %v5068_v34 = vmax.f32 %v4122_v60, 0.0  ;;  %v4127_v0 = vadd.f32 %v9504_v41, %v9679_v24  ;;  %7852 = vmatprep.mubr.msk.bf16.mxu1 %vm1847_vm0, %v8166_v15  ;;  %v8137_v24 = vld [vmem:[%s11122_s0 + $0x398] sm:$0xff]  }
 0x1cf   :  { %v5460_v28 = vsel %vm5213_vm2, %v4817_v61, 0.0  ;;  %v4818_v17 = vmax.f32 %v3122_v39, 0.0  ;;  %7596 = vmatprep.mubr.msk.bf16.mxu0 %vm1847_vm0, %v8136_v1  ;;  %v6000_v21 = vsel %vm5213_vm2, %v5067_v31, 0.0  ;;  %v5995_v48 = vadd.f32 %v5994_v7, %v5993_v46  ;;  %v8167_v46 = vld [vmem:[%s11122_s0 + $0x798] sm:$0xff]  }
 0x1d0   :  { %v5461_v19 = vadd.f32 %v5460_v28, %v5459_v51  ;;  %v4135_v1 = vadd.f32 %v9504_v41, %v9675_v33  ;;  %v5464_v44 = vsel %vm5213_vm2, %v4819_v38, 0.0  ;;  %v5998_v60 = vsel %vm5213_vm2, %v5066_v14, 0.0  ;;  %v8140_v33 = vld [vmem:[%s11122_s0 + $0x3a0] sm:$0xff]   ;;  %v9764_v15 = vpop.f32.mrb[116].mxu1 }
 0x1d1   :  { %v5462_v35 = vsel %vm5213_vm2, %v4818_v17, 0.0  ;;  %v7490_v27 = vpop.f32.mrb[120].mxu0  ;;  %v5466_v42 = vsel %vm5213_vm2, %v4820_v13, 0.0  ;;  %v5997_v62 = vadd.f32 %v5996_v26, %v5995_v48  ;;  %v4130_v31 = vadd.f32 %v9504_v41, %v9693_v30  ;;  %v9769_v17 = vpop.f32.mrb[117].mxu1 }
 0x1d2   :  { %v5463_v36 = vadd.f32 %v5462_v35, %v5461_v19  ;;  %v3143_v6 = vadd.f32 %v9504_v41, %v7490_v27  ;;  %v3134_v59 = vpop.f32.mrb[121].mxu0  ;;  %v5069_v28 = vmax.f32 %v4127_v0, 0.0  ;;  %v4138_v13 = vadd.f32 %v9504_v41, %v9686_v23  ;;  %v9775_v35 = vpop.f32.mrb[118].mxu1  ;;  %v8168_v0 = vld [vmem:[%s11122_s0 + $0x7a0] sm:$0xff]  }
 0x1d3   :  { %v3135_v61 = vadd.f32 %v9504_v41, %v3134_v59  ;;  %v7491_v39 = vpop.f32.mrb[122].mxu0  ;;  %v5999_v30 = vadd.f32 %v5998_v60, %v5997_v62  ;;  %v5071_v26 = vmax.f32 %v4135_v1, 0.0 }
 0x1d4   :  { %v5465_v38 = vadd.f32 %v5464_v44, %v5463_v36  ;;  %v3146_v51 = vadd.f32 %v9504_v41, %v7491_v39  ;;  %v3137_v7 = vpop.f32.mrb[123].mxu0  ;;  %v4823_v23 = vmax.f32 %v3143_v6, 0.0  ;;  %v6002_v44 = vsel %vm5213_vm2, %v5068_v34, 0.0  ;;  %v9783_v36 = vpop.f32.mrb[119].mxu1 }
 0x1d5   :  { %v4821_v14 = vmax.f32 %v3135_v61, 0.0  ;;  %v3138_v19 = vadd.f32 %v9504_v41, %v3137_v7  ;;  %v6001_v1 = vadd.f32 %v6000_v21, %v5999_v30  ;;  %v5070_v61 = vmax.f32 %v4130_v31, 0.0  ;;  %7853 = vmatmul.mubr.msk.bf16.gmra.mrb[224].mxu1 %vm1847_vm0, %v8167_v46  ;;  %v8144_v30 = vld [vmem:[%s11122_s0 + $0x3b0] sm:$0xff]  }
 0x1d6   :  { %v5467_v48 = vadd.f32 %v5466_v42, %v5465_v38  ;;  %7597 = vmatmul.mubr.msk.bf16.gmra.mrb[228].mxu0 %vm1847_vm0, %v8137_v24  ;;  %v4824_v62 = vmax.f32 %v3146_v51, 0.0  ;;  %v6004_v7 = vsel %vm5213_vm2, %v5069_v28, 0.0  ;;  %v4143_v6 = vadd.f32 %v9504_v41, %v9725_v50  ;;  %7856 = vmatprep.mubr.msk.bf16.mxu1 %vm1847_vm0, %v8168_v0  ;;  %v8141_v51 = vld [vmem:[%s11122_s0 + $0x3a8] sm:$0xff]  }
 0x1d7   :  { %v5468_v59 = vsel %vm5213_vm2, %v4821_v14, 0.0  ;;  %v4822_v60 = vmax.f32 %v3138_v19, 0.0  ;;  %7600 = vmatprep.mubr.msk.bf16.mxu0 %vm1847_vm0, %v8140_v33  ;;  %v6008_v42 = vsel %vm5213_vm2, %v5071_v26, 0.0  ;;  %v6003_v38 = vadd.f32 %v6002_v44, %v6001_v1 }
 0x1d8   :  { %v5469_v39 = vadd.f32 %v5468_v59, %v5467_v48  ;;  %v5072_v14 = vmax.f32 %v4138_v13, 0.0  ;;  %v6006_v50 = vsel %vm5213_vm2, %v5070_v61, 0.0  ;;  %v4151_v28 = vadd.f32 %v9504_v41, %v9720_v5  ;;  %v9808_v48 = vpop.f32.mrb[120].mxu1  ;;  %v8169_v61 = vld [vmem:[%s11122_s0 + $0x7a8] sm:$0xff]  }
 0x1d9   :  { %v5470_v34 = vsel %vm5213_vm2, %v4822_v60, 0.0  ;;  %v7494_v24 = vpop.f32.mrb[124].mxu0  ;;  %v5472_v46 = vsel %vm5213_vm2, %v4823_v23, 0.0  ;;  %v6005_v26 = vadd.f32 %v6004_v7, %v6003_v38  ;;  %v4146_v0 = vadd.f32 %v9504_v41, %v9738_v37  ;;  %v9812_v1 = vpop.f32.mrb[121].mxu1 }
 0x1da   :  { %v5471_v21 = vadd.f32 %v5470_v34, %v5469_v39  ;;  %v3159_v33 = vadd.f32 %v9504_v41, %v7494_v24  ;;  %v3150_v31 = vpop.f32.mrb[125].mxu0  ;;  %v5474_v44 = vsel %vm5213_vm2, %v4824_v62, 0.0  ;;  %v5073_v23 = vmax.f32 %v4143_v6, 0.0  ;;  %v9820_v24 = vpop.f32.mrb[122].mxu1  ;;  %v8170_v62 = vld [vmem:[%s11122_s0 + $0x7b0] sm:$0xff]  }
 0x1db   :  { %v3151_v19 = vadd.f32 %v9504_v41, %v3150_v31  ;;  %v7495_v13 = vpop.f32.mrb[126].mxu0  ;;  %v6007_v34 = vadd.f32 %v6006_v50, %v6005_v26  ;;  %v4154_v37 = vadd.f32 %v9504_v41, %v9731_v20  ;;  %v5075_v31 = vmax.f32 %v4151_v28, 0.0 }
 0x1dc   :  { %v5473_v59 = vadd.f32 %v5472_v46, %v5471_v21  ;;  %v3162_v5 = vadd.f32 %v9504_v41, %v7495_v13  ;;  %v3153_v60 = vpop.f32.mrb[127].mxu0  ;;  %v4827_v6 = vmax.f32 %v3159_v33, 0.0  ;;  %v6010_v21 = vsel %vm5213_vm2, %v5072_v14, 0.0  ;;  %v9827_v46 = vpop.f32.mrb[123].mxu1 }
 0x1dd   :  { %v4825_v39 = vmax.f32 %v3151_v19, 0.0  ;;  %v3154_v7 = vadd.f32 %v9504_v41, %v3153_v60  ;;  %v6009_v20 = vadd.f32 %v6008_v42, %v6007_v34  ;;  %v5074_v13 = vmax.f32 %v4146_v0, 0.0  ;;  %7857 = vmatmul.mubr.msk.bf16.gmra.mrb[228].mxu1 %vm1847_vm0, %v8169_v61  ;;  %v8148_v34 = vld [vmem:[%s11122_s0 + $0x3c0] sm:$0xff]  }
 0x1de   :  { %v5475_v38 = vadd.f32 %v5474_v44, %v5473_v59  ;;  %7601 = vmatmul.mubr.msk.bf16.gmra.mrb[232].mxu0 %vm1847_vm0, %v8141_v51  ;;  %v4828_v60 = vmax.f32 %v3162_v5, 0.0  ;;  %v6012_v27 = vsel %vm5213_vm2, %v5073_v23, 0.0  ;;  %v4159_v33 = vadd.f32 %v9504_v41, %v9769_v17  ;;  %7860 = vmatprep.mubr.msk.bf16.mxu1 %vm1847_vm0, %v8170_v62  ;;  %v8145_v17 = vld [vmem:[%s11122_s0 + $0x3b8] sm:$0xff]  }
 0x1df   :  { %v5476_v50 = vsel %vm5213_vm2, %v4825_v39, 0.0  ;;  %v4826_v19 = vmax.f32 %v3154_v7, 0.0  ;;  %7604 = vmatprep.mubr.msk.bf16.mxu0 %vm1847_vm0, %v8144_v30  ;;  %v11153_v14 = vrot.slane %v8977_v32, 4  ;;  %v6011_v30 = vadd.f32 %v6010_v21, %v6009_v20 }
 0x1e0   :  { %v5477_v26 = vadd.f32 %v5476_v50, %v5475_v38  ;;  %v5076_v42 = vmax.f32 %v4154_v37, 0.0  ;;  %v5480_v0 = vsel %vm5213_vm2, %v4827_v6, 0.0  ;;  %v6014_v23 = vsel %vm5213_vm2, %v5074_v13, 0.0  ;;  %v9856_v6 = vpop.f32.mrb[124].mxu1  ;;  %v8171_v13 = vld [vmem:[%s11122_s0 + $0x7b8] sm:$0xff]  }
 0x1e1   :  { %v9838_v51 = vadd.f32 %v11153_v14, %v8977_v32  ;;  %v5478_v28 = vsel %vm5213_vm2, %v4826_v19, 0.0  ;;  %v7498_v44 = vpop.f32.mrb[128].mxu0  ;;  %v4167_v32 = vadd.f32 %v9504_v41, %v9764_v15  ;;  %v6013_v37 = vadd.f32 %v6012_v27, %v6011_v30  ;;  %v9860_v20 = vpop.f32.mrb[125].mxu1 }
 0x1e2   :  { %v5479_v59 = vadd.f32 %v5478_v28, %v5477_v26  ;;  %v3166_v5 = vpop.f32.mrb[129].mxu0  ;;  %v3175_v61 = vadd.f32 %v9504_v41, %v7498_v44  ;;  %v4162_v62 = vadd.f32 %v9504_v41, %v9783_v36  ;;  %v5482_v38 = vsel %vm5213_vm2, %v4828_v60, 0.0  ;;  %v9867_v28 = vpop.f32.mrb[126].mxu1  ;;  %v8172_v60 = vld [vmem:[%s11122_s0 + $0x7c0] sm:$0xff]  }
 0x1e3   :  { %v3167_v39 = vadd.f32 %v9504_v41, %v3166_v5  ;;  %v7499_v7 = vpop.f32.mrb[130].mxu0  ;;  %v6016_v15 = vsel %vm5213_vm2, %v5075_v31, 0.0  ;;  %v5077_v19 = vmax.f32 %v4159_v33, 0.0  ;;  %v6015_v14 = vadd.f32 %v6014_v23, %v6013_v37 }
 0x1e4   :  { %v5481_v21 = vadd.f32 %v5480_v0, %v5479_v59  ;;  %v3169_v50 = vpop.f32.mrb[131].mxu0  ;;  %v3178_v27 = vadd.f32 %v9504_v41, %v7499_v7  ;;  %v6018_v33 = vsel %vm5213_vm2, %v5076_v42, 0.0  ;;  %v5079_v44 = vmax.f32 %v4167_v32, 0.0  ;;  %v9878_v0 = vpop.f32.mrb[127].mxu1 }
 0x1e5   :  { %v4829_v26 = vmax.f32 %v3167_v39, 0.0  ;;  %v3170_v36 = vadd.f32 %v9504_v41, %v3169_v50  ;;  %v4170_v30 = vadd.f32 %v9504_v41, %v9775_v35  ;;  %v4831_v59 = vmax.f32 %v3175_v61, 0.0  ;;  %7861 = vmatmul.mubr.msk.bf16.gmra.mrb[232].mxu1 %vm1847_vm0, %v8171_v13  ;;  %v8149_v50 = vld [vmem:[%s11122_s0 + $0x3c8] sm:$0xff]  }
 0x1e6   :  { %v9872_v31 = vadd.f32 %v5482_v38, %v5481_v21  ;;  %7605 = vmatmul.mubr.msk.bf16.gmra.mrb[236].mxu0 %vm1847_vm0, %v8145_v17  ;;  %v6017_v23 = vadd.f32 %v6016_v15, %v6015_v14  ;;  %v5078_v39 = vmax.f32 %v4162_v62, 0.0  ;;  %v5279_v7 = vrot.slane %v9838_v51, 2  ;;  %7864 = vmatprep.mubr.msk.bf16.mxu1 %vm1847_vm0, %v8172_v60 }
 0x1e7   :  { %v4830_v5 = vmax.f32 %v3170_v36, 0.0  ;;  %7608 = vmatprep.mubr.msk.bf16.mxu0 %vm1847_vm0, %v8148_v34  ;;  %v4962_v37 = vmax.f32 %v9642_v4, 0.0  ;;  %v6020_v17 = vsel %vm5213_vm2, %v5077_v19, 0.0  ;;  %v4175_v42 = vadd.f32 %v9504_v41, %v9812_v1 }
 0x1e8   :  { %v5490_v35 = vsel %vm5213_vm2, %v4829_v26, 0.0  ;;  %v4832_v32 = vmax.f32 %v3178_v27, 0.0  ;;  %v6019_v34 = vadd.f32 %v6018_v33, %v6017_v23  ;;  %v5080_v1 = vmax.f32 %v4170_v30, 0.0  ;;  %v8152_v27 = vld [vmem:[%s11122_s0 + $0x3d0] sm:$0xff]   ;;  %v9901_v60 = vpop.f32.mrb[128].mxu1 }
 0x1e9   :  { %v5491_v61 = vsel %vm5213_vm2, %v4830_v5, 0.0  ;;  %v7502_v38 = vpop.f32.mrb[132].mxu0  ;;  %v6022_v15 = vsel %vm5213_vm2, %v5078_v39, 0.0  ;;  %v5493_v19 = vsel %vm5213_vm2, %v4831_v59, 0.0  ;;  %v6024_v36 = vsel %vm5213_vm2, %v5079_v44, 0.0  ;;  %v9906_v39 = vpop.f32.mrb[129].mxu1 }
 0x1ea   :  { %v5492_v62 = vadd.f32 %v5491_v61, %v5490_v35  ;;  %v3191_v21 = vadd.f32 %v9504_v41, %v7502_v38  ;;  %v3182_v4 = vpop.f32.mrb[133].mxu0  ;;  %v6021_v14 = vadd.f32 %v6020_v17, %v6019_v34  ;;  %v4183_v23 = vadd.f32 %v9504_v41, %v9808_v48  ;;  %v8173_v35 = vld [vmem:[%s11122_s0 + $0x7c8] sm:$0xff]   ;;  %v9913_v34 = vpop.f32.mrb[130].mxu1 }
 0x1eb   :  { %v3183_v13 = vadd.f32 %v9504_v41, %v3182_v4  ;;  %v7503_v26 = vpop.f32.mrb[134].mxu0  ;;  %v5081_v59 = vmax.f32 %v4175_v42, 0.0  ;;  %v5495_v61 = vsel %vm5213_vm2, %v4832_v32, 0.0  ;;  %v6026_v4 = vsel %vm5213_vm2, %v5080_v1, 0.0  ;;  %v9922_v32 = vpop.f32.mrb[131].mxu1 }
 0x1ec   :  { %v5494_v33 = vadd.f32 %v5493_v19, %v5492_v62  ;;  %v3194_v5 = vadd.f32 %v9504_v41, %v7503_v26  ;;  %v3185_v30 = vpop.f32.mrb[135].mxu0  ;;  %v6023_v38 = vadd.f32 %v6022_v15, %v6021_v14  ;;  %v8174_v62 = vld [vmem:[%s11122_s0 + $0x7d0] sm:$0xff]   ;;  %v4835_v48 = vmax.f32 %v3191_v21, 0.0 }
 0x1ed   :  { %v4833_v44 = vmax.f32 %v3183_v13, 0.0  ;;  %v3186_v17 = vadd.f32 %v9504_v41, %v3185_v30  ;;  %v4186_v19 = vadd.f32 %v9504_v41, %v9820_v24  ;;  %v9925_v13 = vsel %vm5213_vm2, %v4962_v37, 0.0  ;;  %7865 = vmatmul.mubr.msk.bf16.gmra.mrb[236].mxu1 %vm1847_vm0, %v8173_v35 }
 0x1ee   :  { %v5496_v42 = vadd.f32 %v5495_v61, %v5494_v33  ;;  %7609 = vmatmul.mubr.msk.bf16.gmra.mrb[240].mxu0 %vm1847_vm0, %v8149_v50  ;;  %v6025_v14 = vadd.f32 %v6024_v36, %v6023_v38  ;;  %v4836_v33 = vmax.f32 %v3194_v5, 0.0  ;;  %v5083_v30 = vmax.f32 %v4183_v23, 0.0  ;;  %7868 = vmatprep.mubr.msk.bf16.mxu1 %vm1847_vm0, %v8174_v62 }
 0x1ef   :  { %v5497_v15 = vsel %vm5213_vm2, %v4833_v44, 0.0  ;;  %v4834_v26 = vmax.f32 %v3186_v17, 0.0  ;;  %7612 = vmatprep.mubr.msk.bf16.mxu0 %vm1847_vm0, %v8152_v27  ;;  %v6028_v50 = vsel %vm5213_vm2, %v5081_v59, 0.0  ;;  %v9932_v24 = vadd.f32 %v5279_v7, %v9838_v51  ;;  %v8153_v51 = vld [vmem:[%s11122_s0 + $0x3d8] sm:$0xff]  }
 0x1f0   :  { %v5498_v21 = vadd.f32 %v5497_v15, %v5496_v42  ;;  %v6027_v61 = vadd.f32 %v6026_v4, %v6025_v14  ;;  %v4178_v44 = vadd.f32 %v9504_v41, %v9827_v46  ;;  %v5501_v27 = vsel %vm5213_vm2, %v4835_v48, 0.0  ;;  %v8156_v46 = vld [vmem:[%s11122_s0 + $0x3e0] sm:$0xff]   ;;  %v9949_v48 = vpop.f32.mrb[132].mxu1 }
 0x1f1   :  { %v5499_v1 = vsel %vm5213_vm2, %v4834_v26, 0.0  ;;  %v7506_v37 = vpop.f32.mrb[136].mxu0  ;;  %v5084_v7 = vmax.f32 %v4186_v19, 0.0  ;;  %v4191_v62 = vadd.f32 %v9504_v41, %v9860_v20  ;;  %v5503_v42 = vsel %vm5213_vm2, %v4836_v33, 0.0  ;;  %v9954_v14 = vpop.f32.mrb[133].mxu1 }
 0x1f2   :  { %v5500_v36 = vadd.f32 %v5499_v1, %v5498_v21  ;;  %v3207_v5 = vadd.f32 %v9504_v41, %v7506_v37  ;;  %v3198_v23 = vpop.f32.mrb[137].mxu0  ;;  %v6029_v17 = vadd.f32 %v6028_v50, %v6027_v61  ;;  %v5082_v38 = vmax.f32 %v4178_v44, 0.0  ;;  %v8175_v21 = vld [vmem:[%s11122_s0 + $0x7d8] sm:$0xff]   ;;  %v9963_v37 = vpop.f32.mrb[134].mxu1 }
 0x1f3   :  { %v3199_v59 = vadd.f32 %v9504_v41, %v3198_v23  ;;  %v7507_v35 = vpop.f32.mrb[138].mxu0  ;;  %v6032_v26 = vsel %vm5213_vm2, %v5083_v30, 0.0  ;;  %v4199_v33 = vadd.f32 %v9504_v41, %v9856_v6  ;;  %v8176_v30 = vld [vmem:[%s11122_s0 + $0x7e0] sm:$0xff]   ;;  %v9970_v23 = vpop.f32.mrb[135].mxu1  ;;  %v5085_v6 = vmax.f32 %v4191_v62, 0.0 }
 0x1f4   :  { %v5502_v4 = vadd.f32 %v5501_v27, %v5500_v36  ;;  %v3210_v15 = vadd.f32 %v9504_v41, %v7507_v35  ;;  %v3201_v19 = vpop.f32.mrb[139].mxu0  ;;  %v6030_v20 = vsel %vm5213_vm2, %v5082_v38, 0.0  ;;  %v4839_v61 = vmax.f32 %v3207_v5, 0.0 }
 0x1f5   :  { %v4837_v50 = vmax.f32 %v3199_v59, 0.0  ;;  %v3202_v1 = vadd.f32 %v9504_v41, %v3201_v19  ;;  %v6034_v27 = vsel %vm5213_vm2, %v5084_v7, 0.0  ;;  %v6031_v36 = vadd.f32 %v6030_v20, %v6029_v17  ;;  %7869 = vmatmul.mubr.msk.bf16.gmra.mrb[240].mxu1 %vm1847_vm0, %v8175_v21 }
 0x1f6   :  { %v5504_v44 = vadd.f32 %v5503_v42, %v5502_v4  ;;  %7613 = vmatmul.mubr.msk.bf16.gmra.mrb[244].mxu0 %vm1847_vm0, %v8153_v51  ;;  %v4202_v38 = vadd.f32 %v9504_v41, %v9867_v28  ;;  %v4840_v63 = vmax.f32 %v3210_v15, 0.0  ;;  %v4194_v51 = vadd.f32 %v9504_v41, %v9878_v0  ;;  %7872 = vmatprep.mubr.msk.bf16.mxu1 %vm1847_vm0, %v8176_v30  ;;  %v8157_v0 = vld [vmem:[%s11122_s0 + $0x3e8] sm:$0xff]  }
 0x1f7   :  { %v5505_v59 = vsel %vm5213_vm2, %v4837_v50, 0.0  ;;  %v4838_v35 = vmax.f32 %v3202_v1, 0.0  ;;  %7616 = vmatprep.mubr.msk.bf16.mxu0 %vm1847_vm0, %v8156_v46  ;;  %v6033_v5 = vadd.f32 %v6032_v26, %v6031_v36  ;;  %v5087_v4 = vmax.f32 %v4199_v33, 0.0 }
 0x1f8   :  { %v5506_v19 = vadd.f32 %v5505_v59, %v5504_v44  ;;  %v4207_v46 = vadd.f32 %v9504_v41, %v9906_v39  ;;  %v5086_v21 = vmax.f32 %v4194_v51, 0.0  ;;  %v5509_v50 = vsel %vm5213_vm2, %v4839_v61, 0.0  ;;  %v8160_v39 = vld [vmem:[%s11122_s0 + $0x3f0] sm:$0xff]   ;;  %v9996_v44 = vpop.f32.mrb[136].mxu1 }
 0x1f9   :  { %v5507_v17 = vsel %vm5213_vm2, %v4838_v35, 0.0  ;;  %v7510_v42 = vpop.f32.mrb[140].mxu0  ;;  %v9988_v26 = vadd.f32 %v6034_v27, %v6033_v5  ;;  %v6042_v33 = vsel %vm5213_vm2, %v5085_v6, 0.0  ;;  %v5088_v30 = vmax.f32 %v4202_v38, 0.0  ;;  %v8177_v5 = vld [vmem:[%s11122_s0 + $0x7e8] sm:$0xff]  }
 0x1fa   :  { %v5508_v28 = vadd.f32 %v5507_v17, %v5506_v19  ;;  %v3223_v62 = vadd.f32 %v9504_v41, %v7510_v42  ;;  %v3214_v15 = vpop.f32.mrb[141].mxu0  ;;  %v5511_v36 = vsel %vm5213_vm2, %v4840_v63, 0.0  ;;  %v4215_v61 = vadd.f32 %v9504_v41, %v9901_v60  ;;  %v10001_v19 = vpop.f32.mrb[137].mxu1  ;;  %v8178_v42 = vld [vmem:[%s11122_s0 + $0x7f0] sm:$0xff]  }
 0x1fb   :  { %11154 = vst [vmem:[#allocation22_spill] sm:$0xff] %v9988_v26  ;;  %v3215_v1 = vadd.f32 %v9504_v41, %v3214_v15  ;;  %v7511_v20 = vpop.f32.mrb[142].mxu0  ;;  %v6043_v17 = vsel %vm5213_vm2, %v5086_v21, 0.0  ;;  %v10009_v63 = vpop.f32.mrb[138].mxu1  ;;  %v5346_v60 = vrot.slane %v9236_v54, 4  ;;  %v5089_v15 = vmax.f32 %v4207_v46, 0.0 }
 0x1fc   :  { %v5510_v59 = vadd.f32 %v5509_v50, %v5508_v28  ;;  %v4843_v27 = vmax.f32 %v3223_v62, 0.0  ;;  %v3217_v35 = vpop.f32.mrb[143].mxu0  ;;  %v3226_v6 = vadd.f32 %v9504_v41, %v7511_v20  ;;  %v6045_v62 = vsel %vm5213_vm2, %v5087_v4, 0.0  ;;  %v10017_v50 = vpop.f32.mrb[139].mxu1 }
 0x1fd   :  { %v4841_v51 = vmax.f32 %v3215_v1, 0.0  ;;  %v3218_v38 = vadd.f32 %v9504_v41, %v3217_v35  ;;  %v6047_v21 = vsel %vm5213_vm2, %v5088_v30, 0.0  ;;  %v6044_v20 = vadd.f32 %v6043_v17, %v6042_v33  ;;  %7873 = vmatmul.mubr.msk.bf16.gmra.mrb[244].mxu1 %vm1847_vm0, %v8177_v5 }
 0x1fe   :  { %v5512_v28 = vadd.f32 %v5511_v36, %v5510_v59  ;;  %7617 = vmatmul.mubr.msk.bf16.gmra.mrb[248].mxu0 %vm1847_vm0, %v8157_v0  ;;  %v5517_v35 = vsel %vm5213_vm2, %v4843_v27, 0.0  ;;  %v5091_v26 = vmax.f32 %v4215_v61, 0.0  ;;  %v10026_v0 = vld [vmem:[%s11124_s2] ss:$0 sm:$0xff]  ;;  %v4844_v46 = vmax.f32 %v3226_v6, 0.0  ;;  %7876 = vmatprep.mubr.msk.bf16.mxu1 %vm1847_vm0, %v8178_v42 }
 0x1ff   :  { %v5513_v41 = vsel %vm5213_vm2, %v4841_v51, 0.0  ;;  %v4842_v1 = vmax.f32 %v3218_v38, 0.0  ;;  %7620 = vmatprep.mubr.msk.bf16.mxu0 %vm1847_vm0, %v8160_v39  ;;  %v4218_v4 = vadd.f32 %v10026_v0, %v9913_v34  ;;  %v6046_v30 = vadd.f32 %v6045_v62, %v6044_v20  ;;  %v8161_v34 = vld [vmem:[%s11122_s0 + $0x3f8] sm:$0xff]  }
 0x200   :  { %v5514_v7 = vadd.f32 %v5513_v41, %v5512_v28  ;;  %v4210_v33 = vadd.f32 %v10026_v0, %v9922_v32  ;;  %v6049_v5 = vsel %vm5213_vm2, %v5089_v15, 0.0  ;;  %v4231_v51 = vadd.f32 %v10026_v0, %v9949_v48  ;;  %v8164_v32 = vld [vmem:[%s11122_s0 + $0x400] sm:$0xff]   ;;  %v10046_v28 = vpop.f32.mrb[140].mxu1 }
 0x201   :  { %v5515_v39 = vsel %vm5213_vm2, %v4842_v1, 0.0  ;;  %v7514_v36 = vpop.f32.mrb[144].mxu0  ;;  %v5092_v17 = vmax.f32 %v4218_v4, 0.0  ;;  %v11155_v62 = vrot.slane %v9932_v24, 1  ;;  %v10054_v15 = vadd.f32 %v5346_v60, %v9236_v54 }
 0x202   :  { %v5516_v59 = vadd.f32 %v5515_v39, %v5514_v7  ;;  %v3239_v27 = vadd.f32 %v10026_v0, %v7514_v36  ;;  %v3230_v61 = vpop.f32.mrb[145].mxu0  ;;  %v6048_v7 = vadd.f32 %v6047_v21, %v6046_v30  ;;  %v5090_v42 = vmax.f32 %v4210_v33, 0.0  ;;  %v10057_v39 = vpop.f32.mrb[141].mxu1  ;;  %v8179_v21 = vld [vmem:[%s11122_s0 + $0x7f8] sm:$0xff]  }
 0x203   :  { %v3231_v6 = vadd.f32 %v10026_v0, %v3230_v61  ;;  %v7515_v38 = vpop.f32.mrb[146].mxu0  ;;  %v10051_v41 = vadd.f32 %v11155_v62, %v9932_v24  ;;  %v5519_v4 = vsel %vm5213_vm2, %v4844_v46, 0.0  ;;  %v10064_v33 = vpop.f32.mrb[142].mxu1  ;;  %v6055_v46 = vsel %vm5213_vm2, %v5092_v17, 0.0 }
 0x204   :  { %v5518_v48 = vadd.f32 %v5517_v35, %v5516_v59  ;;  %v3242_v1 = vadd.f32 %v10026_v0, %v7515_v38  ;;  %v3233_v20 = vpop.f32.mrb[147].mxu0  ;;  %v6050_v24 = vadd.f32 %v6049_v5, %v6048_v7  ;;  %v4847_v54 = vmax.f32 %v3239_v27, 0.0  ;;  %v10068_v61 = vpop.f32.mrb[143].mxu1 }
 0x205   :  { %v4845_v36 = vmax.f32 %v3231_v6, 0.0  ;;  %v3234_v30 = vadd.f32 %v10026_v0, %v3233_v20  ;;  %v6053_v35 = vsel %vm5213_vm2, %v5091_v26, 0.0  ;;  %v5095_v59 = vmax.f32 %v4231_v51, 0.0  ;;  %7877 = vmatmul.mubr.msk.bf16.gmra.mrb[248].mxu1 %vm1847_vm0, %v8179_v21 }
 0x206   :  { %v5520_v60 = vadd.f32 %v5519_v4, %v5518_v48  ;;  %7621 = vmatmul.mubr.msk.bf16.gmra.mrb[252].mxu0 %vm1847_vm0, %v8161_v34  ;;  %v6051_v5 = vsel %vm5213_vm2, %v5090_v42, 0.0  ;;  %v4848_v7 = vmax.f32 %v3242_v1, 0.0  ;;  %v4223_v34 = vadd.f32 %v10026_v0, %v9954_v14  ;;  %v8165_v14 = vld [vmem:[%s11122_s0 + $0x408] sm:$0xff]  }
 0x207   :  { %v5521_v38 = vsel %vm5213_vm2, %v4845_v36, 0.0  ;;  %v4846_v62 = vmax.f32 %v3234_v30, 0.0  ;;  %7624 = vmatprep.mubr.msk.bf16.mxu0 %vm1847_vm0, %v8164_v32  ;;  %v6052_v27 = vadd.f32 %v6051_v5, %v6050_v24  ;;  %v4234_v48 = vadd.f32 %v10026_v0, %v9963_v37 }
 0x208   :  { %v5522_v6 = vadd.f32 %v5521_v38, %v5520_v60  ;;  %v4226_v32 = vadd.f32 %v10026_v0, %v9970_v23  ;;  %v4247_v17 = vadd.f32 %v10026_v0, %v9996_v44  ;;  %v5093_v4 = vmax.f32 %v4223_v34, 0.0  ;;  %v10090_v60 = vpop.f32.mrb[144].mxu1 }
 0x209   :  { %v5523_v26 = vsel %vm5213_vm2, %v4846_v62, 0.0  ;;  %v7518_v51 = vpop.f32.mrb[148].mxu0  ;;  %v6054_v21 = vadd.f32 %v6053_v35, %v6052_v27  ;;  %v5525_v36 = vsel %vm5213_vm2, %v4847_v54, 0.0  ;;  %v5096_v24 = vmax.f32 %v4234_v48, 0.0 }
 0x20a   :  { %v5524_v42 = vadd.f32 %v5523_v26, %v5522_v6  ;;  %v3255_v1 = vadd.f32 %v10026_v0, %v7518_v51  ;;  %v3246_v20 = vpop.f32.mrb[149].mxu0  ;;  %v5094_v23 = vmax.f32 %v4226_v32, 0.0  ;;  %v6061_v5 = vsel %vm5213_vm2, %v5095_v59, 0.0  ;;  %v10094_v26 = vpop.f32.mrb[145].mxu1 }
 0x20b   :  { %v3247_v37 = vadd.f32 %v10026_v0, %v3246_v20  ;;  %v7519_v30 = vpop.f32.mrb[150].mxu0  ;;  %v6056_v6 = vadd.f32 %v6055_v46, %v6054_v21  ;;  %v5527_v35 = vsel %vm5213_vm2, %v4848_v7, 0.0  ;;  %v6057_v34 = vsel %vm5213_vm2, %v5093_v4, 0.0  ;;  %v10099_v51 = vpop.f32.mrb[146].mxu1 }
 0x20c   :  { %v5526_v44 = vadd.f32 %v5525_v36, %v5524_v42  ;;  %v3258_v38 = vadd.f32 %v10026_v0, %v7519_v30  ;;  %v3249_v62 = vpop.f32.mrb[151].mxu0  ;;  %v4851_v48 = vmax.f32 %v3255_v1, 0.0  ;;  %v5099_v20 = vmax.f32 %v4247_v17, 0.0  ;;  %v10102_v36 = vpop.f32.mrb[147].mxu1 }
 0x20d   :  { %v4849_v27 = vmax.f32 %v3247_v37, 0.0  ;;  %v3250_v54 = vadd.f32 %v10026_v0, %v3249_v62  ;;  %v6058_v42 = vadd.f32 %v6057_v34, %v6056_v6  ;;  %v6063_v7 = vsel %vm5213_vm2, %v5096_v24, 0.0 }
 0x20e   :  { %v5528_v32 = vadd.f32 %v5527_v35, %v5526_v44  ;;  %7625 = vmatmul.mubr.msk.bf16.gmra.mrb[0].mxu0 %vm1847_vm0, %v8165_v14  ;;  %v6059_v21 = vsel %vm5213_vm2, %v5094_v23, 0.0  ;;  %v4852_v30 = vmax.f32 %v3258_v38, 0.0  ;;  %v4239_v1 = vadd.f32 %v10026_v0, %v10001_v19 }
 0x20f   :  { %v5529_v59 = vsel %vm5213_vm2, %v4849_v27, 0.0  ;;  %v4850_v46 = vmax.f32 %v3250_v54, 0.0  ;;  %v6060_v4 = vadd.f32 %v6059_v21, %v6058_v42  ;;  %v4250_v17 = vadd.f32 %v10026_v0, %v10009_v63 }
 0x210   :  { %v5530_v37 = vadd.f32 %v5529_v59, %v5528_v32  ;;  %v4242_v62 = vadd.f32 %v10026_v0, %v10017_v50  ;;  %v10116_v24 = vadd.f32 %v10026_v0, %v10046_v28  ;;  %v5097_v27 = vmax.f32 %v4239_v1, 0.0  ;;  %v10122_v42 = vpop.f32.mrb[148].mxu1 }
 0x211   :  { %v5531_v44 = vsel %vm5213_vm2, %v4850_v46, 0.0  ;;  %v7522_v14 = vpop.f32.mrb[152].mxu0  ;;  %v6062_v35 = vadd.f32 %v6061_v5, %v6060_v4  ;;  %v5533_v19 = vsel %vm5213_vm2, %v4851_v48, 0.0  ;;  %v6069_v63 = vsel %vm5213_vm2, %v5099_v20, 0.0 }
 0x212   :  { %v5532_v23 = vadd.f32 %v5531_v44, %v5530_v37  ;;  %v3271_v38 = vadd.f32 %v10026_v0, %v7522_v14  ;;  %v3262_v6 = vpop.f32.mrb[153].mxu0  ;;  %v5098_v32 = vmax.f32 %v4242_v62, 0.0  ;;  %v5100_v21 = vmax.f32 %v4250_v17, 0.0  ;;  %v10125_v37 = vpop.f32.mrb[149].mxu1 }
 0x213   :  { %v3263_v54 = vadd.f32 %v10026_v0, %v3262_v6  ;;  %v7523_v34 = vpop.f32.mrb[154].mxu0  ;;  %v6064_v46 = vadd.f32 %v6063_v7, %v6062_v35  ;;  %v5535_v5 = vsel %vm5213_vm2, %v4852_v30, 0.0  ;;  %v6065_v1 = vsel %vm5213_vm2, %v5097_v27, 0.0  ;;  %v10130_v44 = vpop.f32.mrb[150].mxu1  ;;  %v6320_v7 = vld [vmem:[%s11125_s3 + $0x10] sm:$0xff]  ;;  %v6321_v30 = vld [vmem:[%s11125_s3 + $0x18] sm:$0xff] }
 0x214   :  { %v5534_v50 = vadd.f32 %v5533_v19, %v5532_v23  ;;  %v3274_v28 = vadd.f32 %v10026_v0, %v7523_v34  ;;  %v3265_v59 = vpop.f32.mrb[155].mxu0  ;;  %v4855_v20 = vmax.f32 %v3271_v38, 0.0  ;;  %v5103_v23 = vmax.f32 %v10116_v24, 0.0  ;;  %v10139_v17 = vpop.f32.mrb[151].mxu1 }
 0x215   :  { %v4853_v4 = vmax.f32 %v3263_v54, 0.0  ;;  %v3266_v48 = vadd.f32 %v10026_v0, %v3265_v59  ;;  %v6066_v62 = vadd.f32 %v6065_v1, %v6064_v46  ;;  %v6067_v38 = vsel %vm5213_vm2, %v5098_v32, 0.0 }
 0x216   :  { %v5536_v14 = vadd.f32 %v5535_v5, %v5534_v50  ;;  %v4856_v35 = vmax.f32 %v3274_v28, 0.0  ;;  %v6071_v54 = vsel %vm5213_vm2, %v5100_v21, 0.0  ;;  %v4255_v34 = vadd.f32 %v10026_v0, %v10057_v39 }
 0x217   :  { %v5537_v6 = vsel %vm5213_vm2, %v4853_v4, 0.0  ;;  %v4854_v27 = vmax.f32 %v3266_v48, 0.0  ;;  %v6068_v24 = vadd.f32 %v6067_v38, %v6066_v62  ;;  %v4266_v46 = vadd.f32 %v10026_v0, %v10064_v33 }
 0x218   :  { %v5538_v19 = vadd.f32 %v5537_v6, %v5536_v14  ;;  %v4258_v5 = vadd.f32 %v10026_v0, %v10068_v61  ;;  %v7902_v28 = vpack.c.bf16 %v6321_v30, %v6320_v7  ;;  %v5101_v21 = vmax.f32 %v4255_v34, 0.0  ;;  %v10155_v33 = vpop.f32.mrb[152].mxu1 }
 0x219   :  { %v5539_v50 = vsel %vm5213_vm2, %v4854_v27, 0.0  ;;  %v7526_v59 = vpop.f32.mrb[156].mxu0  ;;  %v6070_v1 = vadd.f32 %v6069_v63, %v6068_v24  ;;  %v5541_v14 = vsel %vm5213_vm2, %v4855_v20, 0.0  ;;  %v5543_v39 = vsel %vm5213_vm2, %v4856_v35, 0.0  ;;  %v10158_v63 = vpop.f32.mrb[153].mxu1 }
 0x21a   :  { %v5540_v4 = vadd.f32 %v5539_v50, %v5538_v19  ;;  %v3287_v32 = vadd.f32 %v10026_v0, %v7526_v59  ;;  %v3278_v48 = vpop.f32.mrb[157].mxu0  ;;  %v5102_v27 = vmax.f32 %v4258_v5, 0.0  ;;  %7903 = vmatprep.subr.bf16.mxu1 %v7902_v28  ;;  %v5104_v19 = vmax.f32 %v4266_v46, 0.0  ;;  %v10164_v50 = vpop.f32.mrb[154].mxu1 }
 0x21b   :  { %v3279_v62 = vadd.f32 %v10026_v0, %v3278_v48  ;;  %v7527_v6 = vpop.f32.mrb[158].mxu0  ;;  %v6072_v30 = vadd.f32 %v6071_v54, %v6070_v1  ;;  %7905 = vmatpush3.bf16.msra.mxu1 %v7902_v28  ;;  %v6073_v35 = vsel %vm5213_vm2, %v5101_v21, 0.0  ;;  %v4279_v34 = vadd.f32 %v10026_v0, %v10090_v60  ;;  %v10167_v54 = vpop.f32.mrb[155].mxu1 }
 0x21c   :  { %v5542_v38 = vadd.f32 %v5541_v14, %v5540_v4  ;;  %v3290_v61 = vadd.f32 %v10026_v0, %v7527_v6  ;;  %v3281_v7 = vpop.f32.mrb[159].mxu0  ;;  %v4859_v59 = vmax.f32 %v3287_v32, 0.0  ;;  %v6077_v4 = vsel %vm5213_vm2, %v5103_v23, 0.0 }
 0x21d   :  { %v4857_v24 = vmax.f32 %v3279_v62, 0.0  ;;  %v3282_v20 = vadd.f32 %v10026_v0, %v3281_v7  ;;  %v6074_v48 = vadd.f32 %v6073_v35, %v6072_v30  ;;  %v6075_v14 = vsel %vm5213_vm2, %v5102_v27, 0.0 }
 0x21e   :  { %v5544_v5 = vadd.f32 %v5543_v39, %v5542_v38  ;;  %v4860_v28 = vmax.f32 %v3290_v61, 0.0  ;;  %v6079_v21 = vsel %vm5213_vm2, %v5104_v19, 0.0  ;;  %v4271_v60 = vadd.f32 %v10026_v0, %v10094_v26 }
 0x21f   :  { %v5545_v46 = vsel %vm5213_vm2, %v4857_v24, 0.0  ;;  %v4858_v1 = vmax.f32 %v3282_v20, 0.0  ;;  %v6076_v6 = vadd.f32 %v6075_v14, %v6074_v48  ;;  %v5107_v23 = vmax.f32 %v4279_v34, 0.0 }
 0x220   :  { %v5546_v62 = vadd.f32 %v5545_v46, %v5544_v5  ;;  %v4282_v38 = vadd.f32 %v10026_v0, %v10099_v51  ;;  %v4274_v61 = vadd.f32 %v10026_v0, %v10102_v36  ;;  %v5105_v19 = vmax.f32 %v4271_v60, 0.0  ;;  %v10183_v48 = vpop.f32.mrb[156].mxu1 }
 0x221   :  { %v5547_v32 = vsel %vm5213_vm2, %v4858_v1, 0.0  ;;  %v7530_v39 = vpop.f32.mrb[160].mxu0  ;;  %v6078_v24 = vadd.f32 %v6077_v4, %v6076_v6  ;;  %v5549_v20 = vsel %vm5213_vm2, %v4859_v59, 0.0  ;;  %v5551_v26 = vsel %vm5213_vm2, %v4860_v28, 0.0 }
 0x222   :  { %v5548_v7 = vadd.f32 %v5547_v32, %v5546_v62  ;;  %v3303_v27 = vadd.f32 %v10026_v0, %v7530_v39  ;;  %v3294_v30 = vpop.f32.mrb[161].mxu0  ;;  %v5106_v34 = vmax.f32 %v4274_v61, 0.0  ;;  %v5108_v14 = vmax.f32 %v4282_v38, 0.0  ;;  %v10186_v62 = vpop.f32.mrb[157].mxu1 }
 0x223   :  { %v3295_v35 = vadd.f32 %v10026_v0, %v3294_v30  ;;  %v7531_v5 = vpop.f32.mrb[162].mxu0  ;;  %v6080_v1 = vadd.f32 %v6079_v21, %v6078_v24  ;;  %v6081_v28 = vsel %vm5213_vm2, %v5105_v19, 0.0  ;;  %v10190_v60 = vpop.f32.mrb[158].mxu1  ;;  %v5348_v32 = vrot.slane %v10054_v15, 2 }
 0x224   :  { %v5550_v51 = vadd.f32 %v5549_v20, %v5548_v7  ;;  %v3306_v46 = vadd.f32 %v10026_v0, %v7531_v5  ;;  %v3297_v36 = vpop.f32.mrb[163].mxu0  ;;  %v4863_v4 = vmax.f32 %v3303_v27, 0.0  ;;  %v6085_v61 = vsel %vm5213_vm2, %v5107_v23, 0.0  ;;  %v10196_v30 = vpop.f32.mrb[159].mxu1 }
 0x225   :  { %v4861_v6 = vmax.f32 %v3295_v35, 0.0  ;;  %v3298_v59 = vadd.f32 %v10026_v0, %v3297_v36  ;;  %v6082_v7 = vadd.f32 %v6081_v28, %v6080_v1  ;;  %v6083_v27 = vsel %vm5213_vm2, %v5106_v34, 0.0 }
 0x226   :  { %v10193_v39 = vadd.f32 %v5551_v26, %v5550_v51  ;;  %v4864_v21 = vmax.f32 %v3306_v46, 0.0  ;;  %v4295_v24 = vadd.f32 %v10026_v0, %v10122_v42  ;;  %v5415_v19 = vrot.slane %v9496_v9, 4 }
 0x227   :  { %v4862_v38 = vmax.f32 %v3298_v59, 0.0  ;;  %v6087_v20 = vsel %vm5213_vm2, %v5108_v14, 0.0  ;;  %v6084_v35 = vadd.f32 %v6083_v27, %v6082_v7  ;;  %v4287_v26 = vadd.f32 %v10026_v0, %v10125_v37 }
 0x228   :  { %v5562_v23 = vsel %vm5213_vm2, %v4863_v4, 0.0  ;;  %v5559_v5 = vsel %vm5213_vm2, %v4861_v6, 0.0  ;;  %v4290_v34 = vadd.f32 %v10026_v0, %v10139_v17  ;;  %v4298_v14 = vadd.f32 %v10026_v0, %v10130_v44 }
 0x229   :  { %v5560_v51 = vsel %vm5213_vm2, %v4862_v38, 0.0  ;;  %v7534_v46 = vpop.f32.mrb[164].mxu0  ;;  %v6086_v59 = vadd.f32 %v6085_v61, %v6084_v35  ;;  %v5564_v37 = vsel %vm5213_vm2, %v4864_v21, 0.0  ;;  %v5111_v6 = vmax.f32 %v4295_v24, 0.0  ;;  %v10215_v38 = vpop.f32.mrb[160].mxu1 }
 0x22a   :  { %v5561_v36 = vadd.f32 %v5560_v51, %v5559_v5  ;;  %v3319_v42 = vadd.f32 %v10026_v0, %v7534_v46  ;;  %v3310_v1 = vpop.f32.mrb[165].mxu0  ;;  %v5109_v7 = vmax.f32 %v4287_v26, 0.0  ;;  %v5110_v51 = vmax.f32 %v4290_v34, 0.0  ;;  %v10218_v46 = vpop.f32.mrb[161].mxu1 }
 0x22b   :  { %v3311_v4 = vadd.f32 %v10026_v0, %v3310_v1  ;;  %v7535_v28 = vpop.f32.mrb[166].mxu0  ;;  %v6088_v35 = vadd.f32 %v6087_v20, %v6086_v59  ;;  %v10222_v1 = vpop.f32.mrb[162].mxu1  ;;  %v10225_v24 = vadd.f32 %v5348_v32, %v10054_v15  ;;  %v10228_v26 = vadd.f32 %v5415_v19, %v9496_v9 }
 0x22c   :  { %v5563_v27 = vadd.f32 %v5562_v23, %v5561_v36  ;;  %v4867_v49 = vmax.f32 %v3319_v42, 0.0  ;;  %v3322_v17 = vadd.f32 %v10026_v0, %v7535_v28  ;;  %v3313_v5 = vpop.f32.mrb[167].mxu0  ;;  %v6089_v21 = vsel %vm5213_vm2, %v5109_v7, 0.0  ;;  %v10230_v42 = vpop.f32.mrb[163].mxu1 }
 0x22d   :  { %v4865_v61 = vmax.f32 %v3311_v4, 0.0  ;;  %v3314_v44 = vadd.f32 %v10026_v0, %v3313_v5  ;;  %v5112_v36 = vmax.f32 %v4298_v14, 0.0  ;;  %v6093_v28 = vsel %vm5213_vm2, %v5111_v6, 0.0 }
 0x22e   :  { %v5565_v23 = vadd.f32 %v5564_v37, %v5563_v27  ;;  %v6090_v20 = vadd.f32 %v6089_v21, %v6088_v35  ;;  %v5570_v59 = vsel %vm5213_vm2, %v4867_v49, 0.0  ;;  %v4868_v5 = vmax.f32 %v3322_v17, 0.0 }
 0x22f   :  { %v5566_v34 = vsel %vm5213_vm2, %v4865_v61, 0.0  ;;  %v4866_v4 = vmax.f32 %v3314_v44, 0.0  ;;  %v6091_v15 = vsel %vm5213_vm2, %v5110_v51, 0.0  ;;  %v4311_v14 = vadd.f32 %v10026_v0, %v10155_v33 }
 0x230   :  { %v5567_v7 = vadd.f32 %v5566_v34, %v5565_v23  ;;  %v6092_v19 = vadd.f32 %v6091_v15, %v6090_v20  ;;  %v4303_v37 = vadd.f32 %v10026_v0, %v10158_v63  ;;  %v6095_v49 = vsel %vm5213_vm2, %v5112_v36, 0.0  ;;  %v10246_v34 = vpop.f32.mrb[164].mxu1 }
 0x231   :  { %v5568_v32 = vsel %vm5213_vm2, %v4866_v4, 0.0  ;;  %v7538_v9 = vpop.f32.mrb[168].mxu0  ;;  %v4314_v17 = vadd.f32 %v10026_v0, %v10164_v50  ;;  %v5115_v21 = vmax.f32 %v4311_v14, 0.0  ;;  %v5572_v63 = vsel %vm5213_vm2, %v4868_v5, 0.0  ;;  %v10250_v15 = vpop.f32.mrb[165].mxu1 }
 0x232   :  { %v5569_v27 = vadd.f32 %v5568_v32, %v5567_v7  ;;  %v3335_v6 = vadd.f32 %v10026_v0, %v7538_v9  ;;  %v3326_v61 = vpop.f32.mrb[169].mxu0  ;;  %v6094_v35 = vadd.f32 %v6093_v28, %v6092_v19  ;;  %v5113_v23 = vmax.f32 %v4303_v37, 0.0  ;;  %v10254_v28 = vpop.f32.mrb[166].mxu1 }
 0x233   :  { %v3327_v51 = vadd.f32 %v10026_v0, %v3326_v61  ;;  %v7539_v44 = vpop.f32.mrb[170].mxu0  ;;  %v5116_v61 = vmax.f32 %v4314_v17, 0.0  ;;  %v10258_v5 = vpop.f32.mrb[167].mxu1 }
 0x234   :  { %v5571_v4 = vadd.f32 %v5570_v59, %v5569_v27  ;;  %v4871_v20 = vmax.f32 %v3335_v6, 0.0  ;;  %v3329_v7 = vpop.f32.mrb[171].mxu0  ;;  %v3338_v50 = vadd.f32 %v10026_v0, %v7539_v44  ;;  %v6096_v9 = vadd.f32 %v6095_v49, %v6094_v35 }
 0x235   :  { %v4869_v36 = vmax.f32 %v3327_v51, 0.0  ;;  %v3330_v32 = vadd.f32 %v10026_v0, %v3329_v7  ;;  %v6097_v37 = vsel %vm5213_vm2, %v5113_v23, 0.0  ;;  %v6101_v6 = vsel %vm5213_vm2, %v5115_v21, 0.0 }
 0x236   :  { %v5573_v14 = vadd.f32 %v5572_v63, %v5571_v4  ;;  %v6098_v51 = vadd.f32 %v6097_v37, %v6096_v9  ;;  %v5578_v44 = vsel %vm5213_vm2, %v4871_v20, 0.0  ;;  %v4306_v49 = vadd.f32 %v10026_v0, %v10167_v54 }
 0x237   :  { %v5574_v59 = vsel %vm5213_vm2, %v4869_v36, 0.0  ;;  %v4870_v27 = vmax.f32 %v3330_v32, 0.0  ;;  %v4327_v35 = vadd.f32 %v10026_v0, %v10183_v48  ;;  %v4872_v63 = vmax.f32 %v3338_v50, 0.0 }
 0x238   :  { %v5575_v7 = vadd.f32 %v5574_v59, %v5573_v14  ;;  %v4319_v4 = vadd.f32 %v10026_v0, %v10186_v62  ;;  %v4322_v21 = vadd.f32 %v10026_v0, %v10196_v30  ;;  %v5114_v9 = vmax.f32 %v4306_v49, 0.0 }
 0x239   :  { %v5576_v17 = vsel %vm5213_vm2, %v4870_v27, 0.0  ;;  %v7542_v23 = vpop.f32.mrb[172].mxu0  ;;  %v4330_v54 = vadd.f32 %v10026_v0, %v10190_v60  ;;  %v6103_v14 = vsel %vm5213_vm2, %v5116_v61, 0.0  ;;  %v5119_v37 = vmax.f32 %v4327_v35, 0.0  ;;  %v10277_v27 = vpop.f32.mrb[168].mxu1 }
 0x23a   :  { %v5577_v36 = vadd.f32 %v5576_v17, %v5575_v7  ;;  %v3351_v20 = vadd.f32 %v10026_v0, %v7542_v23  ;;  %v3342_v32 = vpop.f32.mrb[173].mxu0  ;;  %v5117_v59 = vmax.f32 %v4319_v4, 0.0  ;;  %v6099_v17 = vsel %vm5213_vm2, %v5114_v9, 0.0  ;;  %v10281_v49 = vpop.f32.mrb[169].mxu1 }
 0x23b   :  { %v3343_v48 = vadd.f32 %v10026_v0, %v3342_v32  ;;  %v7543_v50 = vpop.f32.mrb[174].mxu0  ;;  %v5118_v23 = vmax.f32 %v4322_v21, 0.0  ;;  %v5580_v60 = vsel %vm5213_vm2, %v4872_v63, 0.0  ;;  %v6100_v19 = vadd.f32 %v6099_v17, %v6098_v51  ;;  %v10285_v61 = vpop.f32.mrb[170].mxu1 }
 0x23c   :  { %v5579_v62 = vadd.f32 %v5578_v44, %v5577_v36  ;;  %v3354_v30 = vadd.f32 %v10026_v0, %v7543_v50  ;;  %v3345_v7 = vpop.f32.mrb[175].mxu0  ;;  %v4875_v35 = vmax.f32 %v3351_v20, 0.0  ;;  %v6111_v44 = vsel %vm5213_vm2, %v5117_v59, 0.0  ;;  %v10288_v50 = vpop.f32.mrb[171].mxu1 }
 0x23d   :  { %v4873_v33 = vmax.f32 %v3343_v48, 0.0  ;;  %v3346_v32 = vadd.f32 %v10026_v0, %v3345_v7  ;;  %v5120_v36 = vmax.f32 %v4330_v54, 0.0  ;;  %v5484_v9 = vrot.slane %v9872_v31, 4 }
 0x23e   :  { %v5581_v4 = vadd.f32 %v5580_v60, %v5579_v62  ;;  %v6102_v58 = vadd.f32 %v6101_v6, %v6100_v19  ;;  %v4876_v48 = vmax.f32 %v3354_v30, 0.0  ;;  %v6114_v7 = vsel %vm5213_vm2, %v5119_v37, 0.0 }
 0x23f   :  { %v5582_v21 = vsel %vm5213_vm2, %v4873_v33, 0.0  ;;  %v4874_v2 = vmax.f32 %v3346_v32, 0.0  ;;  %v6112_v51 = vsel %vm5213_vm2, %v5118_v23, 0.0  ;;  %v4335_v59 = vadd.f32 %v10026_v0, %v10218_v46 }
 0x240   :  { %v5583_v63 = vadd.f32 %v5582_v21, %v5581_v4  ;;  %v10295_v17 = vadd.f32 %v6103_v14, %v6102_v58  ;;  %v6113_v54 = vadd.f32 %v6112_v51, %v6111_v44  ;;  %v5586_v60 = vsel %vm5213_vm2, %v4875_v35, 0.0  ;;  %v10305_v23 = vpop.f32.mrb[172].mxu1 }
 0x241   :  { %v5584_v20 = vsel %vm5213_vm2, %v4874_v2, 0.0  ;;  %v7546_v62 = vpop.f32.mrb[176].mxu0  ;;  %v6116_v19 = vsel %vm5213_vm2, %v5120_v36, 0.0  ;;  %v4343_v6 = vadd.f32 %v10026_v0, %v10215_v38  ;;  %v5121_v14 = vmax.f32 %v4335_v59, 0.0  ;;  %v10315_v21 = vpop.f32.mrb[173].mxu1 }
 0x242   :  { %11156 = vst [vmem:[#allocation23_spill] sm:$0xff] %v10295_v17  ;;  %v5585_v33 = vadd.f32 %v5584_v20, %v5583_v63  ;;  %v3358_v32 = vpop.f32.mrb[177].mxu0  ;;  %v3367_v37 = vadd.f32 %v10026_v0, %v7546_v62  ;;  %v6115_v58 = vadd.f32 %v6114_v7, %v6113_v54  ;;  %v11157_v46 = vrot.slane %v10228_v26, 2  ;;  %v10319_v62 = vpop.f32.mrb[174].mxu1 }
 0x243   :  { %v3359_v2 = vadd.f32 %v10026_v0, %v3358_v32  ;;  %v7547_v30 = vpop.f32.mrb[178].mxu0  ;;  %v5588_v4 = vsel %vm5213_vm2, %v4876_v48, 0.0  ;;  %v4346_v38 = vadd.f32 %v10026_v0, %v10222_v1  ;;  %v5123_v48 = vmax.f32 %v4343_v6, 0.0 }
 0x244   :  { %v10310_v35 = vadd.f32 %v11157_v46, %v10228_v26  ;;  %v5587_v44 = vadd.f32 %v5586_v60, %v5585_v33  ;;  %v3361_v36 = vpop.f32.mrb[179].mxu0  ;;  %v3370_v7 = vadd.f32 %v10026_v0, %v7547_v30  ;;  %v6117_v20 = vadd.f32 %v6116_v19, %v6115_v58  ;;  %v10325_v60 = vpop.f32.mrb[175].mxu1 }
 0x245   :  { %v4877_v63 = vmax.f32 %v3359_v2, 0.0  ;;  %v3362_v51 = vadd.f32 %v10026_v0, %v3361_v36  ;;  %v10322_v26 = vadd.f32 %v5484_v9, %v9872_v31  ;;  %v6118_v59 = vsel %vm5213_vm2, %v5121_v14, 0.0 }
 0x246   :  { %v5589_v54 = vadd.f32 %v5588_v4, %v5587_v44  ;;  %v4879_v1 = vmax.f32 %v3367_v37, 0.0  ;;  %v6119_v2 = vadd.f32 %v6118_v59, %v6117_v20  ;;  %v11158_v30 = vrot.slane %v10225_v24, 1 }
 0x247   :  { %v5590_v33 = vsel %vm5213_vm2, %v4877_v63, 0.0  ;;  %v4878_v32 = vmax.f32 %v3362_v51, 0.0  ;;  %v4338_v9 = vadd.f32 %v10026_v0, %v10230_v42  ;;  %v4880_v6 = vmax.f32 %v3370_v7, 0.0 }
 0x248   :  { %v10331_v19 = vadd.f32 %v11158_v30, %v10225_v24  ;;  %v5591_v31 = vadd.f32 %v5590_v33, %v5589_v54  ;;  %v5124_v37 = vmax.f32 %v4346_v38, 0.0  ;;  %v4351_v4 = vadd.f32 %v10026_v0, %v10250_v15  ;;  %v10346_v59 = vpop.f32.mrb[176].mxu1 }
 0x249   :  { %v5592_v14 = vsel %vm5213_vm2, %v4878_v32, 0.0  ;;  %v7550_v46 = vpop.f32.mrb[180].mxu0  ;;  %v5122_v24 = vmax.f32 %v4338_v9, 0.0  ;;  %v4359_v51 = vadd.f32 %v10026_v0, %v10246_v34  ;;  %v5594_v42 = vsel %vm5213_vm2, %v4879_v1, 0.0  ;;  %v10350_v9 = vpop.f32.mrb[177].mxu1 }
 0x24a   :  { %v5593_v44 = vadd.f32 %v5592_v14, %v5591_v31  ;;  %v3383_v36 = vadd.f32 %v10026_v0, %v7550_v46  ;;  %v3374_v63 = vpop.f32.mrb[181].mxu0  ;;  %v6122_v38 = vsel %vm5213_vm2, %v5123_v48, 0.0  ;;  %v5125_v31 = vmax.f32 %v4351_v4, 0.0 }
 0x24b   :  { %v3375_v7 = vadd.f32 %v10026_v0, %v3374_v63  ;;  %v7551_v54 = vpop.f32.mrb[182].mxu0  ;;  %v6120_v30 = vsel %vm5213_vm2, %v5122_v24, 0.0  ;;  %v5596_v34 = vsel %vm5213_vm2, %v4880_v6, 0.0  ;;  %v10354_v63 = vpop.f32.mrb[178].mxu1 }
 0x24c   :  { %v5595_v15 = vadd.f32 %v5594_v42, %v5593_v44  ;;  %v3386_v33 = vadd.f32 %v10026_v0, %v7551_v54  ;;  %v3377_v32 = vpop.f32.mrb[183].mxu0  ;;  %v6121_v46 = vadd.f32 %v6120_v30, %v6119_v2  ;;  %v4883_v48 = vmax.f32 %v3383_v36, 0.0  ;;  %v10357_v54 = vpop.f32.mrb[179].mxu1 }
 0x24d   :  { %v4881_v14 = vmax.f32 %v3375_v7, 0.0  ;;  %v3378_v1 = vadd.f32 %v10026_v0, %v3377_v32  ;;  %v6124_v44 = vsel %vm5213_vm2, %v5124_v37, 0.0  ;;  %v5127_v42 = vmax.f32 %v4359_v51, 0.0 }
 0x24e   :  { %v5597_v58 = vadd.f32 %v5596_v34, %v5595_v15  ;;  %v4884_v4 = vmax.f32 %v3386_v33, 0.0  ;;  %v6123_v17 = vadd.f32 %v6122_v38, %v6121_v46  ;;  %v6126_v6 = vsel %vm5213_vm2, %v5125_v31, 0.0 }
 0x24f   :  { %v5598_v24 = vsel %vm5213_vm2, %v4881_v14, 0.0  ;;  %v4882_v20 = vmax.f32 %v3378_v1, 0.0  ;;  %v4362_v2 = vadd.f32 %v10026_v0, %v10254_v28  ;;  %v4354_v36 = vadd.f32 %v10026_v0, %v10258_v5 }
 0x250   :  { %v5599_v25 = vadd.f32 %v5598_v24, %v5597_v58  ;;  %v6125_v51 = vadd.f32 %v6124_v44, %v6123_v17  ;;  %v4375_v15 = vadd.f32 %v10026_v0, %v10277_v27  ;;  %v4367_v33 = vadd.f32 %v10026_v0, %v10281_v49  ;;  %v10374_v14 = vpop.f32.mrb[180].mxu1 }
 0x251   :  { %v5600_v7 = vsel %vm5213_vm2, %v4882_v20, 0.0  ;;  %v7554_v37 = vpop.f32.mrb[184].mxu0  ;;  %v5128_v30 = vmax.f32 %v4362_v2, 0.0  ;;  %v5126_v31 = vmax.f32 %v4354_v36, 0.0  ;;  %v5602_v28 = vsel %vm5213_vm2, %v4883_v48, 0.0  ;;  %v10378_v44 = vpop.f32.mrb[181].mxu1 }
 0x252   :  { %v5601_v38 = vadd.f32 %v5600_v7, %v5599_v25  ;;  %v3399_v58 = vadd.f32 %v10026_v0, %v7554_v37  ;;  %v3390_v32 = vpop.f32.mrb[185].mxu0  ;;  %v6130_v20 = vsel %vm5213_vm2, %v5127_v42, 0.0  ;;  %v6127_v17 = vadd.f32 %v6126_v6, %v6125_v51  ;;  %v10382_v7 = vpop.f32.mrb[182].mxu1 }
 0x253   :  { %v3391_v5 = vadd.f32 %v10026_v0, %v3390_v32  ;;  %v7555_v34 = vpop.f32.mrb[186].mxu0  ;;  %v5604_v27 = vsel %vm5213_vm2, %v4884_v4, 0.0  ;;  %v5129_v46 = vmax.f32 %v4367_v33, 0.0  ;;  %v6128_v2 = vsel %vm5213_vm2, %v5126_v31, 0.0  ;;  %v10385_v51 = vpop.f32.mrb[183].mxu1 }
 0x254   :  { %v5603_v1 = vadd.f32 %v5602_v28, %v5601_v38  ;;  %v3402_v25 = vadd.f32 %v10026_v0, %v7555_v34  ;;  %v3393_v49 = vpop.f32.mrb[187].mxu0  ;;  %v5131_v36 = vmax.f32 %v4375_v15, 0.0  ;;  %v4887_v42 = vmax.f32 %v3399_v58, 0.0 }
 0x255   :  { %v4885_v24 = vmax.f32 %v3391_v5, 0.0  ;;  %v3394_v48 = vadd.f32 %v10026_v0, %v3393_v49  ;;  %v6132_v37 = vsel %vm5213_vm2, %v5128_v30, 0.0  ;;  %v6129_v4 = vadd.f32 %v6128_v2, %v6127_v17 }
 0x256   :  { %v5605_v6 = vadd.f32 %v5604_v27, %v5603_v1  ;;  %v4888_v33 = vmax.f32 %v3402_v25, 0.0  ;;  %v4378_v28 = vadd.f32 %v10026_v0, %v10285_v61  ;;  %v6134_v15 = vsel %vm5213_vm2, %v5129_v46, 0.0 }
 0x257   :  { %v5606_v38 = vsel %vm5213_vm2, %v4885_v24, 0.0  ;;  %v4886_v32 = vmax.f32 %v3394_v48, 0.0  ;;  %v6131_v34 = vadd.f32 %v6130_v20, %v6129_v4  ;;  %v4370_v58 = vadd.f32 %v10026_v0, %v10288_v50 }
 0x258   :  { %v5607_v5 = vadd.f32 %v5606_v38, %v5605_v6  ;;  %v5132_v17 = vmax.f32 %v4378_v28, 0.0  ;;  %v4391_v27 = vadd.f32 %v10026_v0, %v10305_v23  ;;  %v4383_v1 = vadd.f32 %v10026_v0, %v10315_v21  ;;  %v10403_v4 = vpop.f32.mrb[184].mxu1 }
 0x259   :  { %v5608_v31 = vsel %vm5213_vm2, %v4886_v32, 0.0  ;;  %v7558_v30 = vpop.f32.mrb[188].mxu0  ;;  %v6133_v20 = vadd.f32 %v6132_v37, %v6131_v34  ;;  %v5130_v24 = vmax.f32 %v4370_v58, 0.0  ;;  %v5610_v46 = vsel %vm5213_vm2, %v4887_v42, 0.0 }
 0x25a   :  { %v5609_v25 = vadd.f32 %v5608_v31, %v5607_v5  ;;  %v3415_v61 = vadd.f32 %v10026_v0, %v7558_v30  ;;  %v3406_v49 = vpop.f32.mrb[189].mxu0  ;;  %v5612_v50 = vsel %vm5213_vm2, %v4888_v33, 0.0  ;;  %v6138_v6 = vsel %vm5213_vm2, %v5131_v36, 0.0  ;;  %v10406_v5 = vpop.f32.mrb[185].mxu1 }
 0x25b   :  { %v3407_v48 = vadd.f32 %v10026_v0, %v3406_v49  ;;  %v7559_v2 = vpop.f32.mrb[190].mxu0  ;;  %v6135_v32 = vadd.f32 %v6134_v15, %v6133_v20  ;;  %v5135_v28 = vmax.f32 %v4391_v27, 0.0  ;;  %v6136_v33 = vsel %vm5213_vm2, %v5130_v24, 0.0  ;;  %v10410_v58 = vpop.f32.mrb[186].mxu1 }
 0x25c   :  { %v5611_v23 = vadd.f32 %v5610_v46, %v5609_v25  ;;  %v3418_v21 = vadd.f32 %v10026_v0, %v7559_v2  ;;  %v3409_v38 = vpop.f32.mrb[191].mxu0  ;;  %v5133_v34 = vmax.f32 %v4383_v1, 0.0  ;;  %v4891_v31 = vmax.f32 %v3415_v61, 0.0  ;;  %v10413_v49 = vpop.f32.mrb[187].mxu1 }
 0x25d   :  { %v4889_v37 = vmax.f32 %v3407_v48, 0.0  ;;  %v3410_v42 = vadd.f32 %v10026_v0, %v3409_v38  ;;  %v6140_v30 = vsel %vm5213_vm2, %v5132_v17, 0.0  ;;  %v6137_v25 = vadd.f32 %v6136_v33, %v6135_v32 }
 0x25e   :  { %v5613_v36 = vadd.f32 %v5612_v50, %v5611_v23  ;;  %v4892_v27 = vmax.f32 %v3418_v21, 0.0  ;;  %v4394_v46 = vadd.f32 %v10026_v0, %v10319_v62  ;;  %v11159_v24 = vrot.slane %v10322_v26, 2 }
 0x25f   :  { %v5614_v15 = vsel %vm5213_vm2, %v4889_v37, 0.0  ;;  %v4890_v20 = vmax.f32 %v3410_v42, 0.0  ;;  %v6139_v61 = vadd.f32 %v6138_v6, %v6137_v25  ;;  %v4386_v17 = vadd.f32 %v10026_v0, %v10325_v60 }
 0x260   :  { %v10421_v1 = vadd.f32 %v11159_v24, %v10322_v26  ;;  %v5615_v48 = vadd.f32 %v5614_v15, %v5613_v36  ;;  %v6146_v23 = vsel %vm5213_vm2, %v5135_v28, 0.0  ;;  %v6142_v21 = vsel %vm5213_vm2, %v5133_v34, 0.0  ;;  %v10434_v28 = vpop.f32.mrb[188].mxu1 }
 0x261   :  { %v5616_v50 = vsel %vm5213_vm2, %v4890_v20, 0.0  ;;  %v7562_v2 = vpop.f32.mrb[192].mxu0  ;;  %v4399_v62 = vadd.f32 %v10026_v0, %v10350_v9  ;;  %v6141_v37 = vadd.f32 %v6140_v30, %v6139_v61  ;;  %v5134_v42 = vmax.f32 %v4386_v17, 0.0  ;;  %v10439_v9 = vld [vmem:[%s11124_s2] ss:$0 sm:$0xff] }
 0x262   :  { %v5617_v38 = vadd.f32 %v5616_v50, %v5615_v48  ;;  %v3431_v32 = vadd.f32 %v10026_v0, %v7562_v2  ;;  %v3422_v26 = vpop.f32.mrb[193].mxu0  ;;  %v5618_v6 = vsel %vm5213_vm2, %v4891_v31, 0.0  ;;  %v5620_v60 = vsel %vm5213_vm2, %v4892_v27, 0.0  ;;  %v10444_v27 = vpop.f32.mrb[189].mxu1 }
 0x263   :  { %v3423_v33 = vadd.f32 %v10026_v0, %v3422_v26  ;;  %v7563_v36 = vpop.f32.mrb[194].mxu0  ;;  %v5136_v25 = vmax.f32 %v4394_v46, 0.0  ;;  %v6143_v20 = vadd.f32 %v6142_v21, %v6141_v37  ;;  %v4407_v31 = vadd.f32 %v10439_v9, %v10346_v59  ;;  %v10448_v61 = vpop.f32.mrb[190].mxu1 }
 0x264   :  { %v5619_v34 = vadd.f32 %v5618_v6, %v5617_v38  ;;  %v3434_v15 = vadd.f32 %v10439_v9, %v7563_v36  ;;  %v3425_v30 = vpop.f32.mrb[195].mxu0  ;;  %v4895_v0 = vmax.f32 %v3431_v32, 0.0  ;;  %v6144_v48 = vsel %vm5213_vm2, %v5134_v42, 0.0  ;;  %v10457_v59 = vpop.f32.mrb[191].mxu1 }
 0x265   :  { %v4893_v24 = vmax.f32 %v3423_v33, 0.0  ;;  %v3426_v46 = vadd.f32 %v10439_v9, %v3425_v30  ;;  %v11160_v17 = vrot.slane %v10310_v35, 1  ;;  %v6145_v21 = vadd.f32 %v6144_v48, %v6143_v20 }
 0x266   :  { %v10455_v2 = vadd.f32 %v5620_v60, %v5619_v34  ;;  %v5137_v38 = vmax.f32 %v4399_v62, 0.0  ;;  %v4896_v26 = vmax.f32 %v3434_v15, 0.0  ;;  %v6148_v37 = vsel %vm5213_vm2, %v5136_v25, 0.0 }
 0x267   :  { %v10453_v50 = vadd.f32 %v11160_v17, %v10310_v35  ;;  %v4894_v32 = vmax.f32 %v3426_v46, 0.0  ;;  %v4410_v42 = vadd.f32 %v10439_v9, %v10354_v63  ;;  %v5553_v33 = vrot.slane %v10193_v39, 4 }
 0x268   :  { %v6147_v36 = vadd.f32 %v6146_v23, %v6145_v21  ;;  %v4402_v35 = vadd.f32 %v10439_v9, %v10357_v54  ;;  %v5631_v60 = vsel %vm5213_vm2, %v4895_v0, 0.0  ;;  %v5628_v62 = vsel %vm5213_vm2, %v4893_v24, 0.0  ;;  %v10473_v6 = vpop.f32.mrb[192].mxu1 }
 0x269   :  { %v5629_v34 = vsel %vm5213_vm2, %v4894_v32, 0.0  ;;  %v7566_v15 = vpop.f32.mrb[196].mxu0  ;;  %v5139_v30 = vmax.f32 %v4407_v31, 0.0  ;;  %v6150_v48 = vsel %vm5213_vm2, %v5137_v38, 0.0  ;;  %v5633_v23 = vsel %vm5213_vm2, %v4896_v26, 0.0  ;;  %v10480_v38 = vpop.f32.mrb[193].mxu1 }
 0x26a   :  { %v5630_v25 = vadd.f32 %v5629_v34, %v5628_v62  ;;  %v3447_v20 = vadd.f32 %v10439_v9, %v7566_v15  ;;  %v3438_v63 = vpop.f32.mrb[197].mxu0  ;;  %v6149_v46 = vadd.f32 %v6148_v37, %v6147_v36  ;;  %v5140_v21 = vmax.f32 %v4410_v42, 0.0 }
 0x26b   :  { %v3439_v17 = vadd.f32 %v10439_v9, %v3438_v63  ;;  %v7567_v54 = vpop.f32.mrb[198].mxu0  ;;  %v5138_v0 = vmax.f32 %v4402_v35, 0.0  ;;  %v4423_v62 = vadd.f32 %v10439_v9, %v10374_v14  ;;  %v4415_v37 = vadd.f32 %v10439_v9, %v10378_v44  ;;  %v10484_v35 = vpop.f32.mrb[194].mxu1 }
 0x26c   :  { %v5632_v24 = vadd.f32 %v5631_v60, %v5630_v25  ;;  %v3450_v32 = vadd.f32 %v10439_v9, %v7567_v54  ;;  %v3441_v31 = vpop.f32.mrb[199].mxu0  ;;  %v6151_v34 = vadd.f32 %v6150_v48, %v6149_v46  ;;  %v5554_v60 = vadd.f32 %v5553_v33, %v10193_v39  ;;  %v10488_v14 = vpop.f32.mrb[195].mxu1 }
 0x26d   :  { %v4897_v26 = vmax.f32 %v3439_v17, 0.0  ;;  %v3442_v36 = vadd.f32 %v10439_v9, %v3441_v31  ;;  %v6152_v42 = vsel %vm5213_vm2, %v5138_v0, 0.0  ;;  %v4899_v15 = vmax.f32 %v3447_v20, 0.0 }
 0x26e   :  { %v5634_v25 = vadd.f32 %v5633_v23, %v5632_v24  ;;  %v6154_v63 = vsel %vm5213_vm2, %v5139_v30, 0.0  ;;  %v6156_v17 = vsel %vm5213_vm2, %v5140_v21, 0.0  ;;  %v6153_v10 = vadd.f32 %v6152_v42, %v6151_v34 }
 0x26f   :  { %v5635_v44 = vsel %vm5213_vm2, %v4897_v26, 0.0  ;;  %v4898_v54 = vmax.f32 %v3442_v36, 0.0  ;;  %v4900_v46 = vmax.f32 %v3450_v32, 0.0  ;;  %v5143_v48 = vmax.f32 %v4423_v62, 0.0 }
 0x270   :  { %v5636_v31 = vadd.f32 %v5635_v44, %v5634_v25  ;;  %v5141_v0 = vmax.f32 %v4415_v37, 0.0  ;;  %v6155_v39 = vadd.f32 %v6154_v63, %v6153_v10  ;;  %v4426_v33 = vadd.f32 %v10439_v9, %v10382_v7  ;;  %v10501_v34 = vpop.f32.mrb[196].mxu1 }
 0x271   :  { %v5637_v29 = vsel %vm5213_vm2, %v4898_v54, 0.0  ;;  %v7570_v16 = vpop.f32.mrb[200].mxu0  ;;  %v4418_v30 = vadd.f32 %v10439_v9, %v10385_v51  ;;  %v5639_v20 = vsel %vm5213_vm2, %v4899_v15, 0.0  ;;  %v5555_v7 = vrot.slane %v5554_v60, 2  ;;  %v10505_v15 = vpop.f32.mrb[197].mxu1 }
 0x272   :  { %v5638_v23 = vadd.f32 %v5637_v29, %v5636_v31  ;;  %v3463_v21 = vadd.f32 %v10439_v9, %v7570_v16  ;;  %v3454_v24 = vpop.f32.mrb[201].mxu0  ;;  %v6158_v32 = vsel %vm5213_vm2, %v5141_v0, 0.0  ;;  %v6157_v26 = vadd.f32 %v6156_v17, %v6155_v39  ;;  %v10509_v17 = vpop.f32.mrb[198].mxu1 }
 0x273   :  { %v3455_v62 = vadd.f32 %v10439_v9, %v3454_v24  ;;  %v7571_v37 = vpop.f32.mrb[202].mxu0  ;;  %v5144_v36 = vmax.f32 %v4426_v33, 0.0  ;;  %v5142_v10 = vmax.f32 %v4418_v30, 0.0  ;;  %v6162_v29 = vsel %vm5213_vm2, %v5143_v48, 0.0  ;;  %v10514_v30 = vpop.f32.mrb[199].mxu1 }
 0x274   :  { %v5640_v42 = vadd.f32 %v5639_v20, %v5638_v23  ;;  %v3466_v51 = vadd.f32 %v10439_v9, %v7571_v37  ;;  %v3457_v25 = vpop.f32.mrb[203].mxu0  ;;  %v5641_v16 = vsel %vm5213_vm2, %v4900_v46, 0.0  ;;  %v6159_v54 = vadd.f32 %v6158_v32, %v6157_v26 }
 0x275   :  { %v4901_v63 = vmax.f32 %v3455_v62, 0.0  ;;  %v3458_v44 = vadd.f32 %v10439_v9, %v3457_v25  ;;  %v4903_v31 = vmax.f32 %v3463_v21, 0.0  ;;  %v6160_v39 = vsel %vm5213_vm2, %v5142_v10, 0.0 }
 0x276   :  { %v5642_v0 = vadd.f32 %v5641_v16, %v5640_v42  ;;  %v4439_v33 = vadd.f32 %v10439_v9, %v10403_v4  ;;  %v6164_v46 = vsel %vm5213_vm2, %v5144_v36, 0.0  ;;  %v6161_v23 = vadd.f32 %v6160_v39, %v6159_v54 }
 0x277   :  { %v5643_v48 = vsel %vm5213_vm2, %v4901_v63, 0.0  ;;  %v4902_v20 = vmax.f32 %v3458_v44, 0.0  ;;  %v4904_v62 = vmax.f32 %v3466_v51, 0.0  ;;  %v4431_v32 = vadd.f32 %v10439_v9, %v10406_v5 }
 0x278   :  { %v5644_v24 = vadd.f32 %v5643_v48, %v5642_v0  ;;  %v4442_v21 = vadd.f32 %v10439_v9, %v10410_v58  ;;  %v10522_v37 = vadd.f32 %v5555_v7, %v5554_v60  ;;  %v6163_v10 = vadd.f32 %v6162_v29, %v6161_v23  ;;  %v10530_v54 = vpop.f32.mrb[200].mxu1 }
 0x279   :  { %v5645_v4 = vsel %vm5213_vm2, %v4902_v20, 0.0  ;;  %v7574_v26 = vpop.f32.mrb[204].mxu0  ;;  %v4434_v42 = vadd.f32 %v10439_v9, %v10413_v49  ;;  %v5647_v36 = vsel %vm5213_vm2, %v4903_v31, 0.0  ;;  %v5147_v51 = vmax.f32 %v4439_v33, 0.0  ;;  %v10534_v48 = vpop.f32.mrb[201].mxu1 }
 0x27a   :  { %v5646_v25 = vadd.f32 %v5645_v4, %v5644_v24  ;;  %v3470_v16 = vpop.f32.mrb[205].mxu0  ;;  %v5145_v63 = vmax.f32 %v4431_v32, 0.0  ;;  %v3479_v5 = vadd.f32 %v10439_v9, %v7574_v26  ;;  %v6165_v60 = vadd.f32 %v6164_v46, %v6163_v10  ;;  %v10538_v32 = vpop.f32.mrb[202].mxu1 }
 0x27b   :  { %v3471_v44 = vadd.f32 %v10439_v9, %v3470_v16  ;;  %v7575_v58 = vpop.f32.mrb[206].mxu0  ;;  %v5146_v7 = vmax.f32 %v4434_v42, 0.0  ;;  %v5649_v29 = vsel %vm5213_vm2, %v4904_v62, 0.0  ;;  %v5148_v31 = vmax.f32 %v4442_v21, 0.0  ;;  %v10544_v10 = vpop.f32.mrb[203].mxu1 }
 0x27c   :  { %v5648_v0 = vadd.f32 %v5647_v36, %v5646_v25  ;;  %v3473_v39 = vpop.f32.mrb[207].mxu0  ;;  %v6166_v49 = vsel %vm5213_vm2, %v5145_v63, 0.0  ;;  %v3482_v20 = vadd.f32 %v10439_v9, %v7575_v58  ;;  %v6170_v4 = vsel %vm5213_vm2, %v5147_v51, 0.0 }
 0x27d   :  { %v4905_v33 = vmax.f32 %v3471_v44, 0.0  ;;  %v3474_v23 = vadd.f32 %v10439_v9, %v3473_v39  ;;  %v6167_v24 = vadd.f32 %v6166_v49, %v6165_v60  ;;  %v6168_v62 = vsel %vm5213_vm2, %v5146_v7, 0.0 }
 0x27e   :  { %v5650_v46 = vadd.f32 %v5649_v29, %v5648_v0  ;;  %v4455_v26 = vadd.f32 %v10439_v9, %v10434_v28  ;;  %v4907_v21 = vmax.f32 %v3479_v5, 0.0  ;;  %v6172_v63 = vsel %vm5213_vm2, %v5148_v31, 0.0 }
 0x27f   :  { %v5651_v42 = vsel %vm5213_vm2, %v4905_v33, 0.0  ;;  %v4906_v36 = vmax.f32 %v3474_v23, 0.0  ;;  %v6169_v25 = vadd.f32 %v6168_v62, %v6167_v24  ;;  %v4447_v44 = vadd.f32 %v10439_v9, %v10444_v27 }
 0x280   :  { %v5652_v16 = vadd.f32 %v5651_v42, %v5650_v46  ;;  %v4458_v51 = vadd.f32 %v10439_v9, %v10448_v61  ;;  %v4908_v58 = vmax.f32 %v3482_v20, 0.0  ;;  %v4450_v5 = vadd.f32 %v10439_v9, %v10457_v59  ;;  %v10560_v24 = vpop.f32.mrb[204].mxu1 }
 0x281   :  { %v5653_v60 = vsel %vm5213_vm2, %v4906_v36, 0.0  ;;  %v7578_v28 = vpop.f32.mrb[208].mxu0  ;;  %v6171_v7 = vadd.f32 %v6170_v4, %v6169_v25  ;;  %v5151_v49 = vmax.f32 %v4455_v26, 0.0  ;;  %v5149_v31 = vmax.f32 %v4447_v44, 0.0  ;;  %v10565_v26 = vpop.f32.mrb[205].mxu1 }
 0x282   :  { %v5654_v29 = vadd.f32 %v5653_v60, %v5652_v16  ;;  %v3495_v0 = vadd.f32 %v10439_v9, %v7578_v28  ;;  %v3486_v39 = vpop.f32.mrb[209].mxu0  ;;  %v5655_v33 = vsel %vm5213_vm2, %v4907_v21, 0.0  ;;  %v5150_v20 = vmax.f32 %v4450_v5, 0.0 }
 0x283   :  { %v3487_v27 = vadd.f32 %v10439_v9, %v3486_v39  ;;  %v7579_v23 = vpop.f32.mrb[210].mxu0  ;;  %v10558_v61 = vadd.f32 %v6172_v63, %v6171_v7  ;;  %v6180_v59 = vsel %vm5213_vm2, %v5149_v31, 0.0  ;;  %v5152_v62 = vmax.f32 %v4458_v51, 0.0  ;;  %v10570_v63 = vpop.f32.mrb[206].mxu1 }
 0x284   :  { %v5656_v46 = vadd.f32 %v5655_v33, %v5654_v29  ;;  %v3489_v4 = vpop.f32.mrb[211].mxu0  ;;  %v4471_v42 = vadd.f32 %v10439_v9, %v10473_v6  ;;  %v5657_v21 = vsel %vm5213_vm2, %v4908_v58, 0.0  ;;  %v3498_v25 = vadd.f32 %v10439_v9, %v7579_v23  ;;  %v10574_v7 = vpop.f32.mrb[207].mxu1 }
 0x285   :  { %11161 = vst [vmem:[#allocation24_spill] sm:$0xff] %v10558_v61  ;;  %v4909_v36 = vmax.f32 %v3487_v27, 0.0  ;;  %v3490_v16 = vadd.f32 %v10439_v9, %v3489_v4  ;;  %v4911_v44 = vmax.f32 %v3495_v0, 0.0  ;;  %v6183_v28 = vsel %vm5213_vm2, %v5151_v49, 0.0 }
 0x286   :  { %v5658_v60 = vadd.f32 %v5657_v21, %v5656_v46  ;;  %v6181_v51 = vsel %vm5213_vm2, %v5150_v20, 0.0  ;;  %v6185_v31 = vsel %vm5213_vm2, %v5152_v62, 0.0  ;;  %v5155_v33 = vmax.f32 %v4471_v42, 0.0 }
 0x287   :  { %v5659_v5 = vsel %vm5213_vm2, %v4909_v36, 0.0  ;;  %v4910_v58 = vmax.f32 %v3490_v16, 0.0  ;;  %v6182_v29 = vadd.f32 %v6181_v51, %v6180_v59  ;;  %v4463_v0 = vadd.f32 %v10439_v9, %v10480_v38 }
 0x288   :  { %v5660_v39 = vadd.f32 %v5659_v5, %v5658_v60  ;;  %v4912_v27 = vmax.f32 %v3498_v25, 0.0  ;;  %v4474_v46 = vadd.f32 %v10439_v9, %v10484_v35  ;;  %v5663_v4 = vsel %vm5213_vm2, %v4911_v44, 0.0  ;;  %v10589_v51 = vpop.f32.mrb[208].mxu1 }
 0x289   :  { %v5661_v49 = vsel %vm5213_vm2, %v4910_v58, 0.0  ;;  %v7582_v23 = vpop.f32.mrb[212].mxu0  ;;  %v6184_v20 = vadd.f32 %v6183_v28, %v6182_v29  ;;  %v5153_v16 = vmax.f32 %v4463_v0, 0.0  ;;  %v4466_v25 = vadd.f32 %v10439_v9, %v10488_v14  ;;  %v10593_v29 = vpop.f32.mrb[209].mxu1 }
 0x28a   :  { %v5662_v21 = vadd.f32 %v5661_v49, %v5660_v39  ;;  %v3511_v59 = vadd.f32 %v10439_v9, %v7582_v23  ;;  %v3502_v36 = vpop.f32.mrb[213].mxu0  ;;  %v5156_v38 = vmax.f32 %v4474_v46, 0.0  ;;  %v5665_v39 = vsel %vm5213_vm2, %v4912_v27, 0.0  ;;  %v10597_v23 = vpop.f32.mrb[210].mxu1 }
 0x28b   :  { %v3503_v62 = vadd.f32 %v10439_v9, %v3502_v36  ;;  %v7583_v42 = vpop.f32.mrb[214].mxu0  ;;  %v6186_v60 = vadd.f32 %v6185_v31, %v6184_v20  ;;  %v6187_v58 = vsel %vm5213_vm2, %v5153_v16, 0.0  ;;  %v5154_v27 = vmax.f32 %v4466_v25, 0.0 }
 0x28c   :  { %v5664_v28 = vadd.f32 %v5663_v4, %v5662_v21  ;;  %v4915_v5 = vmax.f32 %v3511_v59, 0.0  ;;  %v3514_v35 = vadd.f32 %v10439_v9, %v7583_v42  ;;  %v3505_v44 = vpop.f32.mrb[215].mxu0  ;;  %v6191_v4 = vsel %vm5213_vm2, %v5155_v33, 0.0  ;;  %v10602_v21 = vpop.f32.mrb[211].mxu1 }
 0x28d   :  { %v4913_v0 = vmax.f32 %v3503_v62, 0.0  ;;  %v3506_v31 = vadd.f32 %v10439_v9, %v3505_v44  ;;  %v6188_v49 = vadd.f32 %v6187_v58, %v6186_v60  ;;  %v6193_v42 = vsel %vm5213_vm2, %v5156_v38, 0.0 }
 0x28e   :  { %v5671_v20 = vsel %vm5213_vm2, %v4915_v5, 0.0  ;;  %v5666_v46 = vadd.f32 %v5665_v39, %v5664_v28  ;;  %v4916_v36 = vmax.f32 %v3514_v35, 0.0  ;;  %v4487_v60 = vadd.f32 %v10439_v9, %v10501_v34 }
 0x28f   :  { %v5667_v59 = vsel %vm5213_vm2, %v4913_v0, 0.0  ;;  %v4914_v16 = vmax.f32 %v3506_v31, 0.0  ;;  %v4479_v44 = vadd.f32 %v10439_v9, %v10505_v15  ;;  %v6189_v33 = vsel %vm5213_vm2, %v5154_v27, 0.0 }
 0x290   :  { %v5668_v62 = vadd.f32 %v5667_v59, %v5666_v46  ;;  %v4490_v58 = vadd.f32 %v10439_v9, %v10509_v17  ;;  %v4482_v25 = vadd.f32 %v10439_v9, %v10514_v30  ;;  %v6190_v0 = vadd.f32 %v6189_v33, %v6188_v49  ;;  %v10618_v6 = vpop.f32.mrb[212].mxu1 }
 0x291   :  { %v5669_v28 = vsel %vm5213_vm2, %v4914_v16, 0.0  ;;  %v7586_v5 = vpop.f32.mrb[216].mxu0  ;;  %v5159_v34 = vmax.f32 %v4487_v60, 0.0  ;;  %v5157_v46 = vmax.f32 %v4479_v44, 0.0 }
 0x292   :  { %v5670_v35 = vadd.f32 %v5669_v28, %v5668_v62  ;;  %v3527_v38 = vadd.f32 %v10439_v9, %v7586_v5  ;;  %v3518_v39 = vpop.f32.mrb[217].mxu0  ;;  %v5160_v59 = vmax.f32 %v4490_v58, 0.0  ;;  %v5158_v16 = vmax.f32 %v4482_v25, 0.0  ;;  %v10621_v62 = vpop.f32.mrb[213].mxu1 }
 0x293   :  { %v3519_v31 = vadd.f32 %v10439_v9, %v3518_v39  ;;  %v7587_v15 = vpop.f32.mrb[218].mxu0  ;;  %v6192_v30 = vadd.f32 %v6191_v4, %v6190_v0  ;;  %v5673_v28 = vsel %vm5213_vm2, %v4916_v36, 0.0  ;;  %v6195_v5 = vsel %vm5213_vm2, %v5157_v46, 0.0  ;;  %v10626_v44 = vpop.f32.mrb[214].mxu1 }
 0x294   :  { %v5672_v27 = vadd.f32 %v5671_v20, %v5670_v35  ;;  %v4919_v14 = vmax.f32 %v3527_v38, 0.0  ;;  %v3530_v17 = vadd.f32 %v10439_v9, %v7587_v15  ;;  %v3521_v61 = vpop.f32.mrb[219].mxu0  ;;  %v6199_v20 = vsel %vm5213_vm2, %v5159_v34, 0.0  ;;  %v10629_v35 = vpop.f32.mrb[215].mxu1 }
 0x295   :  { %v4917_v49 = vmax.f32 %v3519_v31, 0.0  ;;  %v3522_v60 = vadd.f32 %v10439_v9, %v3521_v61  ;;  %v6194_v25 = vadd.f32 %v6193_v42, %v6192_v30  ;;  %v6197_v36 = vsel %vm5213_vm2, %v5158_v16, 0.0 }
 0x296   :  { %v5674_v33 = vadd.f32 %v5673_v28, %v5672_v27  ;;  %v4920_v58 = vmax.f32 %v3530_v17, 0.0  ;;  %v5679_v4 = vsel %vm5213_vm2, %v4919_v14, 0.0  ;;  %v6201_v31 = vsel %vm5213_vm2, %v5160_v59, 0.0 }
 0x297   :  { %v5675_v38 = vsel %vm5213_vm2, %v4917_v49, 0.0  ;;  %v4918_v39 = vmax.f32 %v3522_v60, 0.0  ;;  %v6196_v61 = vadd.f32 %v6195_v5, %v6194_v25  ;;  %v4503_v15 = vadd.f32 %v10439_v9, %v10530_v54 }
 0x298   :  { %v5676_v0 = vadd.f32 %v5675_v38, %v5674_v33  ;;  %v4495_v42 = vadd.f32 %v10439_v9, %v10534_v48  ;;  %v4506_v14 = vadd.f32 %v10439_v9, %v10538_v32  ;;  %v4498_v27 = vadd.f32 %v10439_v9, %v10544_v10  ;;  %v10647_v48 = vpop.f32.mrb[216].mxu1 }
 0x299   :  { %v5677_v46 = vsel %vm5213_vm2, %v4918_v39, 0.0  ;;  %v7590_v34 = vpop.f32.mrb[220].mxu0  ;;  %v5681_v16 = vsel %vm5213_vm2, %v4920_v58, 0.0  ;;  %v6198_v28 = vadd.f32 %v6197_v36, %v6196_v61  ;;  %v5163_v60 = vmax.f32 %v4503_v15, 0.0  ;;  %v10650_v58 = vpop.f32.mrb[217].mxu1 }
 0x29a   :  { %v5678_v17 = vadd.f32 %v5677_v46, %v5676_v0  ;;  %v3543_v59 = vadd.f32 %v10439_v9, %v7590_v34  ;;  %v3534_v30 = vpop.f32.mrb[221].mxu0  ;;  %v5161_v5 = vmax.f32 %v4495_v42, 0.0  ;;  %v5162_v33 = vmax.f32 %v4498_v27, 0.0  ;;  %v10654_v34 = vpop.f32.mrb[218].mxu1 }
 0x29b   :  { %v3535_v54 = vadd.f32 %v10439_v9, %v3534_v30  ;;  %v7591_v49 = vpop.f32.mrb[222].mxu0  ;;  %v6200_v39 = vadd.f32 %v6199_v20, %v6198_v28  ;;  %v5164_v61 = vmax.f32 %v4506_v14, 0.0  ;;  %v11162_v15 = vrot.slane %v10455_v2, 4 }
 0x29c   :  { %v5680_v25 = vadd.f32 %v5679_v4, %v5678_v17  ;;  %v4923_v32 = vmax.f32 %v3543_v59, 0.0  ;;  %v3546_v38 = vadd.f32 %v10439_v9, %v7591_v49  ;;  %v3537_v10 = vpop.f32.mrb[223].mxu0  ;;  %v6203_v36 = vsel %vm5213_vm2, %v5161_v5, 0.0  ;;  %v10661_v59 = vpop.f32.mrb[219].mxu1 }
 0x29d   :  { %v4921_v0 = vmax.f32 %v3535_v54, 0.0  ;;  %v3538_v46 = vadd.f32 %v10439_v9, %v3537_v10  ;;  %v10659_v42 = vadd.f32 %v11162_v15, %v10455_v2  ;;  %v6202_v17 = vadd.f32 %v6201_v31, %v6200_v39 }
 0x29e   :  { %v5682_v4 = vadd.f32 %v5681_v16, %v5680_v25  ;;  %v4924_v27 = vmax.f32 %v3546_v38, 0.0  ;;  %v6207_v28 = vsel %vm5213_vm2, %v5163_v60, 0.0  ;;  %v6205_v54 = vsel %vm5213_vm2, %v5162_v33, 0.0 }
 0x29f   :  { %v5683_v20 = vsel %vm5213_vm2, %v4921_v0, 0.0  ;;  %v4922_v30 = vmax.f32 %v3538_v46, 0.0  ;;  %v5687_v14 = vsel %vm5213_vm2, %v4923_v32, 0.0  ;;  %v6204_v5 = vadd.f32 %v6203_v36, %v6202_v17 }
 0x2a0   :  { %v5684_v49 = vadd.f32 %v5683_v20, %v5682_v4  ;;  %v4519_v2 = vadd.f32 %v10439_v9, %v10560_v24  ;;  %v6209_v31 = vsel %vm5213_vm2, %v5164_v61, 0.0  ;;  %v4511_v38 = vadd.f32 %v10439_v9, %v10565_v26  ;;  %v10680_v4 = vpop.f32.mrb[220].mxu1 }
 0x2a1   :  { %v5685_v16 = vsel %vm5213_vm2, %v4922_v30, 0.0  ;;  %v7594_v25 = vpop.f32.mrb[224].mxu0  ;;  %v4514_v60 = vadd.f32 %v10439_v9, %v10574_v7  ;;  %v5689_v33 = vsel %vm5213_vm2, %v4924_v27, 0.0  ;;  %v6206_v0 = vadd.f32 %v6205_v54, %v6204_v5  ;;  %v10682_v30 = vpop.f32.mrb[221].mxu1 }
 0x2a2   :  { %v5686_v10 = vadd.f32 %v5685_v16, %v5684_v49  ;;  %v3559_v32 = vadd.f32 %v10439_v9, %v7594_v25  ;;  %v3550_v39 = vpop.f32.mrb[225].mxu0  ;;  %v5165_v36 = vmax.f32 %v4511_v38, 0.0  ;;  %v4522_v61 = vadd.f32 %v10439_v9, %v10570_v63  ;;  %v10687_v25 = vpop.f32.mrb[222].mxu1 }
 0x2a3   :  { %v3551_v24 = vadd.f32 %v10439_v9, %v3550_v39  ;;  %v7595_v46 = vpop.f32.mrb[226].mxu0  ;;  %v5166_v15 = vmax.f32 %v4514_v60, 0.0  ;;  %v6208_v20 = vadd.f32 %v6207_v28, %v6206_v0  ;;  %v5167_v27 = vmax.f32 %v4519_v2, 0.0 }
 0x2a4   :  { %v5688_v26 = vadd.f32 %v5687_v14, %v5686_v10  ;;  %v4927_v17 = vmax.f32 %v3559_v32, 0.0  ;;  %v3553_v7 = vpop.f32.mrb[227].mxu0  ;;  %v3562_v54 = vadd.f32 %v10439_v9, %v7595_v46  ;;  %v6211_v16 = vsel %vm5213_vm2, %v5165_v36, 0.0  ;;  %v10699_v10 = vpop.f32.mrb[223].mxu1 }
 0x2a5   :  { %v4925_v49 = vmax.f32 %v3551_v24, 0.0  ;;  %v3554_v5 = vadd.f32 %v10439_v9, %v3553_v7  ;;  %v11163_v63 = vrot.slane %v10421_v1, 1  ;;  %v11164_v28 = vrot.slane %v10522_v37, 1 }
 0x2a6   :  { %v5690_v2 = vadd.f32 %v5689_v33, %v5688_v26  ;;  %v6210_v60 = vadd.f32 %v6209_v31, %v6208_v20  ;;  %v5168_v0 = vmax.f32 %v4522_v61, 0.0  ;;  %v6213_v24 = vsel %vm5213_vm2, %v5166_v15, 0.0 }
 0x2a7   :  { %v10692_v38 = vadd.f32 %v11163_v63, %v10421_v1  ;;  %v10697_v14 = vadd.f32 %v11164_v28, %v10522_v37  ;;  %v4926_v39 = vmax.f32 %v3554_v5, 0.0  ;;  %v5700_v46 = vsel %vm5213_vm2, %v4927_v17, 0.0 }
 0x2a8   :  { %v6215_v1 = vsel %vm5213_vm2, %v5167_v27, 0.0  ;;  %v6212_v36 = vadd.f32 %v6211_v16, %v6210_v60  ;;  %v4535_v7 = vadd.f32 %v10439_v9, %v10589_v51  ;;  %v5697_v37 = vsel %vm5213_vm2, %v4925_v49, 0.0 }
 0x2a9   :  { %v4928_v33 = vmax.f32 %v3562_v54, 0.0  ;;  %v5698_v31 = vsel %vm5213_vm2, %v4926_v39, 0.0  ;;  %v7598_v26 = vpop.f32.mrb[228].mxu0  ;;  %v4527_v20 = vadd.f32 %v10439_v9, %v10593_v29  ;;  %v5691_v61 = vrot.slane %v5690_v2, 4  ;;  %v10716_v54 = vpop.f32.mrb[224].mxu1 }
 0x2aa   :  { %v5699_v5 = vadd.f32 %v5698_v31, %v5697_v37  ;;  %v3575_v15 = vadd.f32 %v10439_v9, %v7598_v26  ;;  %v3566_v17 = vpop.f32.mrb[229].mxu0  ;;  %v6214_v63 = vadd.f32 %v6213_v24, %v6212_v36  ;;  %v6217_v51 = vsel %vm5213_vm2, %v5168_v0, 0.0  ;;  %v10721_v24 = vpop.f32.mrb[225].mxu1 }
 0x2ab   :  { %v3567_v27 = vadd.f32 %v10439_v9, %v3566_v17  ;;  %v7599_v16 = vpop.f32.mrb[230].mxu0  ;;  %v5169_v28 = vmax.f32 %v4527_v20, 0.0  ;;  %v4538_v49 = vadd.f32 %v10439_v9, %v10597_v23  ;;  %v5171_v37 = vmax.f32 %v4535_v7, 0.0  ;;  %v10725_v17 = vpop.f32.mrb[226].mxu1 }
 0x2ac   :  { %v5701_v60 = vadd.f32 %v5700_v46, %v5699_v5  ;;  %v3578_v29 = vadd.f32 %v10439_v9, %v7599_v16  ;;  %v3569_v39 = vpop.f32.mrb[231].mxu0  ;;  %v4530_v31 = vadd.f32 %v10439_v9, %v10602_v21  ;;  %v5702_v36 = vsel %vm5213_vm2, %v4928_v33, 0.0  ;;  %v10729_v32 = vpop.f32.mrb[227].mxu1 }
 0x2ad   :  { %v4929_v26 = vmax.f32 %v3567_v27, 0.0  ;;  %v3570_v0 = vadd.f32 %v10439_v9, %v3569_v39  ;;  %v6216_v20 = vadd.f32 %v6215_v1, %v6214_v63  ;;  %v10727_v23 = vadd.f32 %v5691_v61, %v5690_v2 }
 0x2ae   :  { %v4931_v46 = vmax.f32 %v3575_v15, 0.0  ;;  %v5703_v5 = vadd.f32 %v5702_v36, %v5701_v60  ;;  %v4932_v16 = vmax.f32 %v3578_v29, 0.0  ;;  %v6219_v40 = vsel %vm5213_vm2, %v5169_v28, 0.0 }
 0x2af   :  { %v5704_v7 = vsel %vm5213_vm2, %v4929_v26, 0.0  ;;  %v4930_v21 = vmax.f32 %v3570_v0, 0.0  ;;  %v6218_v52 = vadd.f32 %v6217_v51, %v6216_v20  ;;  %v6223_v27 = vsel %vm5213_vm2, %v5171_v37, 0.0 }
 0x2b0   :  { %v5705_v33 = vadd.f32 %v5704_v7, %v5703_v5  ;;  %v5172_v39 = vmax.f32 %v4538_v49, 0.0  ;;  %v5170_v1 = vmax.f32 %v4530_v31, 0.0  ;;  %v4551_v15 = vadd.f32 %v10439_v9, %v10618_v6  ;;  %v10744_v0 = vpop.f32.mrb[228].mxu1 }
 0x2b1   :  { %v5706_v63 = vsel %vm5213_vm2, %v4930_v21, 0.0  ;;  %v7602_v2 = vpop.f32.mrb[232].mxu0  ;;  %v6220_v61 = vadd.f32 %v6219_v40, %v6218_v52  ;;  %v4543_v60 = vadd.f32 %v10439_v9, %v10621_v62  ;;  %v5708_v29 = vsel %vm5213_vm2, %v4931_v46, 0.0 }
 0x2b2   :  { %v5710_v51 = vsel %vm5213_vm2, %v4932_v16, 0.0  ;;  %v5707_v28 = vadd.f32 %v5706_v63, %v5705_v33  ;;  %v3582_v36 = vpop.f32.mrb[233].mxu0  ;;  %v6221_v37 = vsel %vm5213_vm2, %v5170_v1, 0.0  ;;  %v3591_v49 = vadd.f32 %v10439_v9, %v7602_v2  ;;  %v10749_v16 = vpop.f32.mrb[229].mxu1 }
 0x2b3   :  { %v3583_v31 = vadd.f32 %v10439_v9, %v3582_v36  ;;  %v7603_v26 = vpop.f32.mrb[234].mxu0  ;;  %v6222_v40 = vadd.f32 %v6221_v37, %v6220_v61  ;;  %v5173_v52 = vmax.f32 %v4543_v60, 0.0  ;;  %v6225_v62 = vsel %vm5213_vm2, %v5172_v39, 0.0  ;;  %v10753_v63 = vpop.f32.mrb[230].mxu1 }
 0x2b4   :  { %v5709_v6 = vadd.f32 %v5708_v29, %v5707_v28  ;;  %v3585_v20 = vpop.f32.mrb[235].mxu0  ;;  %v5175_v46 = vmax.f32 %v4551_v15, 0.0  ;;  %v4554_v5 = vadd.f32 %v10439_v9, %v10626_v44  ;;  %v3594_v21 = vadd.f32 %v10439_v9, %v7603_v26  ;;  %v10762_v60 = vpop.f32.mrb[231].mxu1 }
 0x2b5   :  { %v4933_v7 = vmax.f32 %v3583_v31, 0.0  ;;  %v3586_v33 = vadd.f32 %v10439_v9, %v3585_v20  ;;  %v6224_v1 = vadd.f32 %v6223_v27, %v6222_v40  ;;  %v11165_v2 = vrot.slane %v10659_v42, 2 }
 0x2b6   :  { %v5711_v15 = vadd.f32 %v5710_v51, %v5709_v6  ;;  %v6227_v44 = vsel %vm5213_vm2, %v5173_v52, 0.0  ;;  %v4935_v29 = vmax.f32 %v3591_v49, 0.0  ;;  %v6231_v31 = vsel %vm5213_vm2, %v5175_v46, 0.0 }
 0x2b7   :  { %v10758_v61 = vadd.f32 %v11165_v2, %v10659_v42  ;;  %v5712_v28 = vsel %vm5213_vm2, %v4933_v7, 0.0  ;;  %v4934_v36 = vmax.f32 %v3586_v33, 0.0  ;;  %v6226_v37 = vadd.f32 %v6225_v62, %v6224_v1 }
 0x2b8   :  { %v5713_v27 = vadd.f32 %v5712_v28, %v5711_v15  ;;  %v5176_v26 = vmax.f32 %v4554_v5, 0.0  ;;  %v4546_v42 = vadd.f32 %v10439_v9, %v10629_v35  ;;  %v4936_v40 = vmax.f32 %v3594_v21, 0.0  ;;  %v10778_v15 = vpop.f32.mrb[232].mxu1 }
 0x2b9   :  { %v5714_v20 = vsel %vm5213_vm2, %v4934_v36, 0.0  ;;  %v7606_v51 = vpop.f32.mrb[236].mxu0  ;;  %v6228_v6 = vadd.f32 %v6227_v44, %v6226_v37  ;;  %v4559_v52 = vadd.f32 %v10439_v9, %v10650_v58  ;;  %v4567_v62 = vadd.f32 %v10439_v9, %v10647_v48 }
 0x2ba   :  { %v5715_v49 = vadd.f32 %v5714_v20, %v5713_v27  ;;  %v3598_v2 = vpop.f32.mrb[237].mxu0  ;;  %v5174_v7 = vmax.f32 %v4546_v42, 0.0  ;;  %v4570_v46 = vadd.f32 %v10439_v9, %v10654_v34  ;;  %v5716_v5 = vsel %vm5213_vm2, %v4935_v29, 0.0  ;;  %v10784_v34 = vpop.f32.mrb[233].mxu1 }
 0x2bb   :  { %v3607_v35 = vadd.f32 %v10439_v9, %v7606_v51  ;;  %v3599_v21 = vadd.f32 %v10439_v9, %v3598_v2  ;;  %v7607_v33 = vpop.f32.mrb[238].mxu0  ;;  %v5177_v1 = vmax.f32 %v4559_v52, 0.0  ;;  %v4562_v48 = vadd.f32 %v10439_v9, %v10661_v59  ;;  %v10788_v20 = vpop.f32.mrb[234].mxu1 }
 0x2bc   :  { %v5717_v58 = vadd.f32 %v5716_v5, %v5715_v49  ;;  %v3610_v44 = vadd.f32 %v10439_v9, %v7607_v33  ;;  %v3601_v28 = vpop.f32.mrb[239].mxu0  ;;  %v6229_v36 = vsel %vm5213_vm2, %v5174_v7, 0.0  ;;  %v5718_v29 = vsel %vm5213_vm2, %v4936_v40, 0.0  ;;  %v10791_v5 = vpop.f32.mrb[235].mxu1 }
 0x2bd   :  { %v4937_v37 = vmax.f32 %v3599_v21, 0.0  ;;  %v3602_v27 = vadd.f32 %v10439_v9, %v3601_v28  ;;  %v6230_v42 = vadd.f32 %v6229_v36, %v6228_v6  ;;  %v6233_v52 = vsel %vm5213_vm2, %v5176_v26, 0.0 }
 0x2be   :  { %v5719_v51 = vadd.f32 %v5718_v29, %v5717_v58  ;;  %v5179_v49 = vmax.f32 %v4567_v62, 0.0  ;;  %v5180_v2 = vmax.f32 %v4570_v46, 0.0  ;;  %v4939_v7 = vmax.f32 %v3607_v35, 0.0 }
 0x2bf   :  { %v5720_v59 = vsel %vm5213_vm2, %v4937_v37, 0.0  ;;  %v4938_v33 = vmax.f32 %v3602_v27, 0.0  ;;  %v6232_v39 = vadd.f32 %v6231_v31, %v6230_v42  ;;  %v4940_v40 = vmax.f32 %v3610_v44, 0.0 }
 0x2c0   :  { %v5721_v57 = vadd.f32 %v5720_v59, %v5719_v51  ;;  %v6235_v21 = vsel %vm5213_vm2, %v5177_v1, 0.0  ;;  %v5178_v28 = vmax.f32 %v4562_v48, 0.0  ;;  %v4583_v26 = vadd.f32 %v10439_v9, %v10680_v4  ;;  %v10807_v27 = vpop.f32.mrb[236].mxu1 }
 0x2c1   :  { %v5722_v6 = vsel %vm5213_vm2, %v4938_v33, 0.0  ;;  %v7610_v36 = vpop.f32.mrb[240].mxu0  ;;  %v6234_v58 = vadd.f32 %v6233_v52, %v6232_v39  ;;  %v4575_v62 = vadd.f32 %v10439_v9, %v10682_v30  ;;  %v4586_v1 = vadd.f32 %v10439_v9, %v10687_v25  ;;  %v10811_v59 = vpop.f32.mrb[237].mxu1 }
 0x2c2   :  { %v5723_v46 = vadd.f32 %v5722_v6, %v5721_v57  ;;  %v3623_v35 = vadd.f32 %v10439_v9, %v7610_v36  ;;  %v3614_v29 = vpop.f32.mrb[241].mxu0  ;;  %v6237_v31 = vsel %vm5213_vm2, %v5178_v28, 0.0  ;;  %v5724_v44 = vsel %vm5213_vm2, %v4939_v7, 0.0  ;;  %v10815_v6 = vpop.f32.mrb[238].mxu1 }
 0x2c3   :  { %v3615_v48 = vadd.f32 %v10439_v9, %v3614_v29  ;;  %v7611_v39 = vpop.f32.mrb[242].mxu0  ;;  %v6239_v37 = vsel %vm5213_vm2, %v5179_v49, 0.0  ;;  %v6236_v4 = vadd.f32 %v6235_v21, %v6234_v58  ;;  %v5726_v57 = vsel %vm5213_vm2, %v4940_v40, 0.0  ;;  %v10817_v40 = vpop.f32.mrb[239].mxu1 }
 0x2c4   :  { %v5725_v30 = vadd.f32 %v5724_v44, %v5723_v46  ;;  %v3617_v42 = vpop.f32.mrb[243].mxu0  ;;  %v6241_v51 = vsel %vm5213_vm2, %v5180_v2, 0.0  ;;  %v5181_v52 = vmax.f32 %v4575_v62, 0.0  ;;  %v3626_v7 = vadd.f32 %v10439_v9, %v7611_v39 }
 0x2c5   :  { %v4941_v25 = vmax.f32 %v3615_v48, 0.0  ;;  %v3618_v33 = vadd.f32 %v10439_v9, %v3617_v42  ;;  %v6238_v28 = vadd.f32 %v6237_v31, %v6236_v4  ;;  %v4943_v49 = vmax.f32 %v3623_v35, 0.0 }
 0x2c6   :  { %v5727_v21 = vadd.f32 %v5726_v57, %v5725_v30  ;;  %v5183_v36 = vmax.f32 %v4583_v26, 0.0  ;;  %v5184_v58 = vmax.f32 %v4586_v1, 0.0  ;;  %v4578_v29 = vadd.f32 %v10439_v9, %v10699_v10 }
 0x2c7   :  { %v5728_v46 = vsel %vm5213_vm2, %v4941_v25, 0.0  ;;  %v4942_v2 = vmax.f32 %v3618_v33, 0.0  ;;  %v6240_v62 = vadd.f32 %v6239_v37, %v6238_v28  ;;  %v6249_v48 = vsel %vm5213_vm2, %v5181_v52, 0.0 }
 0x2c8   :  { %v5729_v44 = vadd.f32 %v5728_v46, %v5727_v21  ;;  %v4599_v31 = vadd.f32 %v10439_v9, %v10716_v54  ;;  %v4591_v35 = vadd.f32 %v10439_v9, %v10721_v24  ;;  %v4944_v26 = vmax.f32 %v3626_v7, 0.0  ;;  %v10836_v54 = vld [vmem:[%s11124_s2] ss:$0 sm:$0xff]  ;;  %v10841_v33 = vpop.f32.mrb[240].mxu1 }
 0x2c9   :  { %v5730_v1 = vsel %vm5213_vm2, %v4942_v2, 0.0  ;;  %v7614_v39 = vpop.f32.mrb[244].mxu0  ;;  %v10828_v4 = vadd.f32 %v6241_v51, %v6240_v62  ;;  %v5182_v57 = vmax.f32 %v4578_v29, 0.0  ;;  %v5732_v37 = vsel %vm5213_vm2, %v4943_v49, 0.0  ;;  %v10845_v46 = vpop.f32.mrb[241].mxu1 }
 0x2ca   :  { %v5731_v30 = vadd.f32 %v5730_v1, %v5729_v44  ;;  %v3630_v10 = vpop.f32.mrb[245].mxu0  ;;  %v6252_v42 = vsel %vm5213_vm2, %v5183_v36, 0.0  ;;  %v6254_v52 = vsel %vm5213_vm2, %v5184_v58, 0.0  ;;  %v3639_v9 = vadd.f32 %v10836_v54, %v7614_v39  ;;  %v10850_v1 = vpop.f32.mrb[242].mxu1 }
 0x2cb   :  { %11166 = vst [vmem:[#allocation25_spill] sm:$0xff] %v10828_v4  ;;  %v3631_v24 = vadd.f32 %v10836_v54, %v3630_v10  ;;  %v7615_v51 = vpop.f32.mrb[246].mxu0  ;;  %v6250_v25 = vsel %vm5213_vm2, %v5182_v57, 0.0  ;;  %v5185_v7 = vmax.f32 %v4591_v35, 0.0  ;;  %v5187_v36 = vmax.f32 %v4599_v31, 0.0  ;;  %v10858_v57 = vpop.f32.mrb[243].mxu1 }
 0x2cc   :  { %v5733_v28 = vadd.f32 %v5732_v37, %v5731_v30  ;;  %v3633_v49 = vpop.f32.mrb[247].mxu0  ;;  %v6251_v21 = vadd.f32 %v6250_v25, %v6249_v48  ;;  %v4602_v58 = vadd.f32 %v10836_v54, %v10725_v17  ;;  %v5734_v2 = vsel %vm5213_vm2, %v4944_v26, 0.0 }
 0x2cd   :  { %v4945_v62 = vmax.f32 %v3631_v24, 0.0  ;;  %v3642_v29 = vadd.f32 %v10836_v54, %v7615_v51  ;;  %v3634_v44 = vadd.f32 %v10836_v54, %v3633_v49  ;;  %v11167_v48 = vrot.slane %v10727_v23, 2 }
 0x2ce   :  { %v5735_v39 = vadd.f32 %v5734_v2, %v5733_v28  ;;  %v6253_v17 = vadd.f32 %v6252_v42, %v6251_v21  ;;  %v4947_v37 = vmax.f32 %v3639_v9, 0.0  ;;  %v6256_v10 = vsel %vm5213_vm2, %v5185_v7, 0.0 }
 0x2cf   :  { %v10856_v31 = vadd.f32 %v11167_v48, %v10727_v23  ;;  %v5736_v26 = vsel %vm5213_vm2, %v4945_v62, 0.0  ;;  %v4946_v30 = vmax.f32 %v3634_v44, 0.0  ;;  %v6260_v51 = vsel %vm5213_vm2, %v5187_v36, 0.0 }
 0x2d0   :  { %v5737_v24 = vadd.f32 %v5736_v26, %v5735_v39  ;;  %v6255_v25 = vadd.f32 %v6254_v52, %v6253_v17  ;;  %v5188_v49 = vmax.f32 %v4602_v58, 0.0  ;;  %v4948_v35 = vmax.f32 %v3642_v29, 0.0  ;;  %v10873_v48 = vpop.f32.mrb[244].mxu1 }
 0x2d1   :  { %v5738_v4 = vsel %vm5213_vm2, %v4946_v30, 0.0  ;;  %v7618_v23 = vpop.f32.mrb[248].mxu0  ;;  %v4594_v42 = vadd.f32 %v10836_v54, %v10729_v32  ;;  %v4615_v9 = vadd.f32 %v10836_v54, %v10744_v0  ;;  %v4607_v36 = vadd.f32 %v10836_v54, %v10749_v16  ;;  %v10876_v26 = vpop.f32.mrb[245].mxu1 }
 0x2d2   :  { %v5739_v28 = vadd.f32 %v5738_v4, %v5737_v24  ;;  %v3655_v21 = vadd.f32 %v10836_v54, %v7618_v23  ;;  %v3646_v2 = vpop.f32.mrb[249].mxu0  ;;  %v6257_v7 = vadd.f32 %v6256_v10, %v6255_v25  ;;  %v5740_v52 = vsel %vm5213_vm2, %v4947_v37, 0.0  ;;  %v10881_v24 = vpop.f32.mrb[246].mxu1 }
 0x2d3   :  { %v3647_v58 = vadd.f32 %v10836_v54, %v3646_v2  ;;  %v7619_v62 = vpop.f32.mrb[250].mxu0  ;;  %v5186_v29 = vmax.f32 %v4594_v42, 0.0  ;;  %v5191_v44 = vmax.f32 %v4615_v9, 0.0  ;;  %v5189_v17 = vmax.f32 %v4607_v36, 0.0 }
 0x2d4   :  { %v5741_v32 = vadd.f32 %v5740_v52, %v5739_v28  ;;  %v4951_v39 = vmax.f32 %v3655_v21, 0.0  ;;  %v3658_v0 = vadd.f32 %v10836_v54, %v7619_v62  ;;  %v3649_v4 = vpop.f32.mrb[251].mxu0  ;;  %v5742_v30 = vsel %vm5213_vm2, %v4948_v35, 0.0  ;;  %v10885_v28 = vpop.f32.mrb[247].mxu1 }
 0x2d5   :  { %v4949_v16 = vmax.f32 %v3647_v58, 0.0  ;;  %v3650_v37 = vadd.f32 %v10836_v54, %v3649_v4  ;;  %v6258_v10 = vsel %vm5213_vm2, %v5186_v29, 0.0  ;;  %v6262_v42 = vsel %vm5213_vm2, %v5188_v49, 0.0 }
 0x2d6   :  { %v5748_v25 = vsel %vm5213_vm2, %v4951_v39, 0.0  ;;  %v5743_v23 = vadd.f32 %v5742_v30, %v5741_v32  ;;  %v6259_v9 = vadd.f32 %v6258_v10, %v6257_v7  ;;  %v4952_v2 = vmax.f32 %v3658_v0, 0.0 }
 0x2d7   :  { %v5744_v21 = vsel %vm5213_vm2, %v4949_v16, 0.0  ;;  %v4950_v36 = vmax.f32 %v3650_v37, 0.0  ;;  %v6268_v35 = vsel %vm5213_vm2, %v5191_v44, 0.0  ;;  %v6264_v62 = vsel %vm5213_vm2, %v5189_v17, 0.0 }
 0x2d8   :  { %v5745_v52 = vadd.f32 %v5744_v21, %v5743_v23  ;;  %v6261_v58 = vadd.f32 %v6260_v51, %v6259_v9  ;;  %v4618_v29 = vadd.f32 %v10836_v54, %v10753_v63  ;;  %v4610_v49 = vadd.f32 %v10836_v54, %v10762_v60  ;;  %v10901_v9 = vpop.f32.mrb[248].mxu1 }
 0x2d9   :  { %v5746_v32 = vsel %vm5213_vm2, %v4950_v36, 0.0  ;;  %v7622_v39 = vpop.f32.mrb[252].mxu0  ;;  %v4631_v7 = vadd.f32 %v10836_v54, %v10778_v15  ;;  %v4623_v0 = vadd.f32 %v10836_v54, %v10784_v34 }
 0x2da   :  { %v5747_v44 = vadd.f32 %v5746_v32, %v5745_v52  ;;  %v3671_v51 = vadd.f32 %v10836_v54, %v7622_v39  ;;  %v3662_v4 = vpop.f32.mrb[253].mxu0  ;;  %v6263_v17 = vadd.f32 %v6262_v42, %v6261_v58  ;;  %v5192_v30 = vmax.f32 %v4618_v29, 0.0  ;;  %v10904_v52 = vpop.f32.mrb[249].mxu1 }
 0x2db   :  { %v3663_v63 = vadd.f32 %v10836_v54, %v3662_v4  ;;  %v7623_v16 = vpop.f32.mrb[254].mxu0  ;;  %v5190_v37 = vmax.f32 %v4610_v49, 0.0  ;;  %v5195_v10 = vmax.f32 %v4631_v7, 0.0  ;;  %v5193_v23 = vmax.f32 %v4623_v0, 0.0  ;;  %v10909_v39 = vpop.f32.mrb[250].mxu1 }
 0x2dc   :  { %v5749_v60 = vadd.f32 %v5748_v25, %v5747_v44  ;;  %v4955_v21 = vmax.f32 %v3671_v51, 0.0  ;;  %v3674_v15 = vadd.f32 %v10836_v54, %v7623_v16  ;;  %v3665_v36 = vpop.f32.mrb[255].mxu0  ;;  %v6265_v34 = vadd.f32 %v6264_v62, %v6263_v17  ;;  %v10912_v44 = vpop.f32.mrb[251].mxu1 }
 0x2dd   :  { %v5750_v32 = vsel %vm5213_vm2, %v4952_v2, 0.0  ;;  %v4953_v42 = vmax.f32 %v3663_v63, 0.0  ;;  %v3666_v58 = vadd.f32 %v10836_v54, %v3665_v36  ;;  %v6266_v29 = vsel %vm5213_vm2, %v5190_v37, 0.0 }
 0x2de   :  { %v5751_v49 = vadd.f32 %v5750_v32, %v5749_v60  ;;  %v4956_v7 = vmax.f32 %v3674_v15, 0.0  ;;  %v6270_v25 = vsel %vm5213_vm2, %v5192_v30, 0.0  ;;  %v6267_v0 = vadd.f32 %v6266_v29, %v6265_v34 }
 0x2df   :  { %v5756_v62 = vsel %vm5213_vm2, %v4955_v21, 0.0  ;;  %v5752_v51 = vsel %vm5213_vm2, %v4953_v42, 0.0  ;;  %v4954_v4 = vmax.f32 %v3666_v58, 0.0  ;;  %v6276_v2 = vsel %vm5213_vm2, %v5195_v10, 0.0 }
 0x2e0   :  { %v5753_v17 = vadd.f32 %v5752_v51, %v5751_v49  ;;  %v6269_v63 = vadd.f32 %v6268_v35, %v6267_v0  ;;  %v6272_v16 = vsel %vm5213_vm2, %v5193_v23, 0.0  ;;  %v4634_v37 = vadd.f32 %v10836_v54, %v10788_v20 }
 0x2e1   :  { %v5758_v60 = vsel %vm5213_vm2, %v4956_v7, 0.0  ;;  %v5754_v30 = vsel %vm5213_vm2, %v4954_v4, 0.0  ;;  %v7626_v15 = vpop.f32.mrb[0].mxu0  ;;  %v4626_v21 = vadd.f32 %v10836_v54, %v10791_v5  ;;  %v5695_v36 = vrot.slane %v10856_v31, 1 }
 0x2e2   :  { %v5755_v34 = vadd.f32 %v5754_v30, %v5753_v17  ;;  %v3687_v10 = vadd.f32 %v10836_v54, %v7626_v15  ;;  %v3678_v32 = vpop.f32.mrb[1].mxu0  ;;  %v6271_v35 = vadd.f32 %v6270_v25, %v6269_v63  ;;  %v5196_v42 = vmax.f32 %v4634_v37, 0.0 }
 0x2e3   :  { %v3679_v23 = vadd.f32 %v10836_v54, %v3678_v32  ;;  %v7627_v58 = vpop.f32.mrb[2].mxu0  ;;  %v5194_v20 = vmax.f32 %v4626_v21, 0.0  ;;  %v11168_v29 = vrot.slane %v10758_v61, 1  ;;  %v5696_v63 = vadd.f32 %v5695_v36, %v10856_v31 }
 0x2e4   :  { %v5757_v7 = vadd.f32 %v5756_v62, %v5755_v34  ;;  %v4959_v0 = vmax.f32 %v3687_v10, 0.0  ;;  %v3690_v5 = vadd.f32 %v10836_v54, %v7627_v58  ;;  %v3681_v51 = vpop.f32.mrb[3].mxu0  ;;  %v6273_v4 = vadd.f32 %v6272_v16, %v6271_v35 }
 0x2e5   :  { %v5627_v49 = vadd.f32 %v11168_v29, %v10758_v61  ;;  %v4957_v17 = vmax.f32 %v3679_v23, 0.0  ;;  %v3682_v30 = vadd.f32 %v10836_v54, %v3681_v51  ;;  %v6274_v25 = vsel %vm5213_vm2, %v5194_v20, 0.0 }
 0x2e6   :  { %v5759_v37 = vadd.f32 %v5758_v60, %v5757_v7  ;;  %v5769_v15 = vsel %vm5213_vm2, %v4959_v0, 0.0  ;;  %v6278_v21 = vsel %vm5213_vm2, %v5196_v42, 0.0  ;;  %v6275_v61 = vadd.f32 %v6274_v25, %v6273_v4 }
 0x2e7   :  { %v4960_v32 = vmax.f32 %v3690_v5, 0.0  ;;  %v4958_v62 = vmax.f32 %v3682_v30, 0.0  ;;  %v6346_v34 = vsel %vm6345_vm3, %v10331_v19, %v10051_v41  ;;  %v5766_v10 = vsel %vm5213_vm2, %v4957_v17, 0.0 }
 0x2e8   :  { %v5760_v16 = vrot.slane %v5759_v37, 4  ;;  %v6277_v35 = vadd.f32 %v6276_v2, %v6275_v61  ;;  %v6348_v31 = vsel %vm6347_vm4, %v10453_v50, %v6346_v34  ;;  %v4647_v2 = vadd.f32 %v10836_v54, %v10807_v27 }
 0x2e9   :  { %v5767_v60 = vsel %vm5213_vm2, %v4958_v62, 0.0  ;;  %v6350_v23 = vsel %vm6349_vm5, %v10692_v38, %v6348_v31  ;;  %v5771_v41 = vsel %vm5213_vm2, %v4960_v32, 0.0  ;;  %v4639_v50 = vadd.f32 %v10836_v54, %v10811_v59 }
 0x2ea   :  { %v5761_v36 = vadd.f32 %v5760_v16, %v5759_v37  ;;  %v5768_v42 = vadd.f32 %v5767_v60, %v5766_v10  ;;  %v6352_v19 = vsel %vm6351_vm6, %v10697_v14, %v6350_v23  ;;  %v6279_v7 = vadd.f32 %v6278_v21, %v6277_v35 }
 0x2eb   :  { %v6354_v29 = vsel %vm6353_vm7, %v5627_v49, %v6352_v19  ;;  %v5199_v38 = vmax.f32 %v4647_v2, 0.0  ;;  %v5197_v5 = vmax.f32 %v4639_v50, 0.0  ;;  %v4650_v51 = vadd.f32 %v10836_v54, %v10815_v6 }
 0x2ec   :  { %v5770_v58 = vadd.f32 %v5769_v15, %v5768_v42  ;;  %v5762_v20 = vrot.slane %v5761_v36, 2  ;;  %v6356_v0 = vsel %vm6355_vm8, %v5696_v63, %v6354_v29  ;;  %v3711_v14 = vadd.f32 %v10836_v54, %v8780_v47 }
 0x2ed   :  { %v4642_v59 = vadd.f32 %v10836_v54, %v10817_v40  ;;  %v3714_v17 = vadd.f32 %v10836_v54, %v8791_v56  ;;  %v6280_v49 = vsel %vm5213_vm2, %v5197_v5, 0.0  ;;  %v5200_v30 = vmax.f32 %v4650_v51, 0.0 }
 0x2ee   :  { %v5772_v4 = vadd.f32 %v5771_v41, %v5770_v58  ;;  %v5763_v27 = vadd.f32 %v5762_v20, %v5761_v36  ;;  %v4655_v25 = vadd.f32 %v10836_v54, %v10845_v46  ;;  %v6281_v37 = vadd.f32 %v6280_v49, %v6279_v7 }
 0x2ef   :  { %v5198_v15 = vmax.f32 %v4642_v59, 0.0  ;;  %v6284_v47 = vsel %vm5213_vm2, %v5199_v38, 0.0  ;;  %v4663_v40 = vadd.f32 %v10836_v54, %v10841_v33  ;;  %v4658_v46 = vadd.f32 %v10836_v54, %v10858_v57 }
 0x2f0   :  { %v5774_v63 = vadd.f32 %v9638_v3, %v5772_v4  ;;  %v5764_v6 = vrot.slane %v5763_v27, 1  ;;  %v5201_v21 = vmax.f32 %v4655_v25, 0.0  ;;  %v3719_v3 = vadd.f32 %v10836_v54, %v8775_v43 }
 0x2f1   :  { %v6282_v32 = vsel %vm5213_vm2, %v5198_v15, 0.0  ;;  %v4965_v62 = vmax.f32 %v3711_v14, 0.0  ;;  %v6286_v34 = vsel %vm5213_vm2, %v5200_v30, 0.0  ;;  %v5202_v35 = vmax.f32 %v4658_v46, 0.0 }
 0x2f2   :  { %v5776_v56 = vadd.f32 %v9925_v13, %v5774_v63  ;;  %v5765_v61 = vadd.f32 %v5764_v6, %v5763_v27  ;;  %v6283_v16 = vadd.f32 %v6282_v32, %v6281_v37  ;;  %v4666_v13 = vadd.f32 %v10836_v54, %v10850_v1 }
 0x2f3   :  { %v11169_v31 = vmax.f32 %v9608_v11, 0.0  ;;  %v3722_v57 = vadd.f32 %v10836_v54, %v8785_v53  ;;  %v4966_v43 = vmax.f32 %v3714_v17, 0.0  ;;  %v5203_v23 = vmax.f32 %v4663_v40, 0.0 }
 0x2f4   :  { %v5778_v10 = vadd.f32 %v9604_v55, %v5776_v56  ;;  %v6358_v33 = vsel %vm6357_vm9, %v5765_v61, %v6356_v0  ;;  %v6285_v36 = vadd.f32 %v6284_v47, %v6283_v16  ;;  %v6288_v55 = vsel %vm5213_vm2, %v5201_v21, 0.0 }
 0x2f5   :  { %v5779_v60 = vsel %vm5213_vm2, %v11169_v31, 0.0  ;;  %7888 = vmatprep.mubr.msk.f32.mxu1 %vm5213_vm2, %v6358_v33  ;;  %v4671_v41 = vadd.f32 %v10836_v54, %v10876_v26  ;;  %v4967_v1 = vmax.f32 %v3719_v3, 0.0  ;;  %v5781_v19 = vsel %vm5213_vm2, %v4965_v62, 0.0  ;;  %v11170_v62 = vld [vmem:[#allocation7_spill] sm:$0xff] }
 0x2f6   :  { %v5780_v42 = vadd.f32 %v5779_v60, %v5778_v10  ;;  %v3727_v11 = vadd.f32 %v10836_v54, %v8812_v12  ;;  %v6287_v2 = vadd.f32 %v6286_v34, %v6285_v36  ;;  %v5204_v53 = vmax.f32 %v4666_v13, 0.0 }
 0x2f7   :  { %v6290_v58 = vsel %vm5213_vm2, %v5202_v35, 0.0  ;;  %v4674_v20 = vadd.f32 %v10836_v54, %v10885_v28  ;;  %v4968_v29 = vmax.f32 %v3722_v57, 0.0  ;;  %v5783_v7 = vsel %vm5213_vm2, %v4966_v43, 0.0  ;;  %v11171_v35 = vld [vmem:[#allocation5_spill] sm:$0xff] }
 0x2f8   :  { %v5782_v50 = vadd.f32 %v5781_v19, %v5780_v42  ;;  %v3730_v26 = vadd.f32 %v10836_v54, %v8823_v22  ;;  %v6289_v0 = vadd.f32 %v6288_v55, %v6287_v2  ;;  %v6292_v5 = vsel %vm5213_vm2, %v5203_v23, 0.0  ;;  %v11172_v55 = vld [vmem:[#allocation6_spill] sm:$0xff] }
 0x2f9   :  { %v4679_v12 = vadd.f32 %v10836_v54, %v10873_v48  ;;  %v5205_v51 = vmax.f32 %v4671_v41, 0.0  ;;  %v5785_v14 = vsel %vm5213_vm2, %v4967_v1, 0.0  ;;  %v3735_v4 = vadd.f32 %v10836_v54, %v8807_v8 }
 0x2fa   :  { %v5784_v38 = vadd.f32 %v5783_v7, %v5782_v50  ;;  %v4969_v28 = vmax.f32 %v3727_v11, 0.0  ;;  %v6291_v27 = vadd.f32 %v6290_v58, %v6289_v0  ;;  %v6294_v17 = vsel %vm5213_vm2, %v5204_v53, 0.0  ;;  %v11173_v58 = vld [vmem:[#allocation9_spill] sm:$0xff] }
 0x2fb   :  { %v4682_v22 = vadd.f32 %v10836_v54, %v10881_v24  ;;  %v5206_v49 = vmax.f32 %v4674_v20, 0.0  ;;  %v5787_v30 = vsel %vm5213_vm2, %v4968_v29, 0.0  ;;  %v3738_v48 = vadd.f32 %v10836_v54, %v8817_v18 }
 0x2fc   :  { %v5786_v59 = vadd.f32 %v5785_v14, %v5784_v38  ;;  %v4970_v25 = vmax.f32 %v3730_v26, 0.0  ;;  %v6293_v63 = vadd.f32 %v6292_v5, %v6291_v27  ;;  %v5207_v37 = vmax.f32 %v4679_v12, 0.0  ;;  %v11174_v5 = vld [vmem:[#allocation11_spill] sm:$0xff]  ;;  %v11175_v27 = vld [vmem:[#allocation8_spill] sm:$0xff] }
 0x2fd   :  { %v6296_v8 = vsel %vm5213_vm2, %v5205_v51, 0.0  ;;  %v4687_v15 = vadd.f32 %v10836_v54, %v10904_v52  ;;  %v4971_v47 = vmax.f32 %v3735_v4, 0.0  ;;  %v5789_v40 = vsel %vm5213_vm2, %v4969_v28, 0.0 }
 0x2fe   :  { %v5788_v6 = vadd.f32 %v5787_v30, %v5786_v59  ;;  %v3743_v24 = vadd.f32 %v10836_v54, %v8844_v45  ;;  %v6295_v21 = vadd.f32 %v6294_v17, %v6293_v63  ;;  %v5208_v61 = vmax.f32 %v4682_v22, 0.0 }
 0x2ff   :  { %v6298_v18 = vsel %vm5213_vm2, %v5206_v49, 0.0  ;;  %v4690_v32 = vadd.f32 %v10836_v54, %v10912_v44  ;;  %v4972_v46 = vmax.f32 %v3738_v48, 0.0  ;;  %v5791_v3 = vsel %vm5213_vm2, %v4970_v25, 0.0  ;;  %v11176_v25 = vld [vmem:[#allocation10_spill] sm:$0xff] }
 0x300   :  { %v5790_v56 = vadd.f32 %v5789_v40, %v5788_v6  ;;  %v3746_v52 = vadd.f32 %v10836_v54, %v11170_v62  ;;  %v6297_v34 = vadd.f32 %v6296_v8, %v6295_v21  ;;  %v6300_v10 = vsel %vm5213_vm2, %v5207_v37, 0.0  ;;  %v11177_v40 = vld [vmem:[#allocation13_spill] sm:$0xff] }
 0x301   :  { %v4695_v45 = vadd.f32 %v10836_v54, %v10901_v9  ;;  %v5209_v33 = vmax.f32 %v4687_v15, 0.0  ;;  %v5793_v13 = vsel %vm5213_vm2, %v4971_v47, 0.0  ;;  %v3751_v31 = vadd.f32 %v10836_v54, %v11171_v35 }
 0x302   :  { %v5792_v16 = vadd.f32 %v5791_v3, %v5790_v56  ;;  %v4973_v44 = vmax.f32 %v3743_v24, 0.0  ;;  %v6299_v60 = vadd.f32 %v6298_v18, %v6297_v34  ;;  %v6302_v43 = vsel %vm5213_vm2, %v5208_v61, 0.0 }
 0x303   :  { %v4698_v36 = vadd.f32 %v10836_v54, %v10909_v39  ;;  %v5210_v42 = vmax.f32 %v4690_v32, 0.0  ;;  %v5795_v23 = vsel %vm5213_vm2, %v4972_v46, 0.0  ;;  %v3754_v9 = vadd.f32 %v10836_v54, %v11172_v55  ;;  %v11178_v32 = vld [vmem:[#allocation15_spill] sm:$0xff] }
 0x304   :  { %v5794_v57 = vadd.f32 %v5793_v13, %v5792_v16  ;;  %v4974_v41 = vmax.f32 %v3746_v52, 0.0  ;;  %v6301_v1 = vadd.f32 %v6300_v10, %v6299_v60  ;;  %v5211_v11 = vmax.f32 %v4695_v45, 0.0  ;;  %v11179_v52 = vld [vmem:[#allocation12_spill] sm:$0xff]  ;;  %v11182_v55 = vld [vmem:[#allocation19_spill] sm:$0xff] }
 0x305   :  { %v6304_v2 = vsel %vm5213_vm2, %v5209_v33, 0.0  ;;  %v4975_v50 = vmax.f32 %v3751_v31, 0.0  ;;  %v5797_v53 = vsel %vm5213_vm2, %v4973_v44, 0.0  ;;  %v3759_v20 = vadd.f32 %v10836_v54, %v11173_v58  ;;  %v11180_v33 = vld [vmem:[#allocation14_spill] sm:$0xff] }
 0x306   :  { %v5796_v19 = vadd.f32 %v5795_v23, %v5794_v57  ;;  %v6303_v29 = vadd.f32 %v6302_v43, %v6301_v1  ;;  %v5212_v7 = vmax.f32 %v4698_v36, 0.0  ;;  %v6306_v26 = vsel %vm5213_vm2, %v5210_v42, 0.0  ;;  %v11181_v57 = vld [vmem:[#allocation17_spill] sm:$0xff]  ;;  %v11184_v58 = vld [vmem:[#allocation18_spill] sm:$0xff] }
 0x307   :  { %v4976_v0 = vmax.f32 %v3754_v9, 0.0  ;;  %v5799_v38 = vsel %vm5213_vm2, %v4974_v41, 0.0  ;;  %v3762_v12 = vadd.f32 %v10836_v54, %v11174_v5  ;;  %v6308_v4 = vsel %vm5213_vm2, %v5211_v11, 0.0  ;;  %v11186_v5 = vld [vmem:[#allocation21_spill] sm:$0xff] }
 0x308   :  { %v5798_v39 = vadd.f32 %v5797_v53, %v5796_v19  ;;  %v6305_v51 = vadd.f32 %v6304_v2, %v6303_v29  ;;  %v5801_v28 = vsel %vm5213_vm2, %v4975_v50, 0.0  ;;  %v3767_v59 = vadd.f32 %v10836_v54, %v11175_v27  ;;  %v11183_v19 = vld [vmem:[#allocation16_spill] sm:$0xff] }
 0x309   :  { %v4977_v17 = vmax.f32 %v3759_v20, 0.0  ;;  %v6310_v30 = vsel %vm5213_vm2, %v5212_v7, 0.0  ;;  %v5803_v48 = vsel %vm5213_vm2, %v4976_v0, 0.0  ;;  %v3770_v63 = vadd.f32 %v10836_v54, %v11176_v25 }
 0x30a   :  { %v5800_v14 = vadd.f32 %v5799_v38, %v5798_v39  ;;  %v6307_v22 = vadd.f32 %v6306_v26, %v6305_v51  ;;  %v4978_v6 = vmax.f32 %v3762_v12, 0.0  ;;  %v4979_v15 = vmax.f32 %v3767_v59, 0.0  ;;  %v11185_v39 = vld [vmem:[#allocation20_spill] sm:$0xff]  ;;  %v11187_v51 = vld [vmem:[#allocation22_spill] sm:$0xff]  ;;  %v11188_v59 = vld [vmem:[#allocation23_spill] sm:$0xff] }
 0x30b   :  { %v5805_v47 = vsel %vm5213_vm2, %v4977_v17, 0.0  ;;  %v3775_v24 = vadd.f32 %v10836_v54, %v11177_v40  ;;  %v4980_v61 = vmax.f32 %v3770_v63, 0.0  ;;  %v3778_v46 = vadd.f32 %v10836_v54, %v11178_v32  ;;  %v11190_v63 = vld [vmem:[#allocation25_spill] sm:$0xff] }
 0x30c   :  { %v5802_v49 = vadd.f32 %v5801_v28, %v5800_v14  ;;  %v6309_v37 = vadd.f32 %v6308_v4, %v6307_v22  ;;  %v5807_v18 = vsel %vm5213_vm2, %v4978_v6, 0.0  ;;  %v5809_v62 = vsel %vm5213_vm2, %v4979_v15, 0.0 }
 0x30d   :  { %v3783_v34 = vadd.f32 %v10836_v54, %v11179_v52  ;;  %v4981_v16 = vmax.f32 %v3775_v24, 0.0  ;;  %v5811_v45 = vsel %vm5213_vm2, %v4980_v61, 0.0  ;;  %v3786_v13 = vadd.f32 %v10836_v54, %v11180_v33 }
 0x30e   :  { %v5804_v8 = vadd.f32 %v5803_v48, %v5802_v49  ;;  %v6311_v21 = vadd.f32 %v6310_v30, %v6309_v37  ;;  %v4982_v35 = vmax.f32 %v3778_v46, 0.0  ;;  %v3791_v43 = vadd.f32 %v10836_v54, %v11181_v57 }
 0x30f   :  { %v4983_v44 = vmax.f32 %v3783_v34, 0.0  ;;  %v5813_v60 = vsel %vm5213_vm2, %v4981_v16, 0.0  ;;  %v4984_v42 = vmax.f32 %v3786_v13, 0.0  ;;  %v3794_v9 = vadd.f32 %v10836_v54, %v11182_v55 }
 0x310   :  { %v5806_v56 = vadd.f32 %v5805_v47, %v5804_v8  ;;  %v5815_v23 = vsel %vm5213_vm2, %v4982_v35, 0.0  ;;  %v3799_v11 = vadd.f32 %v10836_v54, %v11183_v19  ;;  %v4985_v2 = vmax.f32 %v3791_v43, 0.0 }
 0x311   :  { %v5817_v1 = vsel %vm5213_vm2, %v4983_v44, 0.0  ;;  %v5819_v53 = vsel %vm5213_vm2, %v4984_v42, 0.0  ;;  %v3802_v20 = vadd.f32 %v10836_v54, %v11184_v58  ;;  %v4986_v29 = vmax.f32 %v3794_v9, 0.0  ;;  %v11189_v54 = vld [vmem:[#allocation24_spill] sm:$0xff] }
 0x312   :  { %v5808_v3 = vadd.f32 %v5807_v18, %v5806_v56  ;;  %v5898_v7 = vrot.slane %v11185_v39, 4  ;;  %v4987_v0 = vmax.f32 %v3799_v11, 0.0  ;;  %v5821_v38 = vsel %vm5213_vm2, %v4985_v2, 0.0 }
 0x313   :  { %v5967_v12 = vrot.slane %v11186_v5, 4  ;;  %v6036_v14 = vrot.slane %v11187_v51, 4  ;;  %v4988_v28 = vmax.f32 %v3802_v20, 0.0  ;;  %v5823_v27 = vsel %vm5213_vm2, %v4986_v29, 0.0 }
 0x314   :  { %v5810_v10 = vadd.f32 %v5809_v62, %v5808_v3  ;;  %v6105_v17 = vrot.slane %v11188_v59, 4  ;;  %v5899_v22 = vadd.f32 %v5898_v7, %v11185_v39  ;;  %v6174_v49 = vrot.slane %v11189_v54, 4 }
 0x315   :  { %v5825_v48 = vsel %vm5213_vm2, %v4987_v0, 0.0  ;;  %v5968_v25 = vadd.f32 %v5967_v12, %v11186_v5  ;;  %v6243_v6 = vrot.slane %v11190_v63, 4  ;;  %v6037_v37 = vadd.f32 %v6036_v14, %v11187_v51  ;;  %v6447_v14 = vld [vmem:[%s11127_s5] sm:$0xff] }
 0x316   :  { %v5812_v31 = vadd.f32 %v5811_v45, %v5810_v10  ;;  %v6312_v15 = vrot.slane %v6311_v21, 4  ;;  %v5827_v47 = vsel %vm5213_vm2, %v4988_v28, 0.0  ;;  %v6106_v40 = vadd.f32 %v6105_v17, %v11188_v59 }
 0x317   :  { %v5900_v24 = vrot.slane %v5899_v22, 2  ;;  %v6175_v56 = vadd.f32 %v6174_v49, %v11189_v54  ;;  %v5969_v18 = vrot.slane %v5968_v25, 2  ;;  %v6244_v32 = vadd.f32 %v6243_v6, %v11190_v63 }
 0x318   :  { %v5814_v36 = vadd.f32 %v5813_v60, %v5812_v31  ;;  %v6038_v46 = vrot.slane %v6037_v37, 2  ;;  %v6313_v62 = vadd.f32 %v6312_v15, %v6311_v21  ;;  %v6107_v52 = vrot.slane %v6106_v40, 2 }
 0x319   :  { %v5901_v34 = vadd.f32 %v5900_v24, %v5899_v22  ;;  %v6176_v16 = vrot.slane %v6175_v56, 2  ;;  %v5970_v45 = vadd.f32 %v5969_v18, %v5968_v25  ;;  %v6245_v33 = vrot.slane %v6244_v32, 2 }
 0x31a   :  { %v5816_v41 = vadd.f32 %v5815_v23, %v5814_v36  ;;  %v6039_v13 = vadd.f32 %v6038_v46, %v6037_v37  ;;  %v6314_v31 = vrot.slane %v6313_v62, 2  ;;  %v6108_v44 = vadd.f32 %v6107_v52, %v6106_v40 }
 0x31b   :  { %v5902_v60 = vrot.slane %v5901_v34, 1  ;;  %v6177_v57 = vadd.f32 %v6176_v16, %v6175_v56  ;;  %v5971_v36 = vrot.slane %v5970_v45, 1  ;;  %v6246_v42 = vadd.f32 %v6245_v33, %v6244_v32 }
 0x31c   :  { %v5818_v50 = vadd.f32 %v5817_v1, %v5816_v41  ;;  %v6040_v23 = vrot.slane %v6039_v13, 1  ;;  %v6315_v9 = vadd.f32 %v6314_v31, %v6313_v62  ;;  %v6109_v41 = vrot.slane %v6108_v44, 1 }
 0x31d   :  { %v5903_v21 = vadd.f32 %v5902_v60, %v5901_v34  ;;  %v6178_v1 = vrot.slane %v6177_v57, 1  ;;  %v5972_v11 = vadd.f32 %v5971_v36, %v5970_v45  ;;  %v6247_v2 = vrot.slane %v6246_v42, 1 }
 0x31e   :  { %v5820_v26 = vadd.f32 %v5819_v53, %v5818_v50  ;;  %v6041_v50 = vadd.f32 %v6040_v23, %v6039_v13  ;;  %v6316_v58 = vrot.slane %v6315_v9, 1  ;;  %v6110_v20 = vadd.f32 %v6109_v41, %v6108_v44 }
 0x31f   :  { %v6179_v39 = vadd.f32 %v6178_v1, %v6177_v57 }
 0x320   :  { %v5822_v4 = vadd.f32 %v5821_v38, %v5820_v26  ;;  %v6248_v26 = vadd.f32 %v6247_v2, %v6246_v42  ;;  %v6317_v5 = vadd.f32 %v6316_v58, %v6315_v9 }
 0x322   :  { %v5824_v30 = vadd.f32 %v5823_v27, %v5822_v4  ;;  %v6448_v4 = vld [vmem:[%s11127_s5 + $0x8] sm:$0xff]  ;;  %v7085_v27 = vld [vmem:[%s11126_s4] ss:$0 sm:$0xff]  ;;  %s8217_s4 = smov [#allocation2]  }
 0x323   :  { %v7906_v28 = vpack.c.bf16 %v6448_v4, %v6447_v14  ;;  %s6558_s5 = sshll.u32 %s8217_s4, 4  ;;  %s6559_s5 = int_to_ptr.vmem [resolvable:$true] %s6558_s5 }
 0x324   :  { %v5826_v8 = vadd.f32 %v5825_v48, %v5824_v30  ;;  %v7088_v48 = vld [vmem:[%s11128_s6] ss:$0 sm:$0xff]  ;;  %s8193_s6 = scalar_lea.vmem %s6559_s5, 256  ;;  %p8198_p1 = scmp.lt.s32.totalorder %s6559_s5, %s6559_s5 }
 0x325   :  { %7907 = vmatprep.subr.bf16.mxu1 %v7906_v28  ;;  %p8194_p0 = scmp.ne.s32.totalorder %s6559_s5, %s8193_s6  ;;  %p8199_p2 = scmp.lt.s32.totalorder %s8193_s6, %s8193_s6 }
 0x326   :  { %v5828_v61 = vadd.f32 %v5827_v47, %v5826_v8 }
 0x327   :  { %p8200_p3 = por %p8199_p2, %p8198_p1 }
 0x328   :  { %v5829_v3 = vrot.slane %v5828_v61, 4 }
 0x329   :  { %p8201_p4 = pnand %p8200_p3, %p8194_p0 }
 0x32a   :  { %v5830_v10 = vadd.f32 %v5829_v3, %v5828_v61 }
 0x32c   :  { %v5831_v35 = vrot.slane %v5830_v10, 2 }
 0x32e   :  { %v5832_v43 = vadd.f32 %v5831_v35, %v5830_v10 }
 0x330   :  { %v5833_v55 = vrot.slane %v5832_v43, 1 }
 0x332   :  { %v5834_v19 = vadd.f32 %v5833_v55, %v5832_v43 }
 0x334   :  { %v6359_v53 = vsel %vm6345_vm3, %v5903_v21, %v5834_v19 }
 0x335   :  { %v6360_v29 = vsel %vm6347_vm4, %v5972_v11, %v6359_v53 }
 0x336   :  { %v6361_v7 = vsel %vm6349_vm5, %v6041_v50, %v6360_v29 }
 0x337   :  { %v6362_v0 = vsel %vm6351_vm6, %v6110_v20, %v6361_v7 }
 0x338   :  { %v6363_v38 = vsel %vm6353_vm7, %v6179_v39, %v6362_v0 }
 0x339   :  { %v6364_v12 = vsel %vm6355_vm8, %v6248_v26, %v6363_v38 }
 0x33a   :  { %v6365_v51 = vsel %vm6357_vm9, %v6317_v5, %v6364_v12 }
 0x33b   :  { %7889 = vmatmul.mubr.msk.f32.vlgmr.msra.gmra.mrb[252].mxu1 %vm5213_vm2, %v6365_v51 }
 0x33c   :  { %7909 = vmatpush3.bf16.msra.mxu1 %v7906_v28 }
 0x40e   :  { %v7890_v59 = vpop.f32.mrb[252].mxu1 }
 0x40f   :  { %v6442_v17 = vadd.f32 %v7890_v59, %v7085_v27  ;;  %v6436_v22 = vpop.f32.mrb[253].mxu1 }
 0x410   :  { %v6437_v54 = vadd.f32 %v7085_v27, %v6436_v22 }
 0x411   :  { %v6446_v30 = vmax.f32 %v6442_v17, 0.0 }
 0x412   :  { %v6445_v49 = vmax.f32 %v6437_v54, 0.0 }
 0x414   :  { %7895 = vmatprep.mubr.msk.f32.mxu1 %vm6456_vm10, %v6445_v49 }
 0x415   :  { %7896 = vmatmul.mubr.msk.f32.vlgmr.msra.gmra.mrb[254].mxu1 %vm6456_vm10, %v6446_v30 }
 0x4e8   :  { %v7897_v25 = vpop.f32.mrb[254].mxu1 }
 0x4e9   :  { %v6535_v63 = vadd.f32 %v7897_v25, %v7088_v48  ;;  %v6529_v6 = vpop.f32.mrb[255].mxu1 }
 0x4ea   :  { %v6530_v37 = vadd.f32 %v7088_v48, %v6529_v6 }
 0x4eb   :  { %v7092_v8 = vmul.f32 -1.442695, %v6535_v63 }
 0x4ec   :  { %v7091_v15 = vmul.f32 -1.442695, %v6530_v37 }
 0x4ed   :  { %8180 = vpow2.f32 %v7092_v8 }
 0x4ee   :  { %8182 = vpow2.f32 %v7091_v15 }
 0x4f7   :  { %v8181_v47 = vpop.eup %8180 }
 0x4f8   :  { %v8183_v40 = vpop.eup %8182  ;;  %v6545_v24 = vadd.f32 1.0, %v8181_v47 }
 0x4f9   :  { %v6544_v56 = vadd.f32 1.0, %v8183_v40 }
 0x4fa   :  { %8184 = vrcp.f32 %v6545_v24 }
 0x4fb   :  { %8186 = vrcp.f32 %v6544_v56 }
 0x504   :  { %v8185_v61 = vpop.eup %8184 }
 0x505   :  { %v8187_v18 = vpop.eup %8186  ;;  %6552 = vst.msk [vmem:[#allocation2 + $0x8] sm:$0xff] %vm6550_vm11, %v8185_v61 }
 0x506   :  { %6551 = vst.msk [vmem:[#allocation2] sm:$0xff] %vm6550_vm11, %v8187_v18 }
 0x507   :  { %8204 = shalt.err (!%p8201_p4)
}
 0x508   :  { %s8205_s17 = scalar_lea.hbm %s11129_s7, 256 }
 0x509   :  { %p8206_p5 = scmp.ne.s32.totalorder %s11129_s7, %s8205_s17  ;;  %p8209_p6 = scmp.lt.u32.totalorder %s8205_s17, %s11129_s7 }
 0x50b   :  { %p8211_p7 = pnand %p8209_p6, %p8206_p5 }
 0x50d   :  { %8214 = shalt.err (!%p8211_p7)
}
 0x50e   :  { %s8218_s22 = smov 128   ;;  %s8219_s23 = smov 8  }
 0x50f   :  { %6564 = dma.vmem_to_hbm [thread:$0]  %s6559_s5, 256, %s11129_s7, [#allocation3], %s8218_s22, %s8218_s22, %s8219_s23  }
 0x510   :  { %8215 = dma.done.wait [#allocation3], 256  }
 0x511   :  { %8216 = vsyncadd [#allocation3], 4294967040 }
 0x512   :  { %6568 = vsyncpa [#allocation3], 1 }

</bundles_post_ra>
